<compile_context>
chip_gen: v6e
topology: v6e:2x2x1
jax: 0.10.0
libtpu: 0.0.40
codegen_flags: <defaults>
</compile_context>

<pallas_src>
import jax
import jax.numpy as jnp
from jax.experimental import pallas as pl
from jax.experimental.pallas import tpu as pltpu


def _round_up(x, m):
    return ((x + m - 1) // m) * m


def _fused_d_logits_kernel(xf_ref, y_ref, w1f_ref, w1y_ref, w2_ref, o_ref, acc_ref):
    """Fused conv1(3x3, pad=1) + LeakyReLU(0.2) + conv2(4x4, valid) for one batch tile.

    xf_ref : (4, 4, TB, Cf)   features, (H, W, batch, channel); NO spatial halo
    y_ref  : (TB, 256)        conditioning vector (spatially constant channels)
    w1f_ref: (9, Cf, Cm)      conv1 weights, feature-channel slice, tap-major
    w1y_ref: (9, 256, Cm)     conv1 weights, y-channel slice, tap-major
    w2_ref : (4, 4, 1, Cm)    conv2 weights (f32)
    o_ref  : (TB, 128)        logits broadcast across lanes (lane-dense store)
    acc_ref: (4, 4, TB, Cm)   f32 VMEM accumulator scratch
    """
    TB = xf_ref.shape[2]
    Cf = xf_ref.shape[3]
    Cm = w1f_ref.shape[2]

    acc_ref[...] = jnp.zeros_like(acc_ref)
    y = y_ref[...]                                   # (TB, 256), loaded once

    # 9-tap 3x3 convolution, fully unrolled.  Tap (kh, kw) reads input rows
    # [ii0, ii0+nh) / cols [jj0, jj0+nw) (the only positions where conv1's
    # zero-padding does not apply) and contributes to output rows [oi0, oi0+nh)
    # / cols [oj0, oj0+nw).  The y channels are spatially constant inside the
    # unpadded 4x4 region and zero in the padding ring, so their contribution
    # for tap t is a single (TB,256)@(256,Cm) dot added over the same window.
    for kh in range(3):
        ii0 = max(kh - 1, 0)
        nh = 4 if kh == 1 else 3
        oi0 = ii0 - (kh - 1)
        for kw in range(3):
            t = kh * 3 + kw
            jj0 = max(kw - 1, 0)
            nw = 4 if kw == 1 else 3
            oj0 = jj0 - (kw - 1)

            win = xf_ref[ii0:ii0 + nh, jj0:jj0 + nw, :, :]          # (nh,nw,TB,Cf)
            part = jnp.dot(win.reshape(nh * nw * TB, Cf), w1f_ref[t],
                           preferred_element_type=jnp.float32)       # (nh*nw*TB,Cm)
            yt = jnp.dot(y, w1y_ref[t],
                         preferred_element_type=jnp.float32)         # (TB, Cm)
            acc_ref[oi0:oi0 + nh, oj0:oj0 + nw, :, :] += (
                part.reshape(nh, nw, TB, Cm) + yt[None, None, :, :])

    # LeakyReLU(0.2) on the f32 accumulator, then conv2 epilogue:
    # 4x4 "valid" conv over a 4x4 map == per-batch weighted sum over (h, w, c).
    h = acc_ref[...]
    h = jnp.where(h >= 0.0, h, 0.2 * h)                              # (4,4,TB,Cm)
    prod = h * w2_ref[...]                                           # bcast over TB
    s = jnp.sum(prod, axis=3, keepdims=True)                         # (4,4,TB,1)
    tot = jnp.sum(s, axis=(0, 1))                                    # (TB,1)
    # Lane-dense, unmasked store: broadcast the per-batch logit across 128 lanes.
    o_ref[...] = jnp.broadcast_to(tot, (TB, o_ref.shape[1]))


def _pick_tile_and_vmem(B, cf_pad, cm_pad, itemsize):
    """Pick the batch-tile size and vmem_limit_bytes from the actual per-tile /
    weight footprint and the chip's physical VMEM (generation-aware)."""
    try:
        vmem_cap = int(pltpu.get_tpu_info().vmem_capacity_bytes)
    except Exception:  # no TPU visible at trace time (e.g. interpret mode)
        vmem_cap = 64 * 1024 * 1024          # conservative (v7x per-TensorCore)
    budget = int(vmem_cap * 0.75)

    sub = 8 if itemsize >= 4 else 16         # sublane tile (bf16 packs 2 rows)

    # Grid-invariant weights: constant block index so Pallas does not re-DMA them,
    # but budget for 2x buffers (no pl.Buffered(1) request; stay portable).
    w_bytes = 2 * ((9 * cf_pad * cm_pad + 9 * 256 * cm_pad) * itemsize
                   + 16 * cm_pad * 4)
    # Per-batch-row bytes: 2x-buffered inputs/output + f32 acc scratch + f32 temps.
    per_row = (2 * 16 * cf_pad * itemsize    # feature tile (double buffered)
               + 16 * cf_pad * itemsize      # in-kernel window copies (headroom)
               + 2 * 256 * itemsize          # y tile (double buffered)
               + 2 * 128 * 4                 # lane-dense output tile
               + 3 * 16 * cm_pad * 4)        # acc scratch + dot/epilogue temps
    avail = max(budget - w_bytes - (4 << 20), per_row * sub)
    tb = max(sub, min(256, (avail // per_row) // sub * sub))

    # Never tile past the (padded) batch; when the batch allows, keep >=~4 grid
    # steps so ("parallel",) shards across TensorCores (v7x) and the DMA pipeline
    # has work to overlap.  Single step is unavoidable for tiny batches.
    tb = min(tb, _round_up(B, sub))
    if B > sub:
        tb = min(tb, max(sub, _round_up(-(-B // 4), sub)))

    b_pad = _round_up(B, tb)
    total = w_bytes + per_row * tb + (4 << 20)
    vmem_limit = int(min(max(total, 32 << 20), int(vmem_cap * 0.9)))
    return tb, b_pad, vmem_limit


def d_get_logits_forward(out_feat, y, w1, w2, ndf, compute_dtype=jnp.bfloat16):
    """out_feat: (B, ndf*16, 4, 4) NCHW, y: (B, 256).
    w1: (ndf*2, ndf*16+256, 3, 3) OIHW, w2: (1, ndf*2, 4, 4) OIHW.
    Returns logits of shape (B, 1, 1, 1) matching the PyTorch module."""
    B = out_feat.shape[0]
    Cf = ndf * 16
    Cin = Cf + 256
    Cmid = ndf * 2
    H = W = 4
    assert out_feat.shape == (B, Cf, H, W)
    assert y.shape == (B, 256)
    assert w1.shape == (Cmid, Cin, 3, 3)
    assert w2.shape == (1, Cmid, H, W)

    cf_pad = _round_up(Cf, 128)      # lane-align K; zero pad is numerically a no-op
    cm_pad = _round_up(Cmid, 128)    # padded out-channels have zero weights
    itemsize = jnp.dtype(compute_dtype).itemsize
    tb, b_pad, vmem_limit = _pick_tile_and_vmem(B, cf_pad, cm_pad, itemsize)
    n_tiles = b_pad // tb

    # ---- layout glue (transpose / pad / cast only; no halo, no y replication) ----
    # TODO(synk): have the upstream layer emit (H, W, B, C) directly to remove this
    # transpose+copy HBM pass entirely.
    xf = jnp.transpose(out_feat, (2, 3, 0, 1))                        # (4,4,B,Cf)
    xf = jnp.pad(xf, ((0, 0), (0, 0), (0, b_pad - B), (0, cf_pad - Cf)))
    xf = xf.astype(compute_dtype)

    yb = jnp.pad(y, ((0, b_pad - B), (0, 0))).astype(compute_dtype)

    # conv1 weights OIHW -> (kh, kw, cin, cout); split feature / y channel slices
    # (concat order in the module is [features, y]).
    w1_t = jnp.transpose(w1, (2, 3, 1, 0))                            # (3,3,Cin,Cmid)
    w1f = w1_t[:, :, :Cf, :].reshape(9, Cf, Cmid)
    w1f = jnp.pad(w1f, ((0, 0), (0, cf_pad - Cf), (0, cm_pad - Cmid)))
    w1f = w1f.astype(compute_dtype)
    w1y = w1_t[:, :, Cf:, :].reshape(9, 256, Cmid)
    w1y = jnp.pad(w1y, ((0, 0), (0, 0), (0, cm_pad - Cmid))).astype(compute_dtype)

    # conv2 weight OIHW (1,Cmid,4,4) -> (4,4,1,Cmid); kept f32 (applied to f32 acc).
    w2_t = jnp.transpose(w2, (2, 3, 0, 1))
    w2_t = jnp.pad(w2_t, ((0, 0), (0, 0), (0, 0), (0, cm_pad - Cmid)))
    w2_t = w2_t.astype(jnp.float32)

    out = pl.pallas_call(
        _fused_d_logits_kernel,
        out_shape=jax.ShapeDtypeStruct((b_pad, 128), jnp.float32),
        grid=(n_tiles,),
        in_specs=[
            pl.BlockSpec((4, 4, tb, cf_pad), lambda i: (0, 0, i, 0)),
            pl.BlockSpec((tb, 256), lambda i: (i, 0)),
            pl.BlockSpec((9, cf_pad, cm_pad), lambda i: (0, 0, 0)),
            pl.BlockSpec((9, 256, cm_pad), lambda i: (0, 0, 0)),
            pl.BlockSpec((4, 4, 1, cm_pad), lambda i: (0, 0, 0, 0)),
        ],
        out_specs=pl.BlockSpec((tb, 128), lambda i: (i, 0)),
        scratch_shapes=[pltpu.VMEM((4, 4, tb, cm_pad), jnp.float32)],
        compiler_params=pltpu.CompilerParams(
            dimension_semantics=("parallel",),
            vmem_limit_bytes=vmem_limit,
        ),
    )(xf, yb, w1f, w1y, w2_t)

    return out[:B, 0].reshape(B, 1, 1, 1)


def reference(out_feat, y, w1, w2, ndf):
    """Pure-JAX reference (lax conv) mirroring the PyTorch forward."""
    B = out_feat.shape[0]
    y_rep = jnp.broadcast_to(y.reshape(B, 256, 1, 1), (B, 256, 4, 4))
    x = jnp.concatenate([out_feat, y_rep], axis=1)
    h = jax.lax.conv_general_dilated(
        x, w1, window_strides=(1, 1), padding=((1, 1), (1, 1)),
        dimension_numbers=("NCHW", "OIHW", "NCHW"))
    h = jnp.where(h >= 0, h, 0.2 * h)
    o = jax.lax.conv_general_dilated(
        h, w2, window_strides=(1, 1), padding=((0, 0), (0, 0)),
        dimension_numbers=("NCHW", "OIHW", "NCHW"))
    return o


if __name__ == "__main__":
    def run_case(ndf, B, key, dtype, atol, rtol):
        Cf = ndf * 16
        Cin = Cf + 256
        Cmid = ndf * 2
        k1, k2, k3, k4 = jax.random.split(key, 4)
        out_feat = jax.random.normal(k1, (B, Cf, 4, 4), dtype=jnp.float32)
        y = jax.random.normal(k2, (B, 256), dtype=jnp.float32)
        w1 = 0.02 * jax.random.normal(k3, (Cmid, Cin, 3, 3), dtype=jnp.float32)
        w2 = 0.02 * jax.random.normal(k4, (1, Cmid, 4, 4), dtype=jnp.float32)

        fwd = jax.jit(d_get_logits_forward, static_argnums=(4, 5))
        res = fwd(out_feat, y, w1, w2, ndf, dtype)
        jax.block_until_ready(res)
        ref = reference(out_feat, y, w1, w2, ndf)
        assert res.shape == (B, 1, 1, 1), res.shape
        assert jnp.allclose(res, ref, atol=atol, rtol=rtol), (res, ref)

    key = jax.random.PRNGKey(0)
    k_small, k_multi = jax.random.split(key)

    # Small single-tile case: f32 structural check + bf16 (perf dtype) check.
    run_case(ndf=4, B=2, key=k_small, dtype=jnp.float32, atol=1e-3, rtol=1e-3)
    run_case(ndf=4, B=2, key=k_small, dtype=jnp.bfloat16, atol=5e-2, rtol=5e-2)

    # Multi-tile case (several grid steps + batch padding path).
    run_case(ndf=16, B=40, key=k_multi, dtype=jnp.float32, atol=2e-3, rtol=2e-3)

    print("KERNEL_OK")
</pallas_src>

<mosaic_0001>
module attributes {stable_mosaic.version = 11 : i64} {
  func.func @_fused_d_logits_kernel(%arg0: i32, %arg1: memref<4x4x8x128xf32, #tpu.memory_space<vmem>>, %arg2: memref<8x256xf32, #tpu.memory_space<vmem>>, %arg3: memref<9x128x128xf32, #tpu.memory_space<vmem>>, %arg4: memref<9x256x128xf32, #tpu.memory_space<vmem>>, %arg5: memref<4x4x1x128xf32, #tpu.memory_space<vmem>>, %arg6: memref<8x128xf32, #tpu.memory_space<vmem>>, %arg7: memref<4x4x8x128xf32, #tpu.memory_space<vmem>>) attributes {dimension_semantics = [#tpu.dimension_semantics<parallel>], iteration_bounds = array<i64: 1>, scalar_prefetch = 0 : i64, scratch_operands = 1 : i64, tpu.core_type = #tpu.core_type<tc>, window_params = [{transform_indices = @transform_0, window_bounds = array<i64: 4, 4, 8, 128>}, {transform_indices = @transform_1, window_bounds = array<i64: 8, 256>}, {pipeline_mode = #tpu.pipeline_mode<synchronous>, transform_indices = @transform_2, window_bounds = array<i64: 9, 128, 128>}, {pipeline_mode = #tpu.pipeline_mode<synchronous>, transform_indices = @transform_3, window_bounds = array<i64: 9, 256, 128>}, {pipeline_mode = #tpu.pipeline_mode<synchronous>, transform_indices = @transform_4, window_bounds = array<i64: 4, 4, 1, 128>}, {transform_indices = @transform_5, window_bounds = array<i64: 8, 128>}]} {
    %cst = arith.constant 0.000000e+00 : f32
    %0 = vector.broadcast %cst : f32 to vector<4x4x8x128xf32>
    %c0 = arith.constant 0 : index
    %c0_0 = arith.constant 0 : index
    %c0_1 = arith.constant 0 : index
    %c0_2 = arith.constant 0 : index
    %1 = vector.load %arg7[%c0, %c0_0, %c0_1, %c0_2] : memref<4x4x8x128xf32, #tpu.memory_space<vmem>>, vector<4x4x8x128xf32>
    tpu.vector_store %arg7[%c0, %c0_0, %c0_1, %c0_2], %0 {strides = array<i32>} : memref<4x4x8x128xf32, #tpu.memory_space<vmem>>, vector<4x4x8x128xf32>,
    %c0_3 = arith.constant 0 : index
    %c0_4 = arith.constant 0 : index
    %2 = vector.load %arg2[%c0_3, %c0_4] : memref<8x256xf32, #tpu.memory_space<vmem>>, vector<8x256xf32>
    %c0_5 = arith.constant 0 : index
    %c0_6 = arith.constant 0 : index
    %c0_7 = arith.constant 0 : index
    %c0_8 = arith.constant 0 : index
    %3 = vector.load %arg1[%c0_5, %c0_6, %c0_7, %c0_8] : memref<4x4x8x128xf32, #tpu.memory_space<vmem>>, vector<3x3x8x128xf32>
    %4 = vector.shape_cast %3 : vector<3x3x8x128xf32> to vector<72x128xf32>
    %c0_9 = arith.constant 0 : index
    %c0_10 = arith.constant 0 : index
    %c0_11 = arith.constant 0 : index
    %5 = vector.load %arg3[%c0_9, %c0_10, %c0_11] : memref<9x128x128xf32, #tpu.memory_space<vmem>>, vector<1x128x128xf32>
    %6 = vector.shape_cast %5 : vector<1x128x128xf32> to vector<128x128xf32>
    %cst_12 = arith.constant dense<0.000000e+00> : vector<72x128xf32>
    %7 = tpu.matmul %4, %6, %cst_12 {dimension_numbers = #tpu.dot_dimension_numbers<[1], [0], [0], [1], [0, 0, 1, 1], [], []>} : vector<72x128xf32>, vector<128x128xf32>, vector<72x128xf32> -> vector<72x128xf32>
    %c0_13 = arith.constant 0 : index
    %c0_14 = arith.constant 0 : index
    %c0_15 = arith.constant 0 : index
    %8 = vector.load %arg4[%c0_13, %c0_14, %c0_15] : memref<9x256x128xf32, #tpu.memory_space<vmem>>, vector<1x256x128xf32>
    %9 = vector.shape_cast %8 : vector<1x256x128xf32> to vector<256x128xf32>
    %cst_16 = arith.constant dense<0.000000e+00> : vector<8x128xf32>
    %10 = tpu.matmul %2, %9, %cst_16 {dimension_numbers = #tpu.dot_dimension_numbers<[1], [0], [0], [1], [0, 0, 1, 1], [], []>} : vector<8x256xf32>, vector<256x128xf32>, vector<8x128xf32> -> vector<8x128xf32>
    %c1 = arith.constant 1 : index
    %c1_17 = arith.constant 1 : index
    %c0_18 = arith.constant 0 : index
    %c0_19 = arith.constant 0 : index
    %11 = vector.load %arg7[%c1, %c1_17, %c0_18, %c0_19] : memref<4x4x8x128xf32, #tpu.memory_space<vmem>>, vector<3x3x8x128xf32>
    %12 = vector.shape_cast %7 : vector<72x128xf32> to vector<3x3x8x128xf32>
    %13 = vector.shape_cast %10 : vector<8x128xf32> to vector<1x1x8x128xf32>
    %14 = vector.broadcast %13 : vector<1x1x8x128xf32> to vector<3x3x8x128xf32>
    %15 = arith.addf %12, %14 : vector<3x3x8x128xf32>
    %16 = arith.addf %11, %15 : vector<3x3x8x128xf32>
    %c1_20 = arith.constant 1 : index
    %c1_21 = arith.constant 1 : index
    %c0_22 = arith.constant 0 : index
    %c0_23 = arith.constant 0 : index
    %17 = vector.load %arg7[%c1_20, %c1_21, %c0_22, %c0_23] : memref<4x4x8x128xf32, #tpu.memory_space<vmem>>, vector<3x3x8x128xf32>
    tpu.vector_store %arg7[%c1_20, %c1_21, %c0_22, %c0_23], %16 {strides = array<i32>} : memref<4x4x8x128xf32, #tpu.memory_space<vmem>>, vector<3x3x8x128xf32>,
    %c0_24 = arith.constant 0 : index
    %c0_25 = arith.constant 0 : index
    %c0_26 = arith.constant 0 : index
    %c0_27 = arith.constant 0 : index
    %18 = vector.load %arg1[%c0_24, %c0_25, %c0_26, %c0_27] : memref<4x4x8x128xf32, #tpu.memory_space<vmem>>, vector<3x4x8x128xf32>
    %19 = vector.shape_cast %18 : vector<3x4x8x128xf32> to vector<96x128xf32>
    %c1_28 = arith.constant 1 : index
    %c0_29 = arith.constant 0 : index
    %c0_30 = arith.constant 0 : index
    %20 = vector.load %arg3[%c1_28, %c0_29, %c0_30] : memref<9x128x128xf32, #tpu.memory_space<vmem>>, vector<1x128x128xf32>
    %21 = vector.shape_cast %20 : vector<1x128x128xf32> to vector<128x128xf32>
    %cst_31 = arith.constant dense<0.000000e+00> : vector<96x128xf32>
    %22 = tpu.matmul %19, %21, %cst_31 {dimension_numbers = #tpu.dot_dimension_numbers<[1], [0], [0], [1], [0, 0, 1, 1], [], []>} : vector<96x128xf32>, vector<128x128xf32>, vector<96x128xf32> -> vector<96x128xf32>
    %c1_32 = arith.constant 1 : index
    %c0_33 = arith.constant 0 : index
    %c0_34 = arith.constant 0 : index
    %23 = vector.load %arg4[%c1_32, %c0_33, %c0_34] : memref<9x256x128xf32, #tpu.memory_space<vmem>>, vector<1x256x128xf32>
    %24 = vector.shape_cast %23 : vector<1x256x128xf32> to vector<256x128xf32>
    %cst_35 = arith.constant dense<0.000000e+00> : vector<8x128xf32>
    %25 = tpu.matmul %2, %24, %cst_35 {dimension_numbers = #tpu.dot_dimension_numbers<[1], [0], [0], [1], [0, 0, 1, 1], [], []>} : vector<8x256xf32>, vector<256x128xf32>, vector<8x128xf32> -> vector<8x128xf32>
    %c1_36 = arith.constant 1 : index
    %c0_37 = arith.constant 0 : index
    %c0_38 = arith.constant 0 : index
    %c0_39 = arith.constant 0 : index
    %26 = vector.load %arg7[%c1_36, %c0_37, %c0_38, %c0_39] : memref<4x4x8x128xf32, #tpu.memory_space<vmem>>, vector<3x4x8x128xf32>
    %27 = vector.shape_cast %22 : vector<96x128xf32> to vector<3x4x8x128xf32>
    %28 = vector.shape_cast %25 : vector<8x128xf32> to vector<1x1x8x128xf32>
    %29 = vector.broadcast %28 : vector<1x1x8x128xf32> to vector<3x4x8x128xf32>
    %30 = arith.addf %27, %29 : vector<3x4x8x128xf32>
    %31 = arith.addf %26, %30 : vector<3x4x8x128xf32>
    %c1_40 = arith.constant 1 : index
    %c0_41 = arith.constant 0 : index
    %c0_42 = arith.constant 0 : index
    %c0_43 = arith.constant 0 : index
    %32 = vector.load %arg7[%c1_40, %c0_41, %c0_42, %c0_43] : memref<4x4x8x128xf32, #tpu.memory_space<vmem>>, vector<3x4x8x128xf32>
    tpu.vector_store %arg7[%c1_40, %c0_41, %c0_42, %c0_43], %31 {strides = array<i32>} : memref<4x4x8x128xf32, #tpu.memory_space<vmem>>, vector<3x4x8x128xf32>,
    %c0_44 = arith.constant 0 : index
    %c1_45 = arith.constant 1 : index
    %c0_46 = arith.constant 0 : index
    %c0_47 = arith.constant 0 : index
    %33 = vector.load %arg1[%c0_44, %c1_45, %c0_46, %c0_47] : memref<4x4x8x128xf32, #tpu.memory_space<vmem>>, vector<3x3x8x128xf32>
    %34 = vector.shape_cast %33 : vector<3x3x8x128xf32> to vector<72x128xf32>
    %c2 = arith.constant 2 : index
    %c0_48 = arith.constant 0 : index
    %c0_49 = arith.constant 0 : index
    %35 = vector.load %arg3[%c2, %c0_48, %c0_49] : memref<9x128x128xf32, #tpu.memory_space<vmem>>, vector<1x128x128xf32>
    %36 = vector.shape_cast %35 : vector<1x128x128xf32> to vector<128x128xf32>
    %cst_50 = arith.constant dense<0.000000e+00> : vector<72x128xf32>
    %37 = tpu.matmul %34, %36, %cst_50 {dimension_numbers = #tpu.dot_dimension_numbers<[1], [0], [0], [1], [0, 0, 1, 1], [], []>} : vector<72x128xf32>, vector<128x128xf32>, vector<72x128xf32> -> vector<72x128xf32>
    %c2_51 = arith.constant 2 : index
    %c0_52 = arith.constant 0 : index
    %c0_53 = arith.constant 0 : index
    %38 = vector.load %arg4[%c2_51, %c0_52, %c0_53] : memref<9x256x128xf32, #tpu.memory_space<vmem>>, vector<1x256x128xf32>
    %39 = vector.shape_cast %38 : vector<1x256x128xf32> to vector<256x128xf32>
    %cst_54 = arith.constant dense<0.000000e+00> : vector<8x128xf32>
    %40 = tpu.matmul %2, %39, %cst_54 {dimension_numbers = #tpu.dot_dimension_numbers<[1], [0], [0], [1], [0, 0, 1, 1], [], []>} : vector<8x256xf32>, vector<256x128xf32>, vector<8x128xf32> -> vector<8x128xf32>
    %c1_55 = arith.constant 1 : index
    %c0_56 = arith.constant 0 : index
    %c0_57 = arith.constant 0 : index
    %c0_58 = arith.constant 0 : index
    %41 = vector.load %arg7[%c1_55, %c0_56, %c0_57, %c0_58] : memref<4x4x8x128xf32, #tpu.memory_space<vmem>>, vector<3x3x8x128xf32>
    %42 = vector.shape_cast %37 : vector<72x128xf32> to vector<3x3x8x128xf32>
    %43 = vector.shape_cast %40 : vector<8x128xf32> to vector<1x1x8x128xf32>
    %44 = vector.broadcast %43 : vector<1x1x8x128xf32> to vector<3x3x8x128xf32>
    %45 = arith.addf %42, %44 : vector<3x3x8x128xf32>
    %46 = arith.addf %41, %45 : vector<3x3x8x128xf32>
    %c1_59 = arith.constant 1 : index
    %c0_60 = arith.constant 0 : index
    %c0_61 = arith.constant 0 : index
    %c0_62 = arith.constant 0 : index
    %47 = vector.load %arg7[%c1_59, %c0_60, %c0_61, %c0_62] : memref<4x4x8x128xf32, #tpu.memory_space<vmem>>, vector<3x3x8x128xf32>
    tpu.vector_store %arg7[%c1_59, %c0_60, %c0_61, %c0_62], %46 {strides = array<i32>} : memref<4x4x8x128xf32, #tpu.memory_space<vmem>>, vector<3x3x8x128xf32>,
    %c0_63 = arith.constant 0 : index
    %c0_64 = arith.constant 0 : index
    %c0_65 = arith.constant 0 : index
    %c0_66 = arith.constant 0 : index
    %48 = vector.load %arg1[%c0_63, %c0_64, %c0_65, %c0_66] : memref<4x4x8x128xf32, #tpu.memory_space<vmem>>, vector<4x3x8x128xf32>
    %49 = vector.shape_cast %48 : vector<4x3x8x128xf32> to vector<96x128xf32>
    %c3 = arith.constant 3 : index
    %c0_67 = arith.constant 0 : index
    %c0_68 = arith.constant 0 : index
    %50 = vector.load %arg3[%c3, %c0_67, %c0_68] : memref<9x128x128xf32, #tpu.memory_space<vmem>>, vector<1x128x128xf32>
    %51 = vector.shape_cast %50 : vector<1x128x128xf32> to vector<128x128xf32>
    %cst_69 = arith.constant dense<0.000000e+00> : vector<96x128xf32>
    %52 = tpu.matmul %49, %51, %cst_69 {dimension_numbers = #tpu.dot_dimension_numbers<[1], [0], [0], [1], [0, 0, 1, 1], [], []>} : vector<96x128xf32>, vector<128x128xf32>, vector<96x128xf32> -> vector<96x128xf32>
    %c3_70 = arith.constant 3 : index
    %c0_71 = arith.constant 0 : index
    %c0_72 = arith.constant 0 : index
    %53 = vector.load %arg4[%c3_70, %c0_71, %c0_72] : memref<9x256x128xf32, #tpu.memory_space<vmem>>, vector<1x256x128xf32>
    %54 = vector.shape_cast %53 : vector<1x256x128xf32> to vector<256x128xf32>
    %cst_73 = arith.constant dense<0.000000e+00> : vector<8x128xf32>
    %55 = tpu.matmul %2, %54, %cst_73 {dimension_numbers = #tpu.dot_dimension_numbers<[1], [0], [0], [1], [0, 0, 1, 1], [], []>} : vector<8x256xf32>, vector<256x128xf32>, vector<8x128xf32> -> vector<8x128xf32>
    %c0_74 = arith.constant 0 : index
    %c1_75 = arith.constant 1 : index
    %c0_76 = arith.constant 0 : index
    %c0_77 = arith.constant 0 : index
    %56 = vector.load %arg7[%c0_74, %c1_75, %c0_76, %c0_77] : memref<4x4x8x128xf32, #tpu.memory_space<vmem>>, vector<4x3x8x128xf32>
    %57 = vector.shape_cast %52 : vector<96x128xf32> to vector<4x3x8x128xf32>
    %58 = vector.shape_cast %55 : vector<8x128xf32> to vector<1x1x8x128xf32>
    %59 = vector.broadcast %58 : vector<1x1x8x128xf32> to vector<4x3x8x128xf32>
    %60 = arith.addf %57, %59 : vector<4x3x8x128xf32>
    %61 = arith.addf %56, %60 : vector<4x3x8x128xf32>
    %c0_78 = arith.constant 0 : index
    %c1_79 = arith.constant 1 : index
    %c0_80 = arith.constant 0 : index
    %c0_81 = arith.constant 0 : index
    %62 = vector.load %arg7[%c0_78, %c1_79, %c0_80, %c0_81] : memref<4x4x8x128xf32, #tpu.memory_space<vmem>>, vector<4x3x8x128xf32>
    tpu.vector_store %arg7[%c0_78, %c1_79, %c0_80, %c0_81], %61 {strides = array<i32>} : memref<4x4x8x128xf32, #tpu.memory_space<vmem>>, vector<4x3x8x128xf32>,
    %c0_82 = arith.constant 0 : index
    %c0_83 = arith.constant 0 : index
    %c0_84 = arith.constant 0 : index
    %c0_85 = arith.constant 0 : index
    %63 = vector.load %arg1[%c0_82, %c0_83, %c0_84, %c0_85] : memref<4x4x8x128xf32, #tpu.memory_space<vmem>>, vector<4x4x8x128xf32>
    %64 = vector.shape_cast %63 : vector<4x4x8x128xf32> to vector<128x128xf32>
    %c4 = arith.constant 4 : index
    %c0_86 = arith.constant 0 : index
    %c0_87 = arith.constant 0 : index
    %65 = vector.load %arg3[%c4, %c0_86, %c0_87] : memref<9x128x128xf32, #tpu.memory_space<vmem>>, vector<1x128x128xf32>
    %66 = vector.shape_cast %65 : vector<1x128x128xf32> to vector<128x128xf32>
    %cst_88 = arith.constant dense<0.000000e+00> : vector<128x128xf32>
    %67 = tpu.matmul %64, %66, %cst_88 {dimension_numbers = #tpu.dot_dimension_numbers<[1], [0], [0], [1], [0, 0, 1, 1], [], []>} : vector<128x128xf32>, vector<128x128xf32>, vector<128x128xf32> -> vector<128x128xf32>
    %c4_89 = arith.constant 4 : index
    %c0_90 = arith.constant 0 : index
    %c0_91 = arith.constant 0 : index
    %68 = vector.load %arg4[%c4_89, %c0_90, %c0_91] : memref<9x256x128xf32, #tpu.memory_space<vmem>>, vector<1x256x128xf32>
    %69 = vector.shape_cast %68 : vector<1x256x128xf32> to vector<256x128xf32>
    %cst_92 = arith.constant dense<0.000000e+00> : vector<8x128xf32>
    %70 = tpu.matmul %2, %69, %cst_92 {dimension_numbers = #tpu.dot_dimension_numbers<[1], [0], [0], [1], [0, 0, 1, 1], [], []>} : vector<8x256xf32>, vector<256x128xf32>, vector<8x128xf32> -> vector<8x128xf32>
    %c0_93 = arith.constant 0 : index
    %c0_94 = arith.constant 0 : index
    %c0_95 = arith.constant 0 : index
    %c0_96 = arith.constant 0 : index
    %71 = vector.load %arg7[%c0_93, %c0_94, %c0_95, %c0_96] : memref<4x4x8x128xf32, #tpu.memory_space<vmem>>, vector<4x4x8x128xf32>
    %72 = vector.shape_cast %67 : vector<128x128xf32> to vector<4x4x8x128xf32>
    %73 = vector.shape_cast %70 : vector<8x128xf32> to vector<1x1x8x128xf32>
    %74 = vector.broadcast %73 : vector<1x1x8x128xf32> to vector<4x4x8x128xf32>
    %75 = arith.addf %72, %74 : vector<4x4x8x128xf32>
    %76 = arith.addf %71, %75 : vector<4x4x8x128xf32>
    %c0_97 = arith.constant 0 : index
    %c0_98 = arith.constant 0 : index
    %c0_99 = arith.constant 0 : index
    %c0_100 = arith.constant 0 : index
    %77 = vector.load %arg7[%c0_97, %c0_98, %c0_99, %c0_100] : memref<4x4x8x128xf32, #tpu.memory_space<vmem>>, vector<4x4x8x128xf32>
    tpu.vector_store %arg7[%c0_97, %c0_98, %c0_99, %c0_100], %76 {strides = array<i32>} : memref<4x4x8x128xf32, #tpu.memory_space<vmem>>, vector<4x4x8x128xf32>,
    %c0_101 = arith.constant 0 : index
    %c1_102 = arith.constant 1 : index
    %c0_103 = arith.constant 0 : index
    %c0_104 = arith.constant 0 : index
    %78 = vector.load %arg1[%c0_101, %c1_102, %c0_103, %c0_104] : memref<4x4x8x128xf32, #tpu.memory_space<vmem>>, vector<4x3x8x128xf32>
    %79 = vector.shape_cast %78 : vector<4x3x8x128xf32> to vector<96x128xf32>
    %c5 = arith.constant 5 : index
    %c0_105 = arith.constant 0 : index
    %c0_106 = arith.constant 0 : index
    %80 = vector.load %arg3[%c5, %c0_105, %c0_106] : memref<9x128x128xf32, #tpu.memory_space<vmem>>, vector<1x128x128xf32>
    %81 = vector.shape_cast %80 : vector<1x128x128xf32> to vector<128x128xf32>
    %cst_107 = arith.constant dense<0.000000e+00> : vector<96x128xf32>
    %82 = tpu.matmul %79, %81, %cst_107 {dimension_numbers = #tpu.dot_dimension_numbers<[1], [0], [0], [1], [0, 0, 1, 1], [], []>} : vector<96x128xf32>, vector<128x128xf32>, vector<96x128xf32> -> vector<96x128xf32>
    %c5_108 = arith.constant 5 : index
    %c0_109 = arith.constant 0 : index
    %c0_110 = arith.constant 0 : index
    %83 = vector.load %arg4[%c5_108, %c0_109, %c0_110] : memref<9x256x128xf32, #tpu.memory_space<vmem>>, vector<1x256x128xf32>
    %84 = vector.shape_cast %83 : vector<1x256x128xf32> to vector<256x128xf32>
    %cst_111 = arith.constant dense<0.000000e+00> : vector<8x128xf32>
    %85 = tpu.matmul %2, %84, %cst_111 {dimension_numbers = #tpu.dot_dimension_numbers<[1], [0], [0], [1], [0, 0, 1, 1], [], []>} : vector<8x256xf32>, vector<256x128xf32>, vector<8x128xf32> -> vector<8x128xf32>
    %c0_112 = arith.constant 0 : index
    %c0_113 = arith.constant 0 : index
    %c0_114 = arith.constant 0 : index
    %c0_115 = arith.constant 0 : index
    %86 = vector.load %arg7[%c0_112, %c0_113, %c0_114, %c0_115] : memref<4x4x8x128xf32, #tpu.memory_space<vmem>>, vector<4x3x8x128xf32>
    %87 = vector.shape_cast %82 : vector<96x128xf32> to vector<4x3x8x128xf32>
    %88 = vector.shape_cast %85 : vector<8x128xf32> to vector<1x1x8x128xf32>
    %89 = vector.broadcast %88 : vector<1x1x8x128xf32> to vector<4x3x8x128xf32>
    %90 = arith.addf %87, %89 : vector<4x3x8x128xf32>
    %91 = arith.addf %86, %90 : vector<4x3x8x128xf32>
    %c0_116 = arith.constant 0 : index
    %c0_117 = arith.constant 0 : index
    %c0_118 = arith.constant 0 : index
    %c0_119 = arith.constant 0 : index
    %92 = vector.load %arg7[%c0_116, %c0_117, %c0_118, %c0_119] : memref<4x4x8x128xf32, #tpu.memory_space<vmem>>, vector<4x3x8x128xf32>
    tpu.vector_store %arg7[%c0_116, %c0_117, %c0_118, %c0_119], %91 {strides = array<i32>} : memref<4x4x8x128xf32, #tpu.memory_space<vmem>>, vector<4x3x8x128xf32>,
    %c1_120 = arith.constant 1 : index
    %c0_121 = arith.constant 0 : index
    %c0_122 = arith.constant 0 : index
    %c0_123 = arith.constant 0 : index
    %93 = vector.load %arg1[%c1_120, %c0_121, %c0_122, %c0_123] : memref<4x4x8x128xf32, #tpu.memory_space<vmem>>, vector<3x3x8x128xf32>
    %94 = vector.shape_cast %93 : vector<3x3x8x128xf32> to vector<72x128xf32>
    %c6 = arith.constant 6 : index
    %c0_124 = arith.constant 0 : index
    %c0_125 = arith.constant 0 : index
    %95 = vector.load %arg3[%c6, %c0_124, %c0_125] : memref<9x128x128xf32, #tpu.memory_space<vmem>>, vector<1x128x128xf32>
    %96 = vector.shape_cast %95 : vector<1x128x128xf32> to vector<128x128xf32>
    %cst_126 = arith.constant dense<0.000000e+00> : vector<72x128xf32>
    %97 = tpu.matmul %94, %96, %cst_126 {dimension_numbers = #tpu.dot_dimension_numbers<[1], [0], [0], [1], [0, 0, 1, 1], [], []>} : vector<72x128xf32>, vector<128x128xf32>, vector<72x128xf32> -> vector<72x128xf32>
    %c6_127 = arith.constant 6 : index
    %c0_128 = arith.constant 0 : index
    %c0_129 = arith.constant 0 : index
    %98 = vector.load %arg4[%c6_127, %c0_128, %c0_129] : memref<9x256x128xf32, #tpu.memory_space<vmem>>, vector<1x256x128xf32>
    %99 = vector.shape_cast %98 : vector<1x256x128xf32> to vector<256x128xf32>
    %cst_130 = arith.constant dense<0.000000e+00> : vector<8x128xf32>
    %100 = tpu.matmul %2, %99, %cst_130 {dimension_numbers = #tpu.dot_dimension_numbers<[1], [0], [0], [1], [0, 0, 1, 1], [], []>} : vector<8x256xf32>, vector<256x128xf32>, vector<8x128xf32> -> vector<8x128xf32>
    %c0_131 = arith.constant 0 : index
    %c1_132 = arith.constant 1 : index
    %c0_133 = arith.constant 0 : index
    %c0_134 = arith.constant 0 : index
    %101 = vector.load %arg7[%c0_131, %c1_132, %c0_133, %c0_134] : memref<4x4x8x128xf32, #tpu.memory_space<vmem>>, vector<3x3x8x128xf32>
    %102 = vector.shape_cast %97 : vector<72x128xf32> to vector<3x3x8x128xf32>
    %103 = vector.shape_cast %100 : vector<8x128xf32> to vector<1x1x8x128xf32>
    %104 = vector.broadcast %103 : vector<1x1x8x128xf32> to vector<3x3x8x128xf32>
    %105 = arith.addf %102, %104 : vector<3x3x8x128xf32>
    %106 = arith.addf %101, %105 : vector<3x3x8x128xf32>
    %c0_135 = arith.constant 0 : index
    %c1_136 = arith.constant 1 : index
    %c0_137 = arith.constant 0 : index
    %c0_138 = arith.constant 0 : index
    %107 = vector.load %arg7[%c0_135, %c1_136, %c0_137, %c0_138] : memref<4x4x8x128xf32, #tpu.memory_space<vmem>>, vector<3x3x8x128xf32>
    tpu.vector_store %arg7[%c0_135, %c1_136, %c0_137, %c0_138], %106 {strides = array<i32>} : memref<4x4x8x128xf32, #tpu.memory_space<vmem>>, vector<3x3x8x128xf32>,
    %c1_139 = arith.constant 1 : index
    %c0_140 = arith.constant 0 : index
    %c0_141 = arith.constant 0 : index
    %c0_142 = arith.constant 0 : index
    %108 = vector.load %arg1[%c1_139, %c0_140, %c0_141, %c0_142] : memref<4x4x8x128xf32, #tpu.memory_space<vmem>>, vector<3x4x8x128xf32>
    %109 = vector.shape_cast %108 : vector<3x4x8x128xf32> to vector<96x128xf32>
    %c7 = arith.constant 7 : index
    %c0_143 = arith.constant 0 : index
    %c0_144 = arith.constant 0 : index
    %110 = vector.load %arg3[%c7, %c0_143, %c0_144] : memref<9x128x128xf32, #tpu.memory_space<vmem>>, vector<1x128x128xf32>
    %111 = vector.shape_cast %110 : vector<1x128x128xf32> to vector<128x128xf32>
    %cst_145 = arith.constant dense<0.000000e+00> : vector<96x128xf32>
    %112 = tpu.matmul %109, %111, %cst_145 {dimension_numbers = #tpu.dot_dimension_numbers<[1], [0], [0], [1], [0, 0, 1, 1], [], []>} : vector<96x128xf32>, vector<128x128xf32>, vector<96x128xf32> -> vector<96x128xf32>
    %c7_146 = arith.constant 7 : index
    %c0_147 = arith.constant 0 : index
    %c0_148 = arith.constant 0 : index
    %113 = vector.load %arg4[%c7_146, %c0_147, %c0_148] : memref<9x256x128xf32, #tpu.memory_space<vmem>>, vector<1x256x128xf32>
    %114 = vector.shape_cast %113 : vector<1x256x128xf32> to vector<256x128xf32>
    %cst_149 = arith.constant dense<0.000000e+00> : vector<8x128xf32>
    %115 = tpu.matmul %2, %114, %cst_149 {dimension_numbers = #tpu.dot_dimension_numbers<[1], [0], [0], [1], [0, 0, 1, 1], [], []>} : vector<8x256xf32>, vector<256x128xf32>, vector<8x128xf32> -> vector<8x128xf32>
    %c0_150 = arith.constant 0 : index
    %c0_151 = arith.constant 0 : index
    %c0_152 = arith.constant 0 : index
    %c0_153 = arith.constant 0 : index
    %116 = vector.load %arg7[%c0_150, %c0_151, %c0_152, %c0_153] : memref<4x4x8x128xf32, #tpu.memory_space<vmem>>, vector<3x4x8x128xf32>
    %117 = vector.shape_cast %112 : vector<96x128xf32> to vector<3x4x8x128xf32>
    %118 = vector.shape_cast %115 : vector<8x128xf32> to vector<1x1x8x128xf32>
    %119 = vector.broadcast %118 : vector<1x1x8x128xf32> to vector<3x4x8x128xf32>
    %120 = arith.addf %117, %119 : vector<3x4x8x128xf32>
    %121 = arith.addf %116, %120 : vector<3x4x8x128xf32>
    %c0_154 = arith.constant 0 : index
    %c0_155 = arith.constant 0 : index
    %c0_156 = arith.constant 0 : index
    %c0_157 = arith.constant 0 : index
    %122 = vector.load %arg7[%c0_154, %c0_155, %c0_156, %c0_157] : memref<4x4x8x128xf32, #tpu.memory_space<vmem>>, vector<3x4x8x128xf32>
    tpu.vector_store %arg7[%c0_154, %c0_155, %c0_156, %c0_157], %121 {strides = array<i32>} : memref<4x4x8x128xf32, #tpu.memory_space<vmem>>, vector<3x4x8x128xf32>,
    %c1_158 = arith.constant 1 : index
    %c1_159 = arith.constant 1 : index
    %c0_160 = arith.constant 0 : index
    %c0_161 = arith.constant 0 : index
    %123 = vector.load %arg1[%c1_158, %c1_159, %c0_160, %c0_161] : memref<4x4x8x128xf32, #tpu.memory_space<vmem>>, vector<3x3x8x128xf32>
    %124 = vector.shape_cast %123 : vector<3x3x8x128xf32> to vector<72x128xf32>
    %c8 = arith.constant 8 : index
    %c0_162 = arith.constant 0 : index
    %c0_163 = arith.constant 0 : index
    %125 = vector.load %arg3[%c8, %c0_162, %c0_163] : memref<9x128x128xf32, #tpu.memory_space<vmem>>, vector<1x128x128xf32>
    %126 = vector.shape_cast %125 : vector<1x128x128xf32> to vector<128x128xf32>
    %cst_164 = arith.constant dense<0.000000e+00> : vector<72x128xf32>
    %127 = tpu.matmul %124, %126, %cst_164 {dimension_numbers = #tpu.dot_dimension_numbers<[1], [0], [0], [1], [0, 0, 1, 1], [], []>} : vector<72x128xf32>, vector<128x128xf32>, vector<72x128xf32> -> vector<72x128xf32>
    %c8_165 = arith.constant 8 : index
    %c0_166 = arith.constant 0 : index
    %c0_167 = arith.constant 0 : index
    %128 = vector.load %arg4[%c8_165, %c0_166, %c0_167] : memref<9x256x128xf32, #tpu.memory_space<vmem>>, vector<1x256x128xf32>
    %129 = vector.shape_cast %128 : vector<1x256x128xf32> to vector<256x128xf32>
    %cst_168 = arith.constant dense<0.000000e+00> : vector<8x128xf32>
    %130 = tpu.matmul %2, %129, %cst_168 {dimension_numbers = #tpu.dot_dimension_numbers<[1], [0], [0], [1], [0, 0, 1, 1], [], []>} : vector<8x256xf32>, vector<256x128xf32>, vector<8x128xf32> -> vector<8x128xf32>
    %c0_169 = arith.constant 0 : index
    %c0_170 = arith.constant 0 : index
    %c0_171 = arith.constant 0 : index
    %c0_172 = arith.constant 0 : index
    %131 = vector.load %arg7[%c0_169, %c0_170, %c0_171, %c0_172] : memref<4x4x8x128xf32, #tpu.memory_space<vmem>>, vector<3x3x8x128xf32>
    %132 = vector.shape_cast %127 : vector<72x128xf32> to vector<3x3x8x128xf32>
    %133 = vector.shape_cast %130 : vector<8x128xf32> to vector<1x1x8x128xf32>
    %134 = vector.broadcast %133 : vector<1x1x8x128xf32> to vector<3x3x8x128xf32>
    %135 = arith.addf %132, %134 : vector<3x3x8x128xf32>
    %136 = arith.addf %131, %135 : vector<3x3x8x128xf32>
    %c0_173 = arith.constant 0 : index
    %c0_174 = arith.constant 0 : index
    %c0_175 = arith.constant 0 : index
    %c0_176 = arith.constant 0 : index
    %137 = vector.load %arg7[%c0_173, %c0_174, %c0_175, %c0_176] : memref<4x4x8x128xf32, #tpu.memory_space<vmem>>, vector<3x3x8x128xf32>
    tpu.vector_store %arg7[%c0_173, %c0_174, %c0_175, %c0_176], %136 {strides = array<i32>} : memref<4x4x8x128xf32, #tpu.memory_space<vmem>>, vector<3x3x8x128xf32>,
    %c0_177 = arith.constant 0 : index
    %c0_178 = arith.constant 0 : index
    %c0_179 = arith.constant 0 : index
    %c0_180 = arith.constant 0 : index
    %138 = vector.load %arg7[%c0_177, %c0_178, %c0_179, %c0_180] : memref<4x4x8x128xf32, #tpu.memory_space<vmem>>, vector<4x4x8x128xf32>
    %cst_181 = arith.constant 0.000000e+00 : f32
    %139 = vector.broadcast %cst_181 : f32 to vector<4x4x8x128xf32>
    %140 = arith.cmpf oge, %138, %139 : vector<4x4x8x128xf32>
    %cst_182 = arith.constant 2.000000e-01 : f32
    %141 = vector.broadcast %cst_182 : f32 to vector<4x4x8x128xf32>
    %142 = arith.mulf %141, %138 : vector<4x4x8x128xf32>
    %143 = arith.select %140, %138, %142 : vector<4x4x8x128xi1>, vector<4x4x8x128xf32>
    %c0_183 = arith.constant 0 : index
    %c0_184 = arith.constant 0 : index
    %c0_185 = arith.constant 0 : index
    %c0_186 = arith.constant 0 : index
    %144 = vector.load %arg5[%c0_183, %c0_184, %c0_185, %c0_186] : memref<4x4x1x128xf32, #tpu.memory_space<vmem>>, vector<4x4x1x128xf32>
    %145 = vector.broadcast %144 : vector<4x4x1x128xf32> to vector<4x4x8x128xf32>
    %146 = arith.mulf %143, %145 : vector<4x4x8x128xf32>
    %cst_187 = arith.constant dense<0.000000e+00> : vector<4x4x8xf32>
    %147 = vector.multi_reduction <add>, %146, %cst_187 [3] : vector<4x4x8x128xf32> to vector<4x4x8xf32>
    %148 = vector.shape_cast %147 : vector<4x4x8xf32> to vector<4x4x8x1xf32>
    %cst_188 = arith.constant dense<0.000000e+00> : vector<8x1xf32>
    %149 = vector.multi_reduction <add>, %148, %cst_188 [0, 1] : vector<4x4x8x1xf32> to vector<8x1xf32>
    %150 = vector.shape_cast %149 : vector<8x1xf32> to vector<8x1xf32>
    %151 = vector.broadcast %150 : vector<8x1xf32> to vector<8x128xf32>
    %c0_189 = arith.constant 0 : index
    %c0_190 = arith.constant 0 : index
    %152 = vector.load %arg6[%c0_189, %c0_190] : memref<8x128xf32, #tpu.memory_space<vmem>>, vector<8x128xf32>
    tpu.vector_store %arg6[%c0_189, %c0_190], %151 {strides = array<i32>} : memref<8x128xf32, #tpu.memory_space<vmem>>, vector<8x128xf32>,
    return
  }
  func.func @transform_0(%arg0: i32) -> (i32, i32, i32, i32) {
    %c0_i32 = arith.constant 0 : i32
    %c0_i32_0 = arith.constant 0 : i32
    %c0_i32_1 = arith.constant 0 : i32
    %c0_i32_2 = arith.constant 0 : i32
    return %c0_i32, %c0_i32_0, %arg0, %c0_i32_1 : i32, i32, i32, i32
  }
  func.func @transform_1(%arg0: i32) -> (i32, i32) {
    %c0_i32 = arith.constant 0 : i32
    %c0_i32_0 = arith.constant 0 : i32
    return %arg0, %c0_i32 : i32, i32
  }
  func.func @transform_2(%arg0: i32) -> (i32, i32, i32) {
    %c0_i32 = arith.constant 0 : i32
    %c0_i32_0 = arith.constant 0 : i32
    %c0_i32_1 = arith.constant 0 : i32
    %c0_i32_2 = arith.constant 0 : i32
    return %c0_i32, %c0_i32_0, %c0_i32_1 : i32, i32, i32
  }
  func.func @transform_3(%arg0: i32) -> (i32, i32, i32) {
    %c0_i32 = arith.constant 0 : i32
    %c0_i32_0 = arith.constant 0 : i32
    %c0_i32_1 = arith.constant 0 : i32
    %c0_i32_2 = arith.constant 0 : i32
    return %c0_i32, %c0_i32_0, %c0_i32_1 : i32, i32, i32
  }
  func.func @transform_4(%arg0: i32) -> (i32, i32, i32, i32) {
    %c0_i32 = arith.constant 0 : i32
    %c0_i32_0 = arith.constant 0 : i32
    %c0_i32_1 = arith.constant 0 : i32
    %c0_i32_2 = arith.constant 0 : i32
    %c0_i32_3 = arith.constant 0 : i32
    return %c0_i32, %c0_i32_0, %c0_i32_1, %c0_i32_2 : i32, i32, i32, i32
  }
  func.func @transform_5(%arg0: i32) -> (i32, i32) {
    %c0_i32 = arith.constant 0 : i32
    %c0_i32_0 = arith.constant 0 : i32
    return %arg0, %c0_i32 : i32, i32
  }
}

</mosaic_0001>

<bundles_post_ra>
// kernel: d_get_logits_forward.1
= control target key start
LH: loop header
LB: loop body
LE: loop exit
PB: predicated region body
PF: predicated region fallthrough
CT: control target
= control target key end

     0   :  { %v4460_v0 = vmov 0.0   ;;  %vm4461_vm0 = vmmov 0   ;;  %s6521_s2 = inlined_call_operand.vmem [shape: f32[9,128,128], index: 2, kind: input, shape index: {}]   ;;  %s6522_s3 = inlined_call_operand.vmem [shape: f32[9,256,128], index: 3, kind: input, shape index: {}]   ;;  %s6523_s0 = inlined_call_operand.vmem [shape: f32[4,4,8,128], index: 0, kind: input, shape index: {}]   ;;  %s6524_s1 = inlined_call_operand.vmem [shape: f32[8,256], index: 1, kind: input, shape index: {}]   ;;  %s6525_s4 = inlined_call_operand.vmem [shape: f32[4,4,1,128], index: 4, kind: input, shape index: {}]   ;;  %s6526_s5 = inlined_call_operand.vmem [shape: f32[8,128], index: 5, kind: output, shape index: {}]  }
   0x1   :  { %3961 = vmatprep.subr.mxu0 %v4460_v0  ;;  %v62_v1 = vld [vmem:[%s6521_s2 + $0x78] sm:$0xff]  ;;  %3993 = vmatprep.mubr.msk.f32.mxu0 %vm4461_vm0, %v4460_v0  ;;  %v61_v4 = vld [vmem:[%s6521_s2 + $0x70] sm:$0xff]  ;;  %v60_v7 = vld [vmem:[%s6521_s2 + $0x68] sm:$0xff] }
   0x2   :  { %v204_v2 = vld [vmem:[%s6522_s3 + $0xf8] sm:$0xff]  ;;  %3962 = vmatpush3.msra.mxu0 %v62_v1  ;;  %v203_v5 = vld [vmem:[%s6522_s3 + $0xf0] sm:$0xff]  ;;  %v202_v8 = vld [vmem:[%s6522_s3 + $0xe8] sm:$0xff] }
   0x3   :  { %v188_v3 = vld [vmem:[%s6522_s3 + $0x78] sm:$0xff]  ;;  %3427 = vmatprep.subr.mxu1 %v204_v2  ;;  %v187_v6 = vld [vmem:[%s6522_s3 + $0x70] sm:$0xff]  ;;  %3963 = vmatprep.subr.mxu0 %v4460_v0  ;;  %v186_v9 = vld [vmem:[%s6522_s3 + $0x68] sm:$0xff] }
   0x4   :  { %3428 = vmatpush3.msra.mxu1 %v188_v3  ;;  %3964 = vmatpush3.msra.mxu0 %v61_v4  ;;  %v59_v10 = vld [vmem:[%s6521_s2 + $0x60] sm:$0xff]  ;;  %v58_v13 = vld [vmem:[%s6521_s2 + $0x58] sm:$0xff]  ;;  %v57_v16 = vld [vmem:[%s6521_s2 + $0x50] sm:$0xff] }
   0x5   :  { %3429 = vmatprep.subr.mxu1 %v203_v5  ;;  %3965 = vmatprep.subr.mxu0 %v4460_v0  ;;  %v201_v11 = vld [vmem:[%s6522_s3 + $0xe0] sm:$0xff]  ;;  %v200_v14 = vld [vmem:[%s6522_s3 + $0xd8] sm:$0xff]  ;;  %v199_v17 = vld [vmem:[%s6522_s3 + $0xd0] sm:$0xff] }
   0x6   :  { %3430 = vmatpush3.msra.mxu1 %v187_v6  ;;  %3966 = vmatpush3.msra.mxu0 %v60_v7  ;;  %v185_v12 = vld [vmem:[%s6522_s3 + $0x60] sm:$0xff]  ;;  %v184_v15 = vld [vmem:[%s6522_s3 + $0x58] sm:$0xff]  ;;  %v183_v18 = vld [vmem:[%s6522_s3 + $0x50] sm:$0xff] }
   0x7   :  { %3431 = vmatprep.subr.mxu1 %v202_v8  ;;  %3967 = vmatprep.subr.mxu0 %v4460_v0  ;;  %v56_v19 = vld [vmem:[%s6521_s2 + $0x48] sm:$0xff]  ;;  %v55_v22 = vld [vmem:[%s6521_s2 + $0x40] sm:$0xff]  ;;  %v54_v25 = vld [vmem:[%s6521_s2 + $0x38] sm:$0xff] }
   0x8   :  { %3432 = vmatpush3.msra.mxu1 %v186_v9  ;;  %3968 = vmatpush3.msra.mxu0 %v59_v10  ;;  %v198_v20 = vld [vmem:[%s6522_s3 + $0xc8] sm:$0xff]  ;;  %v197_v23 = vld [vmem:[%s6522_s3 + $0xc0] sm:$0xff]  ;;  %v196_v26 = vld [vmem:[%s6522_s3 + $0xb8] sm:$0xff] }
   0x9   :  { %3433 = vmatprep.subr.mxu1 %v201_v11  ;;  %3969 = vmatprep.subr.mxu0 %v4460_v0  ;;  %v182_v21 = vld [vmem:[%s6522_s3 + $0x48] sm:$0xff]  ;;  %v181_v24 = vld [vmem:[%s6522_s3 + $0x40] sm:$0xff]  ;;  %v180_v27 = vld [vmem:[%s6522_s3 + $0x38] sm:$0xff] }
   0xa   :  { %3434 = vmatpush3.msra.mxu1 %v185_v12  ;;  %3970 = vmatpush3.msra.mxu0 %v58_v13  ;;  %v53_v28 = vld [vmem:[%s6521_s2 + $0x30] sm:$0xff]  ;;  %v52_v31 = vld [vmem:[%s6521_s2 + $0x28] sm:$0xff]  ;;  %v51_v34 = vld [vmem:[%s6521_s2 + $0x20] sm:$0xff] }
   0xb   :  { %3435 = vmatprep.subr.mxu1 %v200_v14  ;;  %3971 = vmatprep.subr.mxu0 %v4460_v0  ;;  %v195_v29 = vld [vmem:[%s6522_s3 + $0xb0] sm:$0xff]  ;;  %v194_v32 = vld [vmem:[%s6522_s3 + $0xa8] sm:$0xff]  ;;  %v193_v35 = vld [vmem:[%s6522_s3 + $0xa0] sm:$0xff] }
   0xc   :  { %3436 = vmatpush3.msra.mxu1 %v184_v15  ;;  %3972 = vmatpush3.msra.mxu0 %v57_v16  ;;  %v179_v30 = vld [vmem:[%s6522_s3 + $0x30] sm:$0xff]  ;;  %v178_v33 = vld [vmem:[%s6522_s3 + $0x28] sm:$0xff]  ;;  %v177_v36 = vld [vmem:[%s6522_s3 + $0x20] sm:$0xff] }
   0xd   :  { %3437 = vmatprep.subr.mxu1 %v199_v17  ;;  %3973 = vmatprep.subr.mxu0 %v4460_v0  ;;  %v50_v37 = vld [vmem:[%s6521_s2 + $0x18] sm:$0xff]  ;;  %v49_v40 = vld [vmem:[%s6521_s2 + $0x10] sm:$0xff]  ;;  %v48_v43 = vld [vmem:[%s6521_s2 + $0x8] sm:$0xff] }
   0xe   :  { %3438 = vmatpush3.msra.mxu1 %v183_v18  ;;  %3974 = vmatpush3.msra.mxu0 %v56_v19  ;;  %v192_v38 = vld [vmem:[%s6522_s3 + $0x98] sm:$0xff]  ;;  %v191_v41 = vld [vmem:[%s6522_s3 + $0x90] sm:$0xff]  ;;  %v190_v44 = vld [vmem:[%s6522_s3 + $0x88] sm:$0xff] }
   0xf   :  { %3439 = vmatprep.subr.mxu1 %v198_v20  ;;  %3975 = vmatprep.subr.mxu0 %v4460_v0  ;;  %v176_v39 = vld [vmem:[%s6522_s3 + $0x18] sm:$0xff]  ;;  %v175_v42 = vld [vmem:[%s6522_s3 + $0x10] sm:$0xff]  ;;  %v174_v45 = vld [vmem:[%s6522_s3 + $0x8] sm:$0xff] }
  0x10   :  { %3440 = vmatpush3.msra.mxu1 %v182_v21  ;;  %3976 = vmatpush3.msra.mxu0 %v55_v22  ;;  %v47_v46 = vld [vmem:[%s6521_s2] sm:$0xff]  ;;  %v4662_v50 = vld [vmem:[%s6524_s1 + $0x8] sm:$0xff]  ;;  %v2966_v51 = vld [vmem:[%s6521_s2 + $0xf8] sm:$0xff] }
  0x11   :  { %3441 = vmatprep.subr.mxu1 %v197_v23  ;;  %3977 = vmatprep.subr.mxu0 %v4460_v0  ;;  %v189_v47 = vld [vmem:[%s6522_s3 + $0x80] sm:$0xff]  ;;  %v2998_v53 = vld [vmem:[%s6522_s3 + $0x1f8] sm:$0xff]  ;;  %v2965_v54 = vld [vmem:[%s6521_s2 + $0xf0] sm:$0xff] }
  0x12   :  { %3442 = vmatpush3.msra.mxu1 %v181_v24  ;;  %3978 = vmatpush3.msra.mxu0 %v54_v25  ;;  %v4653_v48 = vld [vmem:[%s6523_s0] sm:$0xff]  ;;  %v4683_v55 = vld [vmem:[%s6523_s0 + $0x8] sm:$0xff]  ;;  %v2982_v56 = vld [vmem:[%s6522_s3 + $0x178] sm:$0xff] }
  0x13   :  { %3443 = vmatprep.subr.mxu1 %v196_v26  ;;  %3979 = vmatprep.subr.mxu0 %v4460_v0  ;;  %v173_v49 = vld [vmem:[%s6522_s3] sm:$0xff]  ;;  %v2964_v57 = vld [vmem:[%s6521_s2 + $0xe8] sm:$0xff]  ;;  %v2997_v58 = vld [vmem:[%s6522_s3 + $0x1f0] sm:$0xff] }
  0x14   :  { %3444 = vmatpush3.msra.mxu1 %v180_v27  ;;  %3980 = vmatpush3.msra.mxu0 %v53_v28  ;;  %v4670_v52 = vld [vmem:[%s6524_s1] sm:$0xff]  ;;  %v2981_v59 = vld [vmem:[%s6522_s3 + $0x170] sm:$0xff]  ;;  %v2996_v61 = vld [vmem:[%s6522_s3 + $0x1e8] sm:$0xff] }
  0x15   :  { %3445 = vmatprep.subr.mxu1 %v195_v29  ;;  %3981 = vmatprep.subr.mxu0 %v4460_v0  ;;  %v2963_v60 = vld [vmem:[%s6521_s2 + $0xe0] sm:$0xff]  ;;  %v4710_v62 = vld [vmem:[%s6523_s0 + $0x10] sm:$0xff]  ;;  %v2980_v63 = vld [vmem:[%s6522_s3 + $0x168] sm:$0xff] }
  0x16   :  { %3446 = vmatpush3.msra.mxu1 %v179_v30  ;;  %3982 = vmatpush3.msra.mxu0 %v52_v31  ;;  %v2962_v1 = vld [vmem:[%s6521_s2 + $0xd8] sm:$0xff]  ;;  %v2995_v2 = vld [vmem:[%s6522_s3 + $0x1e0] sm:$0xff]  ;;  %v2961_v4 = vld [vmem:[%s6521_s2 + $0xd0] sm:$0xff] }
  0x17   :  { %3447 = vmatprep.subr.mxu1 %v194_v32  ;;  %3983 = vmatprep.subr.mxu0 %v4460_v0  ;;  %v2979_v3 = vld [vmem:[%s6522_s3 + $0x160] sm:$0xff]  ;;  %v2994_v5 = vld [vmem:[%s6522_s3 + $0x1d8] sm:$0xff]  ;;  %v2960_v8 = vld [vmem:[%s6521_s2 + $0xc8] sm:$0xff] }
  0x18   :  { %3448 = vmatpush3.msra.mxu1 %v178_v33  ;;  %3984 = vmatpush3.msra.mxu0 %v51_v34  ;;  %v4736_v6 = vld [vmem:[%s6523_s0 + $0x20] sm:$0xff]  ;;  %v2978_v7 = vld [vmem:[%s6522_s3 + $0x158] sm:$0xff]  ;;  %v2993_v9 = vld [vmem:[%s6522_s3 + $0x1d0] sm:$0xff] }
  0x19   :  { %3449 = vmatprep.subr.mxu1 %v193_v35  ;;  %3985 = vmatprep.subr.mxu0 %v4460_v0  ;;  %v2977_v10 = vld [vmem:[%s6522_s3 + $0x150] sm:$0xff]  ;;  %v2959_v11 = vld [vmem:[%s6521_s2 + $0xc0] sm:$0xff]  ;;  %v2992_v12 = vld [vmem:[%s6522_s3 + $0x1c8] sm:$0xff] }
  0x1a   :  { %3450 = vmatpush3.msra.mxu1 %v177_v36  ;;  %3986 = vmatpush3.msra.mxu0 %v50_v37  ;;  %v4762_v13 = vld [vmem:[%s6523_s0 + $0x28] sm:$0xff]  ;;  %v2958_v15 = vld [vmem:[%s6521_s2 + $0xb8] sm:$0xff]  ;;  %v2991_v16 = vld [vmem:[%s6522_s3 + $0x1c0] sm:$0xff] }
  0x1b   :  { %3451 = vmatprep.subr.mxu1 %v192_v38  ;;  %3987 = vmatprep.subr.mxu0 %v4460_v0  ;;  %v2976_v14 = vld [vmem:[%s6522_s3 + $0x148] sm:$0xff]  ;;  %v2975_v17 = vld [vmem:[%s6522_s3 + $0x140] sm:$0xff]  ;;  %v2957_v18 = vld [vmem:[%s6521_s2 + $0xb0] sm:$0xff] }
  0x1c   :  { %3452 = vmatpush3.msra.mxu1 %v176_v39  ;;  %3988 = vmatpush3.msra.mxu0 %v49_v40  ;;  %v2990_v19 = vld [vmem:[%s6522_s3 + $0x1b8] sm:$0xff]  ;;  %v4788_v20 = vld [vmem:[%s6523_s0 + $0x30] sm:$0xff]  ;;  %v2956_v22 = vld [vmem:[%s6521_s2 + $0xa8] sm:$0xff] }
  0x1d   :  { %3453 = vmatprep.subr.mxu1 %v191_v41  ;;  %3989 = vmatprep.subr.mxu0 %v4460_v0  ;;  %v2974_v21 = vld [vmem:[%s6522_s3 + $0x138] sm:$0xff]  ;;  %v2989_v23 = vld [vmem:[%s6522_s3 + $0x1b0] sm:$0xff]  ;;  %v2955_v25 = vld [vmem:[%s6521_s2 + $0xa0] sm:$0xff] }
  0x1e   :  { %3454 = vmatpush3.msra.mxu1 %v175_v42  ;;  %3990 = vmatpush3.msra.mxu0 %v48_v43  ;;  %v2973_v24 = vld [vmem:[%s6522_s3 + $0x130] sm:$0xff]  ;;  %v2988_v26 = vld [vmem:[%s6522_s3 + $0x1a8] sm:$0xff]  ;;  %v4814_v27 = vld [vmem:[%s6523_s0 + $0x40] sm:$0xff] }
  0x1f   :  { %3455 = vmatprep.subr.mxu1 %v190_v44  ;;  %3991 = vmatprep.subr.mxu0 %v4460_v0  ;;  %v2972_v28 = vld [vmem:[%s6522_s3 + $0x128] sm:$0xff]  ;;  %v2954_v29 = vld [vmem:[%s6521_s2 + $0x98] sm:$0xff]  ;;  %v2987_v30 = vld [vmem:[%s6522_s3 + $0x1a0] sm:$0xff] }
  0x20   :  { %3456 = vmatpush3.msra.mxu1 %v174_v45  ;;  %3992 = vmatpush3.msra.mxu0 %v47_v46  ;;  %v2971_v31 = vld [vmem:[%s6522_s3 + $0x120] sm:$0xff]  ;;  %v2953_v32 = vld [vmem:[%s6521_s2 + $0x90] sm:$0xff]  ;;  %v2986_v33 = vld [vmem:[%s6522_s3 + $0x198] sm:$0xff] }
  0x21   :  { %3457 = vmatprep.subr.mxu1 %v189_v47  ;;  %3994 = vmatmul.mubr.f32.vlgmr.msra.gmra.mxu0 %v4653_v48  ;;  %v4840_v34 = vld [vmem:[%s6523_s0 + $0x48] sm:$0xff]  ;;  %v2970_v35 = vld [vmem:[%s6522_s3 + $0x118] sm:$0xff]  ;;  %v2985_v37 = vld [vmem:[%s6522_s3 + $0x190] sm:$0xff] }
  0x22   :  { %3458 = vmatpush3.msra.mxu1 %v173_v49  ;;  %269 = vmatprep.mubr.f32.mxu1 %v4662_v50  ;;  %v2952_v36 = vld [vmem:[%s6521_s2 + $0x88] sm:$0xff]  ;;  %v2969_v38 = vld [vmem:[%s6522_s3 + $0x110] sm:$0xff]  ;;  %v2951_v39 = vld [vmem:[%s6521_s2 + $0x80] sm:$0xff] }
  0x23   :  { %4020 = vmatprep.subr.mxu1 %v2966_v51  ;;  %270 = vmatmul.mubr.f32.vlgmr.msra.gmra.mxu1 %v4670_v52  ;;  %v2984_v40 = vld [vmem:[%s6522_s3 + $0x188] sm:$0xff]  ;;  %v4866_v41 = vld [vmem:[%s6523_s0 + $0x50] sm:$0xff]  ;;  %v2983_v43 = vld [vmem:[%s6522_s3 + $0x180] sm:$0xff] }
  0x24   :  { %3996 = vmatprep.mubr.msk.f32.mxu0 %vm4461_vm0, %v4460_v0  ;;  %4021 = vmatpush3.msra.mxu1 %v2966_v51  ;;  %v2968_v42 = vld [vmem:[%s6522_s3 + $0x108] sm:$0xff]  ;;  %v2967_v44 = vld [vmem:[%s6522_s3 + $0x100] sm:$0xff]  ;;  %v3023_v45 = vld [vmem:[%s6521_s2 + $0x178] sm:$0xff] }
  0x25   :  { %3490 = vmatprep.subr.mxu0 %v2998_v53  ;;  %4022 = vmatprep.subr.mxu1 %v2965_v54  ;;  %v3055_v46 = vld [vmem:[%s6522_s3 + $0x2f8] sm:$0xff]  ;;  %v3022_v47 = vld [vmem:[%s6521_s2 + $0x170] sm:$0xff] }
  0x26   :  { %3997 = vmatmul.mubr.f32.gmra.mxu0 %v4683_v55  ;;  %4023 = vmatpush3.msra.mxu1 %v2965_v54  ;;  %v3039_v49 = vld [vmem:[%s6522_s3 + $0x278] sm:$0xff]  ;;  %v3054_v53 = vld [vmem:[%s6522_s3 + $0x2f0] sm:$0xff]  ;;  %v3021_v54 = vld [vmem:[%s6521_s2 + $0x168] sm:$0xff] }
  0x27   :  { %3491 = vmatpush3.msra.mxu0 %v2982_v56  ;;  %4024 = vmatprep.subr.mxu1 %v2964_v57  ;;  %v4900_v51 = vld [vmem:[%s6523_s0 + $0x18] sm:$0xff]  ;;  %v3038_v56 = vld [vmem:[%s6522_s3 + $0x270] sm:$0xff] }
  0x28   :  { %3492 = vmatprep.subr.mxu0 %v2997_v58  ;;  %4025 = vmatpush3.msra.mxu1 %v2964_v57  ;;  %v3053_v57 = vld [vmem:[%s6522_s3 + $0x2e8] sm:$0xff]  ;;  %v3020_v58 = vld [vmem:[%s6521_s2 + $0x160] sm:$0xff] }
  0x29   :  { %3493 = vmatpush3.msra.mxu0 %v2981_v59  ;;  %3999 = vmatprep.mubr.msk.f32.mxu0 %vm4461_vm0, %v4460_v0  ;;  %v3037_v59 = vld [vmem:[%s6522_s3 + $0x268] sm:$0xff] }
  0x2a   :  { %4026 = vmatprep.subr.mxu1 %v2963_v60  ;;  %3494 = vmatprep.subr.mxu0 %v2996_v61  ;;  %v3019_v61 = vld [vmem:[%s6521_s2 + $0x158] sm:$0xff] }
  0x2b   :  { %4000 = vmatmul.mubr.f32.gmra.mxu0 %v4710_v62  ;;  %4027 = vmatpush3.msra.mxu1 %v2963_v60  ;;  %v3052_v60 = vld [vmem:[%s6522_s3 + $0x2e0] sm:$0xff] }
  0x2c   :  { %3495 = vmatpush3.msra.mxu0 %v2980_v63  ;;  %4028 = vmatprep.subr.mxu1 %v2962_v1  ;;  %v3036_v63 = vld [vmem:[%s6522_s3 + $0x260] sm:$0xff] }
  0x2d   :  { %3496 = vmatprep.subr.mxu0 %v2995_v2  ;;  %4029 = vmatpush3.msra.mxu1 %v2962_v1  ;;  %v3051_v1 = vld [vmem:[%s6522_s3 + $0x2d8] sm:$0xff]  ;;  %v3018_v2 = vld [vmem:[%s6521_s2 + $0x150] sm:$0xff] }
  0x2e   :  { %3497 = vmatpush3.msra.mxu0 %v2979_v3  ;;  %4002 = vmatprep.mubr.msk.f32.mxu0 %vm4461_vm0, %v4460_v0  ;;  %v3035_v3 = vld [vmem:[%s6522_s3 + $0x258] sm:$0xff] }
  0x2f   :  { %4030 = vmatprep.subr.mxu1 %v2961_v4  ;;  %3498 = vmatprep.subr.mxu0 %v2994_v5  ;;  %v3050_v5 = vld [vmem:[%s6522_s3 + $0x2d0] sm:$0xff] }
  0x30   :  { %4003 = vmatmul.mubr.f32.gmra.mxu0 %v4736_v6  ;;  %4031 = vmatpush3.msra.mxu1 %v2961_v4  ;;  %v4949_v4 = vld [vmem:[%s6523_s0 + $0x38] sm:$0xff] }
  0x31   :  { %3499 = vmatpush3.msra.mxu0 %v2978_v7  ;;  %4032 = vmatprep.subr.mxu1 %v2960_v8  ;;  %v3017_v7 = vld [vmem:[%s6521_s2 + $0x148] sm:$0xff] }
  0x32   :  { %3500 = vmatprep.subr.mxu0 %v2993_v9  ;;  %4033 = vmatpush3.msra.mxu1 %v2960_v8  ;;  %v3034_v8 = vld [vmem:[%s6522_s3 + $0x250] sm:$0xff]  ;;  %v3049_v9 = vld [vmem:[%s6522_s3 + $0x2c8] sm:$0xff] }
  0x33   :  { %3501 = vmatpush3.msra.mxu0 %v2977_v10  ;;  %4005 = vmatprep.mubr.msk.f32.mxu0 %vm4461_vm0, %v4460_v0  ;;  %v3016_v10 = vld [vmem:[%s6521_s2 + $0x140] sm:$0xff] }
  0x34   :  { %4034 = vmatprep.subr.mxu1 %v2959_v11  ;;  %3502 = vmatprep.subr.mxu0 %v2992_v12  ;;  %v3048_v12 = vld [vmem:[%s6522_s3 + $0x2c0] sm:$0xff] }
  0x35   :  { %4006 = vmatmul.mubr.f32.gmra.mxu0 %v4762_v13  ;;  %4035 = vmatpush3.msra.mxu1 %v2959_v11  ;;  %v3033_v11 = vld [vmem:[%s6522_s3 + $0x248] sm:$0xff] }
  0x36   :  { %3503 = vmatpush3.msra.mxu0 %v2976_v14  ;;  %4036 = vmatprep.subr.mxu1 %v2958_v15  ;;  %v3015_v14 = vld [vmem:[%s6521_s2 + $0x138] sm:$0xff] }
  0x37   :  { %3504 = vmatprep.subr.mxu0 %v2991_v16  ;;  %4037 = vmatpush3.msra.mxu1 %v2958_v15  ;;  %v3032_v15 = vld [vmem:[%s6522_s3 + $0x240] sm:$0xff]  ;;  %v3047_v16 = vld [vmem:[%s6522_s3 + $0x2b8] sm:$0xff] }
  0x38   :  { %3505 = vmatpush3.msra.mxu0 %v2975_v17  ;;  %4008 = vmatprep.mubr.msk.f32.mxu0 %vm4461_vm0, %v4460_v0  ;;  %v3014_v17 = vld [vmem:[%s6521_s2 + $0x130] sm:$0xff] }
  0x39   :  { %4038 = vmatprep.subr.mxu1 %v2957_v18  ;;  %3506 = vmatprep.subr.mxu0 %v2990_v19  ;;  %v4998_v19 = vld [vmem:[%s6523_s0 + $0x58] sm:$0xff] }
  0x3a   :  { %4009 = vmatmul.mubr.f32.gmra.mxu0 %v4788_v20  ;;  %4039 = vmatpush3.msra.mxu1 %v2957_v18  ;;  %v3031_v18 = vld [vmem:[%s6522_s3 + $0x238] sm:$0xff] }
  0x3b   :  { %3507 = vmatpush3.msra.mxu0 %v2974_v21  ;;  %4040 = vmatprep.subr.mxu1 %v2956_v22  ;;  %v3046_v21 = vld [vmem:[%s6522_s3 + $0x2b0] sm:$0xff] }
  0x3c   :  { %3508 = vmatprep.subr.mxu0 %v2989_v23  ;;  %4041 = vmatpush3.msra.mxu1 %v2956_v22  ;;  %v3013_v22 = vld [vmem:[%s6521_s2 + $0x128] sm:$0xff]  ;;  %v3030_v23 = vld [vmem:[%s6522_s3 + $0x230] sm:$0xff] }
  0x3d   :  { %3509 = vmatpush3.msra.mxu0 %v2973_v24  ;;  %4011 = vmatprep.mubr.msk.f32.mxu0 %vm4461_vm0, %v4460_v0  ;;  %v3045_v24 = vld [vmem:[%s6522_s3 + $0x2a8] sm:$0xff] }
  0x3e   :  { %4042 = vmatprep.subr.mxu1 %v2955_v25  ;;  %3510 = vmatprep.subr.mxu0 %v2988_v26  ;;  %v3029_v26 = vld [vmem:[%s6522_s3 + $0x228] sm:$0xff] }
  0x3f   :  { %4012 = vmatmul.mubr.f32.gmra.mxu0 %v4814_v27  ;;  %4043 = vmatpush3.msra.mxu1 %v2955_v25  ;;  %v3012_v25 = vld [vmem:[%s6521_s2 + $0x120] sm:$0xff] }
  0x40   :  { %3511 = vmatpush3.msra.mxu0 %v2972_v28  ;;  %4044 = vmatprep.subr.mxu1 %v2954_v29  ;;  %v3044_v28 = vld [vmem:[%s6522_s3 + $0x2a0] sm:$0xff] }
  0x41   :  { %3512 = vmatprep.subr.mxu0 %v2987_v30  ;;  %4045 = vmatpush3.msra.mxu1 %v2954_v29  ;;  %v3011_v29 = vld [vmem:[%s6521_s2 + $0x118] sm:$0xff]  ;;  %v3028_v30 = vld [vmem:[%s6522_s3 + $0x220] sm:$0xff] }
  0x42   :  { %3513 = vmatpush3.msra.mxu0 %v2971_v31  ;;  %4014 = vmatprep.mubr.msk.f32.mxu0 %vm4461_vm0, %v4460_v0  ;;  %v3043_v31 = vld [vmem:[%s6522_s3 + $0x298] sm:$0xff] }
  0x43   :  { %4046 = vmatprep.subr.mxu1 %v2953_v32  ;;  %3514 = vmatprep.subr.mxu0 %v2986_v33  ;;  %v3027_v33 = vld [vmem:[%s6522_s3 + $0x218] sm:$0xff] }
  0x44   :  { %4015 = vmatmul.mubr.f32.gmra.mxu0 %v4840_v34  ;;  %4047 = vmatpush3.msra.mxu1 %v2953_v32  ;;  %v3010_v32 = vld [vmem:[%s6521_s2 + $0x110] sm:$0xff] }
  0x45   :  { %3515 = vmatpush3.msra.mxu0 %v2970_v35  ;;  %4048 = vmatprep.subr.mxu1 %v2952_v36  ;;  %v3042_v35 = vld [vmem:[%s6522_s3 + $0x290] sm:$0xff] }
  0x46   :  { %3516 = vmatprep.subr.mxu0 %v2985_v37  ;;  %4049 = vmatpush3.msra.mxu1 %v2952_v36  ;;  %v3009_v36 = vld [vmem:[%s6521_s2 + $0x108] sm:$0xff]  ;;  %v3026_v37 = vld [vmem:[%s6522_s3 + $0x210] sm:$0xff] }
  0x47   :  { %3517 = vmatpush3.msra.mxu0 %v2969_v38  ;;  %4017 = vmatprep.mubr.msk.f32.mxu0 %vm4461_vm0, %v4460_v0  ;;  %v3041_v38 = vld [vmem:[%s6522_s3 + $0x288] sm:$0xff] }
  0x48   :  { %4050 = vmatprep.subr.mxu1 %v2951_v39  ;;  %3518 = vmatprep.subr.mxu0 %v2984_v40  ;;  %v3025_v40 = vld [vmem:[%s6522_s3 + $0x208] sm:$0xff] }
  0x49   :  { %4018 = vmatmul.mubr.f32.gmra.mxu0 %v4866_v41  ;;  %4051 = vmatpush3.msra.mxu1 %v2951_v39  ;;  %v3008_v39 = vld [vmem:[%s6521_s2 + $0x100] sm:$0xff] }
  0x4a   :  { %4052 = vmatprep.mubr.f32.mxu1 %v4653_v48  ;;  %3519 = vmatpush3.msra.mxu0 %v2968_v42  ;;  %v3040_v42 = vld [vmem:[%s6522_s3 + $0x280] sm:$0xff] }
  0x4b   :  { %4053 = vmatmul.mubr.f32.vlgmr.msra.gmra.mxu1 %v4683_v55  ;;  %3520 = vmatprep.subr.mxu0 %v2983_v43  ;;  %v3103_v43 = vld [vmem:[%s6522_s3 + $0x3f8] sm:$0xff] }
  0x4c   :  { %4070 = vmatprep.subr.mxu1 %v4460_v0  ;;  %3521 = vmatpush3.msra.mxu0 %v2967_v44  ;;  %v3024_v44 = vld [vmem:[%s6522_s3 + $0x200] sm:$0xff] }
  0x4d   :  { %4071 = vmatpush3.msra.mxu1 %v3023_v45  ;;  %563 = vmatprep.mubr.f32.mxu0 %v4662_v50  ;;  %v3087_v45 = vld [vmem:[%s6522_s3 + $0x378] sm:$0xff] }
  0x4e   :  { %4072 = vmatprep.subr.mxu1 %v4460_v0  ;;  %3550 = vmatprep.subr.mxu0 %v3055_v46  ;;  %v3071_v46 = vld [vmem:[%s6521_s2 + $0x1f8] sm:$0xff] }
  0x4f   :  { %4055 = vmatprep.mubr.f32.mxu1 %v4710_v62  ;;  %564 = vmatmul.mubr.f32.vlgmr.msra.gmra.mxu0 %v4670_v52 }
  0x50   :  { %4073 = vmatpush3.msra.mxu1 %v3022_v47  ;;  %3551 = vmatpush3.msra.mxu0 %v3039_v49  ;;  %v3102_v47 = vld [vmem:[%s6522_s3 + $0x3f0] sm:$0xff] }
  0x51   :  { %4056 = vmatmul.mubr.f32.gmra.mxu1 %v4900_v51  ;;  %4074 = vmatprep.subr.mxu1 %v4460_v0  ;;  %v3070_v49 = vld [vmem:[%s6521_s2 + $0x1f0] sm:$0xff] }
  0x52   :  { %3552 = vmatprep.subr.mxu0 %v3054_v53  ;;  %4075 = vmatpush3.msra.mxu1 %v3021_v54  ;;  %v3086_v53 = vld [vmem:[%s6522_s3 + $0x370] sm:$0xff]  ;;  %v3101_v54 = vld [vmem:[%s6522_s3 + $0x3e8] sm:$0xff] }
  0x53   :  { %3553 = vmatpush3.msra.mxu0 %v3038_v56  ;;  %4076 = vmatprep.subr.mxu1 %v4460_v0  ;;  %v3069_v56 = vld [vmem:[%s6521_s2 + $0x1e8] sm:$0xff] }
  0x54   :  { %3554 = vmatprep.subr.mxu0 %v3053_v57  ;;  %4058 = vmatprep.mubr.f32.mxu1 %v4736_v6  ;;  %v3085_v57 = vld [vmem:[%s6522_s3 + $0x368] sm:$0xff] }
  0x55   :  { %4077 = vmatpush3.msra.mxu1 %v3020_v58  ;;  %3555 = vmatpush3.msra.mxu0 %v3037_v59  ;;  %v3100_v58 = vld [vmem:[%s6522_s3 + $0x3e0] sm:$0xff] }
  0x56   :  { %4059 = vmatmul.mubr.f32.gmra.mxu1 %v4762_v13  ;;  %4078 = vmatprep.subr.mxu1 %v4460_v0  ;;  %v3068_v59 = vld [vmem:[%s6521_s2 + $0x1e0] sm:$0xff] }
  0x57   :  { %3556 = vmatprep.subr.mxu0 %v3052_v60  ;;  %4079 = vmatpush3.msra.mxu1 %v3019_v61  ;;  %v3084_v60 = vld [vmem:[%s6522_s3 + $0x360] sm:$0xff]  ;;  %v3099_v61 = vld [vmem:[%s6522_s3 + $0x3d8] sm:$0xff] }
  0x58   :  { %3557 = vmatpush3.msra.mxu0 %v3036_v63  ;;  %4080 = vmatprep.subr.mxu1 %v4460_v0  ;;  %v3067_v63 = vld [vmem:[%s6521_s2 + $0x1d8] sm:$0xff] }
  0x59   :  { %3558 = vmatprep.subr.mxu0 %v3051_v1  ;;  %4061 = vmatprep.mubr.f32.mxu1 %v4788_v20  ;;  %v3083_v1 = vld [vmem:[%s6522_s3 + $0x358] sm:$0xff] }
  0x5a   :  { %4081 = vmatpush3.msra.mxu1 %v3018_v2  ;;  %3559 = vmatpush3.msra.mxu0 %v3035_v3  ;;  %v3066_v2 = vld [vmem:[%s6521_s2 + $0x1d0] sm:$0xff] }
  0x5b   :  { %4062 = vmatmul.mubr.f32.gmra.mxu1 %v4949_v4  ;;  %4082 = vmatprep.subr.mxu1 %v4460_v0  ;;  %v3098_v3 = vld [vmem:[%s6522_s3 + $0x3d0] sm:$0xff] }
  0x5c   :  { %3560 = vmatprep.subr.mxu0 %v3050_v5  ;;  %4083 = vmatpush3.msra.mxu1 %v3017_v7  ;;  %v3082_v5 = vld [vmem:[%s6522_s3 + $0x350] sm:$0xff]  ;;  %v3065_v7 = vld [vmem:[%s6521_s2 + $0x1c8] sm:$0xff] }
  0x5d   :  { %3561 = vmatpush3.msra.mxu0 %v3034_v8  ;;  %4084 = vmatprep.subr.mxu1 %v4460_v0  ;;  %v3097_v8 = vld [vmem:[%s6522_s3 + $0x3c8] sm:$0xff] }
  0x5e   :  { %3562 = vmatprep.subr.mxu0 %v3049_v9  ;;  %4064 = vmatprep.mubr.f32.mxu1 %v4814_v27  ;;  %v3081_v9 = vld [vmem:[%s6522_s3 + $0x348] sm:$0xff] }
  0x5f   :  { %4085 = vmatpush3.msra.mxu1 %v3016_v10  ;;  %3563 = vmatpush3.msra.mxu0 %v3033_v11  ;;  %v3064_v10 = vld [vmem:[%s6521_s2 + $0x1c0] sm:$0xff] }
  0x60   :  { %4065 = vmatmul.mubr.f32.gmra.mxu1 %v4840_v34  ;;  %4086 = vmatprep.subr.mxu1 %v4460_v0  ;;  %v3096_v11 = vld [vmem:[%s6522_s3 + $0x3c0] sm:$0xff] }
  0x61   :  { %3564 = vmatprep.subr.mxu0 %v3048_v12  ;;  %4087 = vmatpush3.msra.mxu1 %v3015_v14  ;;  %v3080_v12 = vld [vmem:[%s6522_s3 + $0x340] sm:$0xff]  ;;  %v3063_v14 = vld [vmem:[%s6521_s2 + $0x1b8] sm:$0xff] }
  0x62   :  { %3565 = vmatpush3.msra.mxu0 %v3032_v15  ;;  %4088 = vmatprep.subr.mxu1 %v4460_v0  ;;  %v3095_v15 = vld [vmem:[%s6522_s3 + $0x3b8] sm:$0xff] }
  0x63   :  { %3566 = vmatprep.subr.mxu0 %v3047_v16  ;;  %4067 = vmatprep.mubr.f32.mxu1 %v4866_v41  ;;  %v3079_v16 = vld [vmem:[%s6522_s3 + $0x338] sm:$0xff] }
  0x64   :  { %4089 = vmatpush3.msra.mxu1 %v3014_v17  ;;  %3567 = vmatpush3.msra.mxu0 %v3031_v18  ;;  %v3062_v17 = vld [vmem:[%s6521_s2 + $0x1b0] sm:$0xff] }
  0x65   :  { %4068 = vmatmul.mubr.f32.gmra.mxu1 %v4998_v19  ;;  %4090 = vmatprep.subr.mxu1 %v4460_v0  ;;  %v3094_v18 = vld [vmem:[%s6522_s3 + $0x3b0] sm:$0xff] }
  0x66   :  { %3568 = vmatprep.subr.mxu0 %v3046_v21  ;;  %4091 = vmatpush3.msra.mxu1 %v3013_v22  ;;  %v3061_v21 = vld [vmem:[%s6521_s2 + $0x1a8] sm:$0xff]  ;;  %v3078_v22 = vld [vmem:[%s6522_s3 + $0x330] sm:$0xff] }
  0x67   :  { %3569 = vmatpush3.msra.mxu0 %v3030_v23  ;;  %4092 = vmatprep.subr.mxu1 %v4460_v0  ;;  %v3093_v23 = vld [vmem:[%s6522_s3 + $0x3a8] sm:$0xff] }
  0x68   :  { %3570 = vmatprep.subr.mxu0 %v3045_v24  ;;  %4093 = vmatpush3.msra.mxu1 %v3012_v25  ;;  %v3060_v24 = vld [vmem:[%s6521_s2 + $0x1a0] sm:$0xff]  ;;  %v3077_v25 = vld [vmem:[%s6522_s3 + $0x328] sm:$0xff] }
  0x69   :  { %3571 = vmatpush3.msra.mxu0 %v3029_v26  ;;  %4094 = vmatprep.subr.mxu1 %v4460_v0  ;;  %v3092_v26 = vld [vmem:[%s6522_s3 + $0x3a0] sm:$0xff] }
  0x6a   :  { %3572 = vmatprep.subr.mxu0 %v3044_v28  ;;  %4095 = vmatpush3.msra.mxu1 %v3011_v29  ;;  %v3059_v28 = vld [vmem:[%s6521_s2 + $0x198] sm:$0xff]  ;;  %v3076_v29 = vld [vmem:[%s6522_s3 + $0x320] sm:$0xff] }
  0x6b   :  { %3573 = vmatpush3.msra.mxu0 %v3028_v30  ;;  %4096 = vmatprep.subr.mxu1 %v4460_v0  ;;  %v3091_v30 = vld [vmem:[%s6522_s3 + $0x398] sm:$0xff] }
  0x6c   :  { %3574 = vmatprep.subr.mxu0 %v3043_v31  ;;  %4097 = vmatpush3.msra.mxu1 %v3010_v32  ;;  %v3058_v31 = vld [vmem:[%s6521_s2 + $0x190] sm:$0xff]  ;;  %v3075_v32 = vld [vmem:[%s6522_s3 + $0x318] sm:$0xff] }
  0x6d   :  { %3575 = vmatpush3.msra.mxu0 %v3027_v33  ;;  %4098 = vmatprep.subr.mxu1 %v4460_v0  ;;  %v3090_v33 = vld [vmem:[%s6522_s3 + $0x390] sm:$0xff] }
  0x6e   :  { %3576 = vmatprep.subr.mxu0 %v3042_v35  ;;  %4099 = vmatpush3.msra.mxu1 %v3009_v36  ;;  %v3057_v35 = vld [vmem:[%s6521_s2 + $0x188] sm:$0xff]  ;;  %v3074_v36 = vld [vmem:[%s6522_s3 + $0x310] sm:$0xff] }
  0x6f   :  { %3577 = vmatpush3.msra.mxu0 %v3026_v37  ;;  %4100 = vmatprep.subr.mxu1 %v4460_v0  ;;  %v3089_v37 = vld [vmem:[%s6522_s3 + $0x388] sm:$0xff] }
  0x70   :  { %3578 = vmatprep.subr.mxu0 %v3041_v38  ;;  %4101 = vmatpush3.msra.mxu1 %v3008_v39  ;;  %v3056_v38 = vld [vmem:[%s6521_s2 + $0x180] sm:$0xff]  ;;  %v3073_v39 = vld [vmem:[%s6522_s3 + $0x308] sm:$0xff] }
  0x71   :  { %4102 = vmatprep.mubr.msk.f32.mxu1 %vm4461_vm0, %v4460_v0  ;;  %3579 = vmatpush3.msra.mxu0 %v3025_v40  ;;  %v3088_v40 = vld [vmem:[%s6522_s3 + $0x380] sm:$0xff] }
  0x72   :  { %4103 = vmatmul.mubr.f32.vlgmr.msra.gmra.mxu1 %v4683_v55  ;;  %3580 = vmatprep.subr.mxu0 %v3040_v42  ;;  %v3072_v42 = vld [vmem:[%s6522_s3 + $0x300] sm:$0xff] }
  0x73   :  { %3613 = vmatprep.subr.mxu1 %v3103_v43  ;;  %3581 = vmatpush3.msra.mxu0 %v3024_v44  ;;  %v3119_v43 = vld [vmem:[%s6521_s2 + $0x278] sm:$0xff] }
  0x74   :  { %852 = vmatprep.mubr.f32.mxu0 %v4662_v50  ;;  %3614 = vmatpush3.msra.mxu1 %v3087_v45  ;;  %v3151_v44 = vld [vmem:[%s6522_s3 + $0x4f8] sm:$0xff]  ;;  %v3118_v45 = vld [vmem:[%s6521_s2 + $0x270] sm:$0xff] }
  0x75   :  { %853 = vmatmul.mubr.f32.vlgmr.msra.gmra.mxu0 %v4670_v52  ;;  %4129 = vmatprep.subr.mxu0 %v3071_v46 }
  0x76   :  { %4105 = vmatprep.mubr.msk.f32.mxu1 %vm4461_vm0, %v4460_v0  ;;  %4130 = vmatpush3.msra.mxu0 %v3071_v46  ;;  %v3135_v46 = vld [vmem:[%s6522_s3 + $0x478] sm:$0xff] }
  0x77   :  { %3615 = vmatprep.subr.mxu1 %v3102_v47  ;;  %4106 = vmatmul.mubr.f32.gmra.mxu1 %v4710_v62  ;;  %v3149_v47 = vld [vmem:[%s6522_s3 + $0x4e8] sm:$0xff] }
  0x78   :  { %4131 = vmatprep.subr.mxu0 %v3070_v49  ;;  %3616 = vmatpush3.msra.mxu1 %v3086_v53  ;;  %v3115_v53 = vld [vmem:[%s6521_s2 + $0x258] sm:$0xff] }
  0x79   :  { %4132 = vmatpush3.msra.mxu0 %v3070_v49  ;;  %3617 = vmatprep.subr.mxu1 %v3101_v54  ;;  %v3148_v49 = vld [vmem:[%s6522_s3 + $0x4e0] sm:$0xff]  ;;  %v3147_v54 = vld [vmem:[%s6522_s3 + $0x4d8] sm:$0xff] }
  0x7a   :  { %4133 = vmatprep.subr.mxu0 %v3069_v56  ;;  %3618 = vmatpush3.msra.mxu1 %v3085_v57  ;;  %v3146_v57 = vld [vmem:[%s6522_s3 + $0x4d0] sm:$0xff] }
  0x7b   :  { %4108 = vmatprep.mubr.msk.f32.mxu1 %vm4461_vm0, %v4460_v0  ;;  %4134 = vmatpush3.msra.mxu0 %v3069_v56  ;;  %v3114_v56 = vld [vmem:[%s6521_s2 + $0x250] sm:$0xff] }
  0x7c   :  { %3619 = vmatprep.subr.mxu1 %v3100_v58  ;;  %4109 = vmatmul.mubr.f32.gmra.mxu1 %v4900_v51  ;;  %v3113_v58 = vld [vmem:[%s6521_s2 + $0x248] sm:$0xff] }
  0x7d   :  { %4135 = vmatprep.subr.mxu0 %v3068_v59  ;;  %3620 = vmatpush3.msra.mxu1 %v3084_v60  ;;  %v3112_v60 = vld [vmem:[%s6521_s2 + $0x240] sm:$0xff] }
  0x7e   :  { %4136 = vmatpush3.msra.mxu0 %v3068_v59  ;;  %3621 = vmatprep.subr.mxu1 %v3099_v61  ;;  %v3145_v59 = vld [vmem:[%s6522_s3 + $0x4c8] sm:$0xff]  ;;  %v3144_v61 = vld [vmem:[%s6522_s3 + $0x4c0] sm:$0xff] }
  0x7f   :  { %4137 = vmatprep.subr.mxu0 %v3067_v63  ;;  %3622 = vmatpush3.msra.mxu1 %v3083_v1  ;;  %v3128_v1 = vld [vmem:[%s6522_s3 + $0x440] sm:$0xff] }
  0x80   :  { %4111 = vmatprep.mubr.msk.f32.mxu1 %vm4461_vm0, %v4460_v0  ;;  %4138 = vmatpush3.msra.mxu0 %v3067_v63  ;;  %v5324_v63 = vld [vmem:[%s6523_s0 + $0x60] sm:$0xff] }
  0x81   :  { %4112 = vmatmul.mubr.f32.gmra.mxu1 %v4762_v13  ;;  %4139 = vmatprep.subr.mxu0 %v3066_v2 }
  0x82   :  { %3623 = vmatprep.subr.mxu1 %v3098_v3  ;;  %4140 = vmatpush3.msra.mxu0 %v3066_v2  ;;  %v3143_v2 = vld [vmem:[%s6522_s3 + $0x4b8] sm:$0xff]  ;;  %v3110_v3 = vld [vmem:[%s6521_s2 + $0x230] sm:$0xff] }
  0x83   :  { %3624 = vmatpush3.msra.mxu1 %v3082_v5  ;;  %4141 = vmatprep.subr.mxu0 %v3065_v7  ;;  %v5346_v5 = vld [vmem:[%s6523_s0 + $0x68] sm:$0xff] }
  0x84   :  { %3625 = vmatprep.subr.mxu1 %v3097_v8  ;;  %4114 = vmatprep.mubr.msk.f32.mxu1 %vm4461_vm0, %v4460_v0  ;;  %v5354_v8 = vld [vmem:[%s6523_s0 + $0x70] sm:$0xff] }
  0x85   :  { %4142 = vmatpush3.msra.mxu0 %v3065_v7  ;;  %3626 = vmatpush3.msra.mxu1 %v3081_v9  ;;  %v3142_v7 = vld [vmem:[%s6522_s3 + $0x4b0] sm:$0xff]  ;;  %v3109_v9 = vld [vmem:[%s6521_s2 + $0x228] sm:$0xff] }
  0x86   :  { %4143 = vmatprep.subr.mxu0 %v3064_v10  ;;  %4115 = vmatmul.mubr.f32.gmra.mxu1 %v4788_v20 }
  0x87   :  { %3627 = vmatprep.subr.mxu1 %v3096_v11  ;;  %4144 = vmatpush3.msra.mxu0 %v3064_v10  ;;  %v3126_v10 = vld [vmem:[%s6522_s3 + $0x430] sm:$0xff]  ;;  %v3141_v11 = vld [vmem:[%s6522_s3 + $0x4a8] sm:$0xff] }
  0x88   :  { %3628 = vmatpush3.msra.mxu1 %v3080_v12  ;;  %4145 = vmatprep.subr.mxu0 %v3063_v14  ;;  %v3108_v12 = vld [vmem:[%s6521_s2 + $0x220] sm:$0xff] }
  0x89   :  { %3629 = vmatprep.subr.mxu1 %v3095_v15  ;;  %4117 = vmatprep.mubr.msk.f32.mxu1 %vm4461_vm0, %v4460_v0  ;;  %v3140_v15 = vld [vmem:[%s6522_s3 + $0x4a0] sm:$0xff] }
  0x8a   :  { %4146 = vmatpush3.msra.mxu0 %v3063_v14  ;;  %3630 = vmatpush3.msra.mxu1 %v3079_v16  ;;  %v3125_v14 = vld [vmem:[%s6522_s3 + $0x428] sm:$0xff]  ;;  %v3107_v16 = vld [vmem:[%s6521_s2 + $0x218] sm:$0xff] }
  0x8b   :  { %4147 = vmatprep.subr.mxu0 %v3062_v17  ;;  %4118 = vmatmul.mubr.f32.gmra.mxu1 %v4949_v4 }
  0x8c   :  { %4148 = vmatpush3.msra.mxu0 %v3062_v17  ;;  %3631 = vmatprep.subr.mxu1 %v3094_v18  ;;  %v3124_v17 = vld [vmem:[%s6522_s3 + $0x420] sm:$0xff]  ;;  %v3139_v18 = vld [vmem:[%s6522_s3 + $0x498] sm:$0xff] }
  0x8d   :  { %4149 = vmatprep.subr.mxu0 %v3061_v21  ;;  %3632 = vmatpush3.msra.mxu1 %v3078_v22  ;;  %v3123_v22 = vld [vmem:[%s6522_s3 + $0x418] sm:$0xff] }
  0x8e   :  { %4120 = vmatprep.mubr.msk.f32.mxu1 %vm4461_vm0, %v4460_v0  ;;  %4150 = vmatpush3.msra.mxu0 %v3061_v21  ;;  %v3106_v21 = vld [vmem:[%s6521_s2 + $0x210] sm:$0xff] }
  0x8f   :  { %3633 = vmatprep.subr.mxu1 %v3093_v23  ;;  %4121 = vmatmul.mubr.f32.gmra.mxu1 %v4840_v34  ;;  %v3138_v23 = vld [vmem:[%s6522_s3 + $0x490] sm:$0xff] }
  0x90   :  { %4151 = vmatprep.subr.mxu0 %v3060_v24  ;;  %3634 = vmatpush3.msra.mxu1 %v3077_v25  ;;  %v3122_v25 = vld [vmem:[%s6522_s3 + $0x410] sm:$0xff] }
  0x91   :  { %4152 = vmatpush3.msra.mxu0 %v3060_v24  ;;  %3635 = vmatprep.subr.mxu1 %v3092_v26  ;;  %v3105_v24 = vld [vmem:[%s6521_s2 + $0x208] sm:$0xff] }
  0x92   :  { %4153 = vmatprep.subr.mxu0 %v3059_v28  ;;  %3636 = vmatpush3.msra.mxu1 %v3076_v29  ;;  %v3137_v26 = vld [vmem:[%s6522_s3 + $0x488] sm:$0xff] }
  0x93   :  { %4123 = vmatprep.mubr.msk.f32.mxu1 %vm4461_vm0, %v4460_v0  ;;  %4154 = vmatpush3.msra.mxu0 %v3059_v28  ;;  %v3104_v28 = vld [vmem:[%s6521_s2 + $0x200] sm:$0xff]  ;;  %v3121_v29 = vld [vmem:[%s6522_s3 + $0x408] sm:$0xff] }
  0x94   :  { %3637 = vmatprep.subr.mxu1 %v3091_v30  ;;  %4124 = vmatmul.mubr.f32.gmra.mxu1 %v4866_v41  ;;  %v1200_v30 = vld [vmem:[%s6523_s0] sm:$0xff] }
  0x95   :  { %4155 = vmatprep.subr.mxu0 %v3058_v31  ;;  %3638 = vmatpush3.msra.mxu1 %v3075_v32  ;;  %v5418_v32 = vld [vmem:[%s6523_s0 + $0x8] sm:$0xff] }
  0x96   :  { %4156 = vmatpush3.msra.mxu0 %v3058_v31  ;;  %3639 = vmatprep.subr.mxu1 %v3090_v33  ;;  %v3136_v31 = vld [vmem:[%s6522_s3 + $0x480] sm:$0xff] }
  0x97   :  { %4157 = vmatprep.subr.mxu0 %v3057_v35  ;;  %3640 = vmatpush3.msra.mxu1 %v3074_v36  ;;  %v3120_v33 = vld [vmem:[%s6522_s3 + $0x400] sm:$0xff]  ;;  %v3211_v36 = vld [vmem:[%s6522_s3 + $0x5f8] sm:$0xff] }
  0x98   :  { %4126 = vmatprep.mubr.msk.f32.mxu1 %vm4461_vm0, %v4460_v0  ;;  %4158 = vmatpush3.msra.mxu0 %v3057_v35  ;;  %v3179_v35 = vld [vmem:[%s6521_s2 + $0x2f8] sm:$0xff] }
  0x99   :  { %3641 = vmatprep.subr.mxu1 %v3089_v37  ;;  %4127 = vmatmul.mubr.f32.gmra.mxu1 %v4998_v19  ;;  %v3178_v37 = vld [vmem:[%s6521_s2 + $0x2f0] sm:$0xff] }
  0x9a   :  { %4159 = vmatprep.subr.mxu0 %v3056_v38  ;;  %3642 = vmatpush3.msra.mxu1 %v3073_v39  ;;  %v3195_v39 = vld [vmem:[%s6522_s3 + $0x578] sm:$0xff] }
  0x9b   :  { %4160 = vmatpush3.msra.mxu0 %v3056_v38  ;;  %4161 = vmatprep.mubr.f32.mxu0 %v4653_v48  ;;  %v3150_v48 = vld [vmem:[%s6522_s3 + $0x4f0] sm:$0xff]  ;;  %v5436_v38 = vld [vmem:[%s6524_s1 + $0x8] sm:$0xff] }
  0x9c   :  { %3643 = vmatprep.subr.mxu1 %v3088_v40  ;;  %4162 = vmatmul.mubr.f32.vlgmr.msra.gmra.mxu0 %v4683_v55  ;;  %v3117_v55 = vld [vmem:[%s6521_s2 + $0x268] sm:$0xff]  ;;  %v5445_v40 = vld [vmem:[%s6523_s0 + $0x10] sm:$0xff] }
  0x9d   :  { %3644 = vmatpush3.msra.mxu1 %v3072_v42  ;;  %4179 = vmatprep.subr.mxu0 %v3119_v43  ;;  %v5450_v42 = vld [vmem:[%s6524_s1] sm:$0xff] }
  0x9e   :  { %1145 = vmatprep.mubr.f32.mxu1 %v4662_v50  ;;  %4180 = vmatpush3.msra.mxu0 %v3119_v43  ;;  %v3134_v50 = vld [vmem:[%s6522_s3 + $0x470] sm:$0xff] }
  0x9f   :  { %3680 = vmatprep.subr.mxu1 %v3151_v44  ;;  %1146 = vmatmul.mubr.f32.vlgmr.msra.gmra.mxu1 %v4670_v52  ;;  %v3116_v52 = vld [vmem:[%s6521_s2 + $0x260] sm:$0xff]  ;;  %v3210_v43 = vld [vmem:[%s6522_s3 + $0x5f0] sm:$0xff]  ;;  %v3177_v44 = vld [vmem:[%s6521_s2 + $0x2e8] sm:$0xff] }
  0xa0   :  { %4181 = vmatprep.subr.mxu0 %v3118_v45  ;;  %3681 = vmatpush3.msra.mxu1 %v3135_v46  ;;  %v3209_v46 = vld [vmem:[%s6522_s3 + $0x5e8] sm:$0xff] }
  0xa1   :  { %4164 = vmatprep.mubr.f32.mxu0 %v4710_v62  ;;  %4182 = vmatpush3.msra.mxu0 %v3118_v45  ;;  %v3133_v62 = vld [vmem:[%s6522_s3 + $0x468] sm:$0xff]  ;;  %v3194_v45 = vld [vmem:[%s6522_s3 + $0x570] sm:$0xff] }
  0xa2   :  { %3682 = vmatprep.subr.mxu1 %v3150_v48  ;;  %4165 = vmatmul.mubr.f32.gmra.mxu0 %v4736_v6  ;;  %v3132_v6 = vld [vmem:[%s6522_s3 + $0x460] sm:$0xff] }
  0xa3   :  { %4183 = vmatprep.subr.mxu0 %v3117_v55  ;;  %3683 = vmatpush3.msra.mxu1 %v3134_v50  ;;  %v3176_v48 = vld [vmem:[%s6521_s2 + $0x2e0] sm:$0xff] }
  0xa4   :  { %4184 = vmatpush3.msra.mxu0 %v3117_v55  ;;  %3684 = vmatprep.subr.mxu1 %v3149_v47  ;;  %v3193_v55 = vld [vmem:[%s6522_s3 + $0x568] sm:$0xff]  ;;  %v5476_v50 = vld [vmem:[%s6523_s0 + $0x20] sm:$0xff] }
  0xa5   :  { %4185 = vmatprep.subr.mxu0 %v3116_v52  ;;  %3685 = vmatpush3.msra.mxu1 %v3133_v62  ;;  %v3208_v47 = vld [vmem:[%s6522_s3 + $0x5e0] sm:$0xff] }
  0xa6   :  { %4167 = vmatprep.mubr.f32.mxu0 %v4762_v13  ;;  %4186 = vmatpush3.msra.mxu0 %v3116_v52  ;;  %v3131_v13 = vld [vmem:[%s6522_s3 + $0x458] sm:$0xff]  ;;  %v3192_v62 = vld [vmem:[%s6522_s3 + $0x560] sm:$0xff] }
  0xa7   :  { %3686 = vmatprep.subr.mxu1 %v3148_v49  ;;  %4168 = vmatmul.mubr.f32.gmra.mxu0 %v4788_v20  ;;  %v3130_v20 = vld [vmem:[%s6522_s3 + $0x450] sm:$0xff]  ;;  %v3175_v52 = vld [vmem:[%s6521_s2 + $0x2d8] sm:$0xff] }
  0xa8   :  { %4187 = vmatprep.subr.mxu0 %v3115_v53  ;;  %3687 = vmatpush3.msra.mxu1 %v3132_v6  ;;  %v3207_v49 = vld [vmem:[%s6522_s3 + $0x5d8] sm:$0xff] }
  0xa9   :  { %4188 = vmatpush3.msra.mxu0 %v3115_v53  ;;  %3688 = vmatprep.subr.mxu1 %v3147_v54  ;;  %v3174_v53 = vld [vmem:[%s6521_s2 + $0x2d0] sm:$0xff]  ;;  %v3191_v6 = vld [vmem:[%s6522_s3 + $0x558] sm:$0xff] }
  0xaa   :  { %4189 = vmatprep.subr.mxu0 %v3114_v56  ;;  %3689 = vmatpush3.msra.mxu1 %v3131_v13  ;;  %v5506_v54 = vld [vmem:[%s6523_s0 + $0x30] sm:$0xff]  ;;  %v3173_v13 = vld [vmem:[%s6521_s2 + $0x2c8] sm:$0xff] }
  0xab   :  { %4170 = vmatprep.mubr.f32.mxu0 %v4814_v27  ;;  %4190 = vmatpush3.msra.mxu0 %v3114_v56  ;;  %v3129_v27 = vld [vmem:[%s6522_s3 + $0x448] sm:$0xff]  ;;  %v3206_v56 = vld [vmem:[%s6522_s3 + $0x5d0] sm:$0xff] }
  0xac   :  { %3690 = vmatprep.subr.mxu1 %v3146_v57  ;;  %4171 = vmatmul.mubr.f32.gmra.mxu0 %v4840_v34  ;;  %v3111_v34 = vld [vmem:[%s6521_s2 + $0x238] sm:$0xff]  ;;  %v3190_v57 = vld [vmem:[%s6522_s3 + $0x550] sm:$0xff] }
  0xad   :  { %4191 = vmatprep.subr.mxu0 %v3113_v58  ;;  %3691 = vmatpush3.msra.mxu1 %v3130_v20  ;;  %v3172_v20 = vld [vmem:[%s6521_s2 + $0x2c0] sm:$0xff] }
  0xae   :  { %4192 = vmatpush3.msra.mxu0 %v3113_v58  ;;  %3692 = vmatprep.subr.mxu1 %v3145_v59  ;;  %v3205_v58 = vld [vmem:[%s6522_s3 + $0x5c8] sm:$0xff] }
  0xaf   :  { %4193 = vmatprep.subr.mxu0 %v3112_v60  ;;  %3693 = vmatpush3.msra.mxu1 %v3129_v27  ;;  %v3189_v59 = vld [vmem:[%s6522_s3 + $0x548] sm:$0xff]  ;;  %v3204_v27 = vld [vmem:[%s6522_s3 + $0x5c0] sm:$0xff] }
  0xb0   :  { %4173 = vmatprep.mubr.f32.mxu0 %v4866_v41  ;;  %4194 = vmatpush3.msra.mxu0 %v3112_v60  ;;  %v3127_v41 = vld [vmem:[%s6522_s3 + $0x438] sm:$0xff]  ;;  %v5531_v60 = vld [vmem:[%s6523_s0 + $0x40] sm:$0xff] }
  0xb1   :  { %3694 = vmatprep.subr.mxu1 %v3144_v61  ;;  %4174 = vmatmul.mubr.f32.gmra.mxu0 %v5324_v63  ;;  %v3171_v61 = vld [vmem:[%s6521_s2 + $0x2b8] sm:$0xff] }
  0xb2   :  { %4195 = vmatprep.subr.mxu0 %v3111_v34  ;;  %3695 = vmatpush3.msra.mxu1 %v3128_v1  ;;  %v3203_v1 = vld [vmem:[%s6522_s3 + $0x5b8] sm:$0xff] }
  0xb3   :  { %4196 = vmatpush3.msra.mxu0 %v3111_v34  ;;  %3696 = vmatprep.subr.mxu1 %v3143_v2  ;;  %v3188_v34 = vld [vmem:[%s6522_s3 + $0x540] sm:$0xff]  ;;  %v3170_v2 = vld [vmem:[%s6521_s2 + $0x2b0] sm:$0xff] }
  0xb4   :  { %4197 = vmatprep.subr.mxu0 %v3110_v3  ;;  %3697 = vmatpush3.msra.mxu1 %v3127_v41  ;;  %v5561_v41 = vld [vmem:[%s6523_s0 + $0x50] sm:$0xff] }
  0xb5   :  { %4176 = vmatprep.mubr.f32.mxu0 %v5346_v5  ;;  %4198 = vmatpush3.msra.mxu0 %v3110_v3  ;;  %v3187_v3 = vld [vmem:[%s6522_s3 + $0x538] sm:$0xff] }
  0xb6   :  { %3698 = vmatprep.subr.mxu1 %v3142_v7  ;;  %4177 = vmatmul.mubr.f32.gmra.mxu0 %v5354_v8  ;;  %v3202_v7 = vld [vmem:[%s6522_s3 + $0x5b0] sm:$0xff] }
  0xb7   :  { %4199 = vmatprep.subr.mxu0 %v3109_v9  ;;  %3699 = vmatpush3.msra.mxu1 %v3126_v10  ;;  %v3186_v10 = vld [vmem:[%s6522_s3 + $0x530] sm:$0xff] }
  0xb8   :  { %4200 = vmatpush3.msra.mxu0 %v3109_v9  ;;  %3700 = vmatprep.subr.mxu1 %v3141_v11  ;;  %v3169_v9 = vld [vmem:[%s6521_s2 + $0x2a8] sm:$0xff] }
  0xb9   :  { %4201 = vmatprep.subr.mxu0 %v3108_v12  ;;  %3701 = vmatpush3.msra.mxu1 %v3125_v14  ;;  %v3201_v11 = vld [vmem:[%s6522_s3 + $0x5a8] sm:$0xff] }
  0xba   :  { %4202 = vmatpush3.msra.mxu0 %v3108_v12  ;;  %3702 = vmatprep.subr.mxu1 %v3140_v15  ;;  %v3168_v12 = vld [vmem:[%s6521_s2 + $0x2a0] sm:$0xff]  ;;  %v3185_v14 = vld [vmem:[%s6522_s3 + $0x528] sm:$0xff] }
  0xbb   :  { %4203 = vmatprep.subr.mxu0 %v3107_v16  ;;  %3703 = vmatpush3.msra.mxu1 %v3124_v17  ;;  %v3200_v15 = vld [vmem:[%s6522_s3 + $0x5a0] sm:$0xff]  ;;  %v3199_v17 = vld [vmem:[%s6522_s3 + $0x598] sm:$0xff] }
  0xbc   :  { %4204 = vmatpush3.msra.mxu0 %v3107_v16  ;;  %3704 = vmatprep.subr.mxu1 %v3139_v18  ;;  %v3167_v16 = vld [vmem:[%s6521_s2 + $0x298] sm:$0xff]  ;;  %v3166_v18 = vld [vmem:[%s6521_s2 + $0x290] sm:$0xff] }
  0xbd   :  { %4205 = vmatprep.subr.mxu0 %v3106_v21  ;;  %3705 = vmatpush3.msra.mxu1 %v3123_v22  ;;  %v3183_v22 = vld [vmem:[%s6522_s3 + $0x518] sm:$0xff] }
  0xbe   :  { %4206 = vmatpush3.msra.mxu0 %v3106_v21  ;;  %3706 = vmatprep.subr.mxu1 %v3138_v23  ;;  %v3198_v23 = vld [vmem:[%s6522_s3 + $0x590] sm:$0xff] }
  0xbf   :  { %4207 = vmatprep.subr.mxu0 %v3105_v24  ;;  %3707 = vmatpush3.msra.mxu1 %v3122_v25 }
  0xc0   :  { %4208 = vmatpush3.msra.mxu0 %v3105_v24  ;;  %3708 = vmatprep.subr.mxu1 %v3137_v26  ;;  %v5609_v26 = vld [vmem:[%s6523_s0 + $0x78] sm:$0xff] }
  0xc1   :  { %4209 = vmatprep.subr.mxu0 %v3104_v28  ;;  %3709 = vmatpush3.msra.mxu1 %v3121_v29  ;;  %v3182_v29 = vld [vmem:[%s6522_s3 + $0x510] sm:$0xff] }
  0xc2   :  { %4210 = vmatpush3.msra.mxu0 %v3104_v28  ;;  %4211 = vmatprep.mubr.f32.mxu0 %v1200_v30  ;;  %v3165_v28 = vld [vmem:[%s6521_s2 + $0x288] sm:$0xff] }
  0xc3   :  { %3710 = vmatprep.subr.mxu1 %v3136_v31  ;;  %4212 = vmatmul.mubr.f32.vlgmr.msra.gmra.mxu0 %v5418_v32 }
  0xc4   :  { %3711 = vmatpush3.msra.mxu1 %v3120_v33  ;;  %1475 = vmatprep.mubr.f32.mxu1 %v5436_v38  ;;  %v3197_v33 = vld [vmem:[%s6522_s3 + $0x588] sm:$0xff] }
  0xc5   :  { %4235 = vmatprep.subr.mxu0 %v3179_v35  ;;  %1476 = vmatmul.mubr.f32.vlgmr.msra.gmra.mxu1 %v5450_v42 }
  0xc6   :  { %4236 = vmatpush3.msra.mxu0 %v3179_v35  ;;  %3743 = vmatprep.subr.mxu1 %v3211_v36  ;;  %v3164_v35 = vld [vmem:[%s6521_s2 + $0x280] sm:$0xff] }
  0xc7   :  { %4237 = vmatprep.subr.mxu0 %v3178_v37  ;;  %3744 = vmatpush3.msra.mxu1 %v3195_v39 }
  0xc8   :  { %4214 = vmatprep.mubr.f32.mxu0 %v5445_v40  ;;  %4238 = vmatpush3.msra.mxu0 %v3178_v37  ;;  %v3181_v37 = vld [vmem:[%s6522_s3 + $0x508] sm:$0xff] }
  0xc9   :  { %3745 = vmatprep.subr.mxu1 %v3210_v43  ;;  %4215 = vmatmul.mubr.f32.gmra.mxu0 %v4900_v51  ;;  %v5484_v51 = vld [vmem:[%s6523_s0 + $0x28] sm:$0xff]  ;;  %v3196_v43 = vld [vmem:[%s6522_s3 + $0x580] sm:$0xff] }
  0xca   :  { %4239 = vmatprep.subr.mxu0 %v3177_v44  ;;  %3746 = vmatpush3.msra.mxu1 %v3194_v45 }
  0xcb   :  { %4240 = vmatpush3.msra.mxu0 %v3177_v44  ;;  %3747 = vmatprep.subr.mxu1 %v3209_v46  ;;  %v3180_v46 = vld [vmem:[%s6522_s3 + $0x500] sm:$0xff] }
  0xcc   :  { %4241 = vmatprep.subr.mxu0 %v3176_v48  ;;  %3748 = vmatpush3.msra.mxu1 %v3193_v55  ;;  %v3236_v55 = vld [vmem:[%s6521_s2 + $0x378] sm:$0xff] }
  0xcd   :  { %4217 = vmatprep.mubr.f32.mxu0 %v5476_v50  ;;  %4242 = vmatpush3.msra.mxu0 %v3176_v48 }
  0xce   :  { %3749 = vmatprep.subr.mxu1 %v3208_v47  ;;  %4218 = vmatmul.mubr.f32.gmra.mxu0 %v5484_v51 }
  0xcf   :  { %4243 = vmatprep.subr.mxu0 %v3175_v52  ;;  %3750 = vmatpush3.msra.mxu1 %v3192_v62 }
  0xd0   :  { %4244 = vmatpush3.msra.mxu0 %v3175_v52  ;;  %3751 = vmatprep.subr.mxu1 %v3207_v49  ;;  %v3268_v52 = vld [vmem:[%s6522_s3 + $0x6f8] sm:$0xff] }
  0xd1   :  { %4245 = vmatprep.subr.mxu0 %v3174_v53  ;;  %3752 = vmatpush3.msra.mxu1 %v3191_v6  ;;  %v3154_v49 = vld [vmem:[%s6523_s0 + $0x18] sm:$0xff] }
  0xd2   :  { %4220 = vmatprep.mubr.f32.mxu0 %v5506_v54  ;;  %4246 = vmatpush3.msra.mxu0 %v3174_v53  ;;  %v3267_v53 = vld [vmem:[%s6522_s3 + $0x6f0] sm:$0xff] }
  0xd3   :  { %3753 = vmatprep.subr.mxu1 %v3206_v56  ;;  %4221 = vmatmul.mubr.f32.gmra.mxu0 %v4949_v4  ;;  %v5539_v4 = vld [vmem:[%s6523_s0 + $0x48] sm:$0xff]  ;;  %v3251_v56 = vld [vmem:[%s6522_s3 + $0x670] sm:$0xff] }
  0xd4   :  { %4247 = vmatprep.subr.mxu0 %v3173_v13  ;;  %3754 = vmatpush3.msra.mxu1 %v3190_v57 }
  0xd5   :  { %4248 = vmatpush3.msra.mxu0 %v3173_v13  ;;  %3755 = vmatprep.subr.mxu1 %v3205_v58  ;;  %v3234_v13 = vld [vmem:[%s6521_s2 + $0x368] sm:$0xff] }
  0xd6   :  { %4249 = vmatprep.subr.mxu0 %v3172_v20  ;;  %3756 = vmatpush3.msra.mxu1 %v3189_v59  ;;  %v3266_v58 = vld [vmem:[%s6522_s3 + $0x6e8] sm:$0xff] }
  0xd7   :  { %4223 = vmatprep.mubr.f32.mxu0 %v5531_v60  ;;  %4250 = vmatpush3.msra.mxu0 %v3172_v20  ;;  %v3250_v59 = vld [vmem:[%s6522_s3 + $0x668] sm:$0xff] }
  0xd8   :  { %3757 = vmatprep.subr.mxu1 %v3204_v27  ;;  %4224 = vmatmul.mubr.f32.gmra.mxu0 %v5539_v4  ;;  %v3233_v27 = vld [vmem:[%s6521_s2 + $0x360] sm:$0xff] }
  0xd9   :  { %4251 = vmatprep.subr.mxu0 %v3171_v61  ;;  %3758 = vmatpush3.msra.mxu1 %v3188_v34  ;;  %v5696_v34 = vld [vmem:[%s6523_s0 + $0x38] sm:$0xff] }
  0xda   :  { %4252 = vmatpush3.msra.mxu0 %v3171_v61  ;;  %3759 = vmatprep.subr.mxu1 %v3203_v1  ;;  %v3265_v61 = vld [vmem:[%s6522_s3 + $0x6e0] sm:$0xff] }
  0xdb   :  { %4253 = vmatprep.subr.mxu0 %v3170_v2  ;;  %3760 = vmatpush3.msra.mxu1 %v3187_v3  ;;  %v3232_v3 = vld [vmem:[%s6521_s2 + $0x358] sm:$0xff] }
  0xdc   :  { %4226 = vmatprep.mubr.f32.mxu0 %v5561_v41  ;;  %4254 = vmatpush3.msra.mxu0 %v3170_v2  ;;  %v3249_v2 = vld [vmem:[%s6522_s3 + $0x660] sm:$0xff] }
  0xdd   :  { %3761 = vmatprep.subr.mxu1 %v3202_v7  ;;  %4227 = vmatmul.mubr.f32.gmra.mxu0 %v4998_v19  ;;  %v3184_v19 = vld [vmem:[%s6522_s3 + $0x520] sm:$0xff] }
  0xde   :  { %4255 = vmatprep.subr.mxu0 %v3169_v9  ;;  %3762 = vmatpush3.msra.mxu1 %v3186_v10 }
  0xdf   :  { %4256 = vmatpush3.msra.mxu0 %v3169_v9  ;;  %3763 = vmatprep.subr.mxu1 %v3201_v11  ;;  %v3264_v9 = vld [vmem:[%s6522_s3 + $0x6d8] sm:$0xff] }
  0xe0   :  { %4257 = vmatprep.subr.mxu0 %v3168_v12  ;;  %3764 = vmatpush3.msra.mxu1 %v3185_v14  ;;  %v3248_v11 = vld [vmem:[%s6522_s3 + $0x658] sm:$0xff]  ;;  %v3263_v14 = vld [vmem:[%s6522_s3 + $0x6d0] sm:$0xff] }
  0xe1   :  { %4229 = vmatprep.mubr.f32.mxu0 %v5324_v63  ;;  %4258 = vmatpush3.msra.mxu0 %v3168_v12  ;;  %v129_v21 = vpop.f32.mrf.mxu0  ;;  %v3231_v12 = vld [vmem:[%s6521_s2 + $0x350] sm:$0xff] }
  0xe2   :  { %3765 = vmatprep.subr.mxu1 %v3200_v15  ;;  %4230 = vmatmul.mubr.f32.gmra.mxu0 %v5346_v5 }
  0xe3   :  { %4259 = vmatprep.subr.mxu0 %v3167_v16  ;;  %3766 = vmatpush3.msra.mxu1 %v3184_v19  ;;  %v3459_v24 = vpop.f32.mrf.mxu1  ;;  %v3995_v25 = vpop.f32.mrf.mxu0  ;;  %v3230_v19 = vld [vmem:[%s6521_s2 + $0x348] sm:$0xff] }
  0xe4   :  { %4260 = vmatpush3.msra.mxu0 %v3167_v16  ;;  %3767 = vmatprep.subr.mxu1 %v3199_v17  ;;  %v3247_v16 = vld [vmem:[%s6522_s3 + $0x650] sm:$0xff]  ;;  %v3261_v25 = vld [vmem:[%s6522_s3 + $0x6c0] sm:$0xff] }
  0xe5   :  { %4261 = vmatprep.subr.mxu0 %v3166_v18  ;;  %3768 = vmatpush3.msra.mxu1 %v3183_v22  ;;  %v3460_v30 = vpop.f32.mrf.mxu1  ;;  %v3246_v22 = vld [vmem:[%s6522_s3 + $0x648] sm:$0xff] }
  0xe6   :  { %4232 = vmatprep.mubr.f32.mxu0 %v5354_v8  ;;  %v134_v31 = vpop.f32.mrf.mxu0  ;;  %4262 = vmatpush3.msra.mxu0 %v3166_v18  ;;  %v5624_v36 = vadd.f32 %v3460_v30, %v3459_v24  ;;  %v3262_v18 = vld [vmem:[%s6522_s3 + $0x6c8] sm:$0xff]  ;;  %v3229_v24 = vld [vmem:[%s6521_s2 + $0x340] sm:$0xff]  ;;  %v3228_v30 = vld [vmem:[%s6521_s2 + $0x338] sm:$0xff] }
  0xe7   :  { %3769 = vmatprep.subr.mxu1 %v3198_v23  ;;  %4233 = vmatmul.mubr.f32.gmra.mxu0 %v5609_v26  ;;  %v5744_v23 = vld [vmem:[%s6523_s0 + $0x58] sm:$0xff] }
  0xe8   :  { %4263 = vmatprep.subr.mxu0 %v3165_v28  ;;  %v3998_v39 = vpop.f32.mrf.mxu0  ;;  %3770 = vmatpush3.msra.mxu1 %v3182_v29  ;;  %v5634_v44 = vadd.f32 %v5624_v36, %v134_v31  ;;  %v5637_v45 = vadd.f32 %v5624_v36, %v129_v21  ;;  %v3245_v29 = vld [vmem:[%s6522_s3 + $0x640] sm:$0xff] }
  0xe9   :  { %4264 = vmatpush3.msra.mxu0 %v3165_v28  ;;  %3771 = vmatprep.subr.mxu1 %v3197_v33  ;;  %v3260_v33 = vld [vmem:[%s6522_s3 + $0x6b8] sm:$0xff]  ;;  %v3227_v39 = vld [vmem:[%s6521_s2 + $0x330] sm:$0xff] }
  0xea   :  { %4265 = vmatprep.subr.mxu0 %v3164_v35  ;;  %3772 = vmatpush3.msra.mxu1 %v3181_v37  ;;  %v3244_v37 = vld [vmem:[%s6522_s3 + $0x638] sm:$0xff] }
  0xeb   :  { %4266 = vmatpush3.msra.mxu0 %v3164_v35  ;;  %v139_v48 = vpop.f32.mrf.mxu0  ;;  %4267 = vmatprep.mubr.f32.mxu0 %v5418_v32  ;;  %v3252_v32 = vld [vmem:[%s6522_s3 + $0x678] sm:$0xff] }
  0xec   :  { %3773 = vmatprep.subr.mxu1 %v3196_v43  ;;  %v5647_v47 = vadd.f32 %v5624_v36, %v139_v48  ;;  %4268 = vmatmul.mubr.f32.vlgmr.msra.gmra.mxu0 %v5445_v40  ;;  %v3235_v40 = vld [vmem:[%s6521_s2 + $0x370] sm:$0xff] }
  0xed   :  { %3774 = vmatpush3.msra.mxu1 %v3180_v46  ;;  %v4001_v62 = vpop.f32.mrf.mxu0  ;;  %1796 = vmatprep.mubr.f32.mxu1 %v5436_v38  ;;  %v3259_v43 = vld [vmem:[%s6522_s3 + $0x6b0] sm:$0xff] }
  0xee   :  { %4285 = vmatprep.subr.mxu0 %v4460_v0  ;;  %1797 = vmatmul.mubr.f32.vlgmr.msra.gmra.mxu1 %v5450_v42  ;;  %v3243_v48 = vld [vmem:[%s6522_s3 + $0x630] sm:$0xff]  ;;  %v3258_v62 = vld [vmem:[%s6522_s3 + $0x6a8] sm:$0xff] }
  0xef   :  { %4286 = vmatpush3.msra.mxu0 %v3236_v55  ;;  %3803 = vmatprep.subr.mxu1 %v3268_v52  ;;  %v3226_v55 = vld [vmem:[%s6521_s2 + $0x328] sm:$0xff] }
  0xf0   :  { %4287 = vmatprep.subr.mxu0 %v4460_v0  ;;  %v144_v6 = vpop.f32.mrf.mxu0  ;;  %3804 = vmatpush3.msra.mxu1 %v3252_v32 }
  0xf1   :  { %4270 = vmatprep.mubr.f32.mxu0 %v3154_v49  ;;  %v5676_v57 = vadd.f32 %v5624_v36, %v144_v6  ;;  %4288 = vmatpush3.msra.mxu0 %v3235_v40  ;;  %v3225_v49 = vld [vmem:[%s6521_s2 + $0x320] sm:$0xff]  ;;  %v3224_v6 = vld [vmem:[%s6521_s2 + $0x318] sm:$0xff] }
  0xf2   :  { %3805 = vmatprep.subr.mxu1 %v3267_v53  ;;  %v4004_v20 = vpop.f32.mrf.mxu0  ;;  %4271 = vmatmul.mubr.f32.gmra.mxu0 %v5484_v51  ;;  %v3257_v40 = vld [vmem:[%s6522_s3 + $0x6a0] sm:$0xff] }
  0xf3   :  { %4289 = vmatprep.subr.mxu0 %v4460_v0  ;;  %3806 = vmatpush3.msra.mxu1 %v3251_v56  ;;  %v3241_v53 = vld [vmem:[%s6522_s3 + $0x620] sm:$0xff]  ;;  %v3240_v20 = vld [vmem:[%s6522_s3 + $0x618] sm:$0xff] }
  0xf4   :  { %4290 = vmatpush3.msra.mxu0 %v3234_v13  ;;  %3807 = vmatprep.subr.mxu1 %v3266_v58  ;;  %v3256_v13 = vld [vmem:[%s6522_s3 + $0x698] sm:$0xff] }
  0xf5   :  { %4291 = vmatprep.subr.mxu0 %v4460_v0  ;;  %v149_v1 = vpop.f32.mrf.mxu0  ;;  %3808 = vmatpush3.msra.mxu1 %v3250_v59  ;;  %v3223_v59 = vld [vmem:[%s6521_s2 + $0x310] sm:$0xff] }
  0xf6   :  { %4273 = vmatprep.mubr.f32.mxu0 %v5506_v54  ;;  %v5706_v7 = vadd.f32 %v5624_v36, %v149_v1  ;;  %4292 = vmatpush3.msra.mxu0 %v3233_v27  ;;  %v3239_v1 = vld [vmem:[%s6522_s3 + $0x610] sm:$0xff] }
  0xf7   :  { %3809 = vmatprep.subr.mxu1 %v3265_v61  ;;  %v4007_v10 = vpop.f32.mrf.mxu0  ;;  %4274 = vmatmul.mubr.f32.gmra.mxu0 %v5696_v34 }
  0xf8   :  { %4293 = vmatprep.subr.mxu0 %v4460_v0  ;;  %3810 = vmatpush3.msra.mxu1 %v3249_v2  ;;  %v3222_v2 = vld [vmem:[%s6521_s2 + $0x308] sm:$0xff] }
  0xf9   :  { %4294 = vmatpush3.msra.mxu0 %v3232_v3  ;;  %3811 = vmatprep.subr.mxu1 %v3264_v9  ;;  %v3254_v9 = vld [vmem:[%s6522_s3 + $0x688] sm:$0xff] }
  0xfa   :  { %4295 = vmatprep.subr.mxu0 %v4460_v0  ;;  %v154_v15 = vpop.f32.mrf.mxu0  ;;  %3812 = vmatpush3.msra.mxu1 %v3248_v11  ;;  %v3238_v10 = vld [vmem:[%s6522_s3 + $0x608] sm:$0xff]  ;;  %v3221_v11 = vld [vmem:[%s6521_s2 + $0x300] sm:$0xff] }
  0xfb   :  { %4276 = vmatprep.mubr.f32.mxu0 %v5539_v4  ;;  %v5731_v17 = vadd.f32 %v5624_v36, %v154_v15  ;;  %4296 = vmatpush3.msra.mxu0 %v3231_v12  ;;  %v3253_v12 = vld [vmem:[%s6522_s3 + $0x680] sm:$0xff] }
  0xfc   :  { %3813 = vmatprep.subr.mxu1 %v3263_v14  ;;  %v4010_v21 = vpop.f32.mrf.mxu0  ;;  %4277 = vmatmul.mubr.f32.gmra.mxu0 %v5561_v41  ;;  %v3237_v15 = vld [vmem:[%s6522_s3 + $0x600] sm:$0xff] }
  0xfd   :  { %4297 = vmatprep.subr.mxu0 %v4460_v0  ;;  %3814 = vmatpush3.msra.mxu1 %v3247_v16 }
  0xfe   :  { %4298 = vmatpush3.msra.mxu0 %v3230_v19  ;;  %3815 = vmatprep.subr.mxu1 %v3262_v18  ;;  %v3296_v19 = vld [vmem:[%s6521_s2 + $0x3f8] sm:$0xff] }
  0xff   :  { %4299 = vmatprep.subr.mxu0 %v4460_v0  ;;  %v159_v28 = vpop.f32.mrf.mxu0  ;;  %3816 = vmatpush3.msra.mxu1 %v3246_v22 }
 0x100   :  { %4279 = vmatprep.mubr.f32.mxu0 %v5744_v23  ;;  %v5761_v31 = vadd.f32 %v5624_v36, %v159_v28  ;;  %4300 = vmatpush3.msra.mxu0 %v3229_v24  ;;  %v3328_v24 = vld [vmem:[%s6522_s3 + $0x7f8] sm:$0xff] }
 0x101   :  { %3817 = vmatprep.subr.mxu1 %v3261_v25  ;;  %v4013_v35 = vpop.f32.mrf.mxu0  ;;  %4280 = vmatmul.mubr.f32.gmra.mxu0 %v5346_v5  ;;  %v3295_v25 = vld [vmem:[%s6521_s2 + $0x3f0] sm:$0xff] }
 0x102   :  { %4301 = vmatprep.subr.mxu0 %v4460_v0  ;;  %3818 = vmatpush3.msra.mxu1 %v3245_v29 }
 0x103   :  { %4302 = vmatpush3.msra.mxu0 %v3228_v30  ;;  %3819 = vmatprep.subr.mxu1 %v3260_v33  ;;  %v3312_v33 = vld [vmem:[%s6522_s3 + $0x778] sm:$0xff] }
 0x104   :  { %4303 = vmatprep.subr.mxu0 %v4460_v0  ;;  %v164_v46 = vpop.f32.mrf.mxu0  ;;  %3820 = vmatpush3.msra.mxu1 %v3244_v37 }
 0x105   :  { %4282 = vmatprep.mubr.f32.mxu0 %v5354_v8  ;;  %v5786_v52 = vadd.f32 %v5624_v36, %v164_v46  ;;  %4304 = vmatpush3.msra.mxu0 %v3227_v39  ;;  %v3242_v8 = vld [vmem:[%s6522_s3 + $0x628] sm:$0xff] }
 0x106   :  { %3821 = vmatprep.subr.mxu1 %v3259_v43  ;;  %v4016_v32 = vpop.f32.mrf.mxu0  ;;  %4283 = vmatmul.mubr.f32.gmra.mxu0 %v5609_v26  ;;  %v3294_v39 = vld [vmem:[%s6521_s2 + $0x3e8] sm:$0xff]  ;;  %v3327_v43 = vld [vmem:[%s6522_s3 + $0x7f0] sm:$0xff] }
 0x107   :  { %4305 = vmatprep.subr.mxu0 %v4460_v0  ;;  %3822 = vmatpush3.msra.mxu1 %v3243_v48 }
 0x108   :  { %4306 = vmatpush3.msra.mxu0 %v3226_v55  ;;  %3823 = vmatprep.subr.mxu1 %v3258_v62  ;;  %v3311_v62 = vld [vmem:[%s6522_s3 + $0x770] sm:$0xff] }
 0x109   :  { %4307 = vmatprep.subr.mxu0 %v4460_v0  ;;  %v169_v56 = vpop.f32.mrf.mxu0  ;;  %3824 = vmatpush3.msra.mxu1 %v3242_v8 }
 0x10a   :  { %4308 = vmatpush3.msra.mxu0 %v3225_v49  ;;  %v5813_v58 = vadd.f32 %v5624_v36, %v169_v56  ;;  %3825 = vmatprep.subr.mxu1 %v3257_v40  ;;  %v3255_v36 = vld [vmem:[%s6522_s3 + $0x690] sm:$0xff]  ;;  %v3326_v40 = vld [vmem:[%s6522_s3 + $0x7e8] sm:$0xff] }
 0x10b   :  { %4309 = vmatprep.subr.mxu0 %v4460_v0  ;;  %v4054_v27 = vpop.f32.mrf.mxu1  ;;  %v4019_v61 = vpop.f32.mrf.mxu0  ;;  %3826 = vmatpush3.msra.mxu1 %v3241_v53 }
 0x10c   :  { %4310 = vmatpush3.msra.mxu0 %v3224_v6  ;;  %3827 = vmatprep.subr.mxu1 %v3256_v13  ;;  %v3325_v6 = vld [vmem:[%s6522_s3 + $0x7e0] sm:$0xff] }
 0x10d   :  { %4311 = vmatprep.subr.mxu0 %v4460_v0  ;;  %v407_v3 = vpop.f32.mrf.mxu1  ;;  %3828 = vmatpush3.msra.mxu1 %v3240_v20  ;;  %v3309_v13 = vld [vmem:[%s6522_s3 + $0x760] sm:$0xff] }
 0x10e   :  { %4312 = vmatpush3.msra.mxu0 %v3223_v59  ;;  %3829 = vmatprep.subr.mxu1 %v3255_v36  ;;  %v3291_v59 = vld [vmem:[%s6521_s2 + $0x3d0] sm:$0xff]  ;;  %v3324_v36 = vld [vmem:[%s6522_s3 + $0x7d8] sm:$0xff] }
 0x10f   :  { %4313 = vmatprep.subr.mxu0 %v4460_v0  ;;  %3830 = vmatpush3.msra.mxu1 %v3239_v1  ;;  %v3522_v14 = vpop.f32.mrf.mxu0  ;;  %v3308_v1 = vld [vmem:[%s6522_s3 + $0x758] sm:$0xff] }
 0x110   :  { %4314 = vmatpush3.msra.mxu0 %v3222_v2  ;;  %3831 = vmatprep.subr.mxu1 %v3254_v9  ;;  %v3323_v9 = vld [vmem:[%s6522_s3 + $0x7d0] sm:$0xff] }
 0x111   :  { %4315 = vmatprep.subr.mxu0 %v4460_v0  ;;  %v4057_v16 = vpop.f32.mrf.mxu1  ;;  %3832 = vmatpush3.msra.mxu1 %v3238_v10  ;;  %v3523_v18 = vpop.f32.mrf.mxu0 }
 0x112   :  { %4316 = vmatpush3.msra.mxu0 %v3221_v11  ;;  %4317 = vmatprep.mubr.msk.f32.mxu0 %vm4461_vm0, %v4460_v0  ;;  %v5854_v21 = vadd.f32 %v3523_v18, %v3522_v14 }
 0x113   :  { %3833 = vmatprep.subr.mxu1 %v3253_v12  ;;  %v417_v22 = vpop.f32.mrf.mxu1  ;;  %4318 = vmatmul.mubr.f32.vlgmr.msra.gmra.mxu0 %v5476_v50  ;;  %v3289_v12 = vld [vmem:[%s6521_s2 + $0x3c0] sm:$0xff] }
 0x114   :  { %3834 = vmatpush3.msra.mxu1 %v3237_v15  ;;  %2084 = vmatprep.mubr.f32.mxu1 %v5436_v38  ;;  %v584_v28 = vadd.f32 %v5854_v21, %v417_v22  ;;  %v585_v29 = vadd.f32 %v4057_v16, %v5854_v21  ;;  %v583_v30 = vadd.f32 %v4054_v27, %v5854_v21  ;;  %v3322_v16 = vld [vmem:[%s6522_s3 + $0x7c8] sm:$0xff]  ;;  %v3321_v22 = vld [vmem:[%s6522_s3 + $0x7c0] sm:$0xff] }
 0x115   :  { %4344 = vmatprep.subr.mxu1 %v3296_v19  ;;  %2085 = vmatmul.mubr.f32.vlgmr.msra.gmra.mxu1 %v5450_v42  ;;  %v5874_v37 = vadd.f32 %v5854_v21, %v407_v3 }
 0x116   :  { %4320 = vmatprep.mubr.msk.f32.mxu0 %vm4461_vm0, %v4460_v0  ;;  %v4060_v35 = vpop.f32.mrf.mxu1  ;;  %4345 = vmatpush3.msra.mxu1 %v3296_v19  ;;  %v5883_v46 = vadd.f32 %v584_v28, %v5634_v44  ;;  %v5887_v55 = vadd.f32 %v585_v29, %v5647_v47  ;;  %v5894_v8 = vadd.f32 %v583_v30, %v5637_v45  ;;  %v3293_v44 = vld [vmem:[%s6521_s2 + $0x3e0] sm:$0xff]  ;;  %v3310_v45 = vld [vmem:[%s6522_s3 + $0x768] sm:$0xff]  ;;  %v3287_v29 = vld [vmem:[%s6521_s2 + $0x3b0] sm:$0xff] }
 0x117   :  { %3866 = vmatprep.subr.mxu0 %v3328_v24  ;;  %v587_v48 = vadd.f32 %v4060_v35, %v5854_v21  ;;  %4346 = vmatprep.subr.mxu1 %v3295_v25  ;;  %v3306_v19 = vld [vmem:[%s6522_s3 + $0x748] sm:$0xff]  ;;  %v3320_v35 = vld [vmem:[%s6522_s3 + $0x7b8] sm:$0xff] }
 0x118   :  { %4321 = vmatmul.mubr.f32.gmra.mxu0 %v5484_v51  ;;  %v427_v32 = vpop.f32.mrf.mxu1  ;;  %4347 = vmatpush3.msra.mxu1 %v3295_v25  ;;  %v3305_v25 = vld [vmem:[%s6522_s3 + $0x740] sm:$0xff] }
 0x119   :  { %3867 = vmatpush3.msra.mxu0 %v3312_v33  ;;  %v5900_v47 = vadd.f32 %v587_v48, %v5676_v57  ;;  %v5903_v49 = vadd.f32 %v5854_v21, %v427_v32  ;;  %4348 = vmatprep.subr.mxu1 %v3294_v39  ;;  %v3292_v57 = vld [vmem:[%s6521_s2 + $0x3d8] sm:$0xff]  ;;  %v3285_v48 = vld [vmem:[%s6521_s2 + $0x3a0] sm:$0xff]  ;;  %v3302_v32 = vld [vmem:[%s6522_s3 + $0x728] sm:$0xff] }
 0x11a   :  { %3868 = vmatprep.subr.mxu0 %v3327_v43  ;;  %4349 = vmatpush3.msra.mxu1 %v3294_v39  ;;  %v3304_v39 = vld [vmem:[%s6522_s3 + $0x738] sm:$0xff] }
 0x11b   :  { %3869 = vmatpush3.msra.mxu0 %v3311_v62  ;;  %v4063_v53 = vpop.f32.mrf.mxu1  ;;  %4323 = vmatprep.mubr.msk.f32.mxu0 %vm4461_vm0, %v4460_v0  ;;  %v3318_v62 = vld [vmem:[%s6522_s3 + $0x7a8] sm:$0xff] }
 0x11c   :  { %4350 = vmatprep.subr.mxu1 %v3293_v44  ;;  %v589_v56 = vadd.f32 %v4063_v53, %v5854_v21  ;;  %3870 = vmatprep.subr.mxu0 %v3326_v40  ;;  %v3317_v40 = vld [vmem:[%s6522_s3 + $0x7a0] sm:$0xff]  ;;  %v3283_v53 = vld [vmem:[%s6521_s2 + $0x390] sm:$0xff] }
 0x11d   :  { %4324 = vmatmul.mubr.f32.gmra.mxu0 %v5506_v54  ;;  %v437_v20 = vpop.f32.mrf.mxu1  ;;  %4351 = vmatpush3.msra.mxu1 %v3293_v44  ;;  %v3284_v44 = vld [vmem:[%s6521_s2 + $0x398] sm:$0xff] }
 0x11e   :  { %3871 = vmatpush3.msra.mxu0 %v3310_v45  ;;  %v5928_v27 = vadd.f32 %v589_v56, %v5731_v17  ;;  %v588_v61 = vadd.f32 %v5854_v21, %v437_v20  ;;  %4352 = vmatprep.subr.mxu1 %v3292_v57  ;;  %v3290_v17 = vld [vmem:[%s6521_s2 + $0x3c8] sm:$0xff]  ;;  %v3301_v45 = vld [vmem:[%s6522_s3 + $0x720] sm:$0xff]  ;;  %v3315_v20 = vld [vmem:[%s6522_s3 + $0x790] sm:$0xff] }
 0x11f   :  { %3872 = vmatprep.subr.mxu0 %v3325_v6  ;;  %4353 = vmatpush3.msra.mxu1 %v3292_v57  ;;  %v3316_v6 = vld [vmem:[%s6522_s3 + $0x798] sm:$0xff] }
 0x120   :  { %3873 = vmatpush3.msra.mxu0 %v3309_v13  ;;  %v5938_v2 = vadd.f32 %v588_v61, %v5706_v7  ;;  %v4066_v3 = vpop.f32.mrf.mxu1  ;;  %4326 = vmatprep.mubr.msk.f32.mxu0 %vm4461_vm0, %v4460_v0  ;;  %v3307_v7 = vld [vmem:[%s6522_s3 + $0x750] sm:$0xff]  ;;  %v3282_v13 = vld [vmem:[%s6521_s2 + $0x388] sm:$0xff] }
 0x121   :  { %4354 = vmatprep.subr.mxu1 %v3291_v59  ;;  %v591_v10 = vadd.f32 %v4066_v3, %v5854_v21  ;;  %3874 = vmatprep.subr.mxu0 %v3324_v36  ;;  %v3299_v61 = vld [vmem:[%s6522_s3 + $0x710] sm:$0xff]  ;;  %v3281_v36 = vld [vmem:[%s6521_s2 + $0x380] sm:$0xff]  ;;  %v3314_v3 = vld [vmem:[%s6522_s3 + $0x788] sm:$0xff] }
 0x122   :  { %4327 = vmatmul.mubr.f32.gmra.mxu0 %v5531_v60  ;;  %v447_v11 = vpop.f32.mrf.mxu1  ;;  %4355 = vmatpush3.msra.mxu1 %v3291_v59 }
 0x123   :  { %3875 = vmatpush3.msra.mxu0 %v3308_v1  ;;  %v5957_v14 = vadd.f32 %v591_v10, %v5761_v31  ;;  %v5960_v15 = vadd.f32 %v5854_v21, %v447_v11  ;;  %4356 = vmatprep.subr.mxu1 %v3290_v17  ;;  %v3288_v31 = vld [vmem:[%s6521_s2 + $0x3b8] sm:$0xff] }
 0x124   :  { %3876 = vmatprep.subr.mxu0 %v3323_v9  ;;  %4357 = vmatpush3.msra.mxu1 %v3290_v17 }
 0x125   :  { %3877 = vmatpush3.msra.mxu0 %v3307_v7  ;;  %v4069_v18 = vpop.f32.mrf.mxu1  ;;  %4329 = vmatprep.mubr.msk.f32.mxu0 %vm4461_vm0, %v4460_v0 }
 0x126   :  { %4358 = vmatprep.subr.mxu1 %v3289_v12  ;;  %v593_v24 = vadd.f32 %v4069_v18, %v5854_v21  ;;  %3878 = vmatprep.subr.mxu0 %v3322_v16  ;;  %v3313_v16 = vld [vmem:[%s6522_s3 + $0x780] sm:$0xff]  ;;  %v3353_v18 = vld [vmem:[%s6521_s2 + $0x478] sm:$0xff] }
 0x127   :  { %4330 = vmatmul.mubr.f32.gmra.mxu0 %v5539_v4  ;;  %v457_v28 = vpop.f32.mrf.mxu1  ;;  %4359 = vmatpush3.msra.mxu1 %v3289_v12  ;;  %v4457_v12 = vld [vmem:[%s6523_s0 + $0x70] sm:$0xff] }
 0x128   :  { %3879 = vmatpush3.msra.mxu0 %v3306_v19  ;;  %v5985_v30 = vadd.f32 %v593_v24, %v5813_v58  ;;  %v592_v33 = vadd.f32 %v5854_v21, %v457_v28  ;;  %4360 = vmatprep.subr.mxu1 %v3288_v31  ;;  %v3286_v58 = vld [vmem:[%s6521_s2 + $0x3a8] sm:$0xff]  ;;  %v3319_v21 = vld [vmem:[%s6522_s3 + $0x7b0] sm:$0xff]  ;;  %v3297_v19 = vld [vmem:[%s6522_s3 + $0x700] sm:$0xff] }
 0x129   :  { %3880 = vmatprep.subr.mxu0 %v3321_v22  ;;  %4361 = vmatpush3.msra.mxu1 %v3288_v31 }
 0x12a   :  { %3881 = vmatpush3.msra.mxu0 %v3305_v25  ;;  %v5995_v43 = vadd.f32 %v592_v33, %v5786_v52  ;;  %4332 = vmatprep.mubr.msk.f32.mxu0 %vm4461_vm0, %v4460_v0  ;;  %v3303_v52 = vld [vmem:[%s6522_s3 + $0x730] sm:$0xff] }
 0x12b   :  { %4362 = vmatprep.subr.mxu1 %v3287_v29  ;;  %3882 = vmatprep.subr.mxu0 %v3320_v35 }
 0x12c   :  { %4333 = vmatmul.mubr.f32.gmra.mxu0 %v5561_v41  ;;  %4363 = vmatpush3.msra.mxu1 %v3287_v29  ;;  %v3384_v29 = vld [vmem:[%s6522_s3 + $0x8f0] sm:$0xff] }
 0x12d   :  { %3883 = vmatpush3.msra.mxu0 %v3304_v39  ;;  %4364 = vmatprep.subr.mxu1 %v3286_v58 }
 0x12e   :  { %3884 = vmatprep.subr.mxu0 %v3319_v21  ;;  %4365 = vmatpush3.msra.mxu1 %v3286_v58  ;;  %v3367_v21 = vld [vmem:[%s6522_s3 + $0x868] sm:$0xff] }
 0x12f   :  { %3885 = vmatpush3.msra.mxu0 %v3303_v52  ;;  %4335 = vmatprep.mubr.msk.f32.mxu0 %vm4461_vm0, %v4460_v0  ;;  %v3382_v52 = vld [vmem:[%s6522_s3 + $0x8e0] sm:$0xff] }
 0x130   :  { %4366 = vmatprep.subr.mxu1 %v3285_v48  ;;  %3886 = vmatprep.subr.mxu0 %v3318_v62 }
 0x131   :  { %4336 = vmatmul.mubr.f32.gmra.mxu0 %v5324_v63  ;;  %4367 = vmatpush3.msra.mxu1 %v3285_v48  ;;  %v3300_v63 = vld [vmem:[%s6522_s3 + $0x718] sm:$0xff]  ;;  %v3366_v48 = vld [vmem:[%s6522_s3 + $0x860] sm:$0xff] }
 0x132   :  { %3887 = vmatpush3.msra.mxu0 %v3302_v32  ;;  %v711_v57 = vpop.f32.mrf.mxu1  ;;  %4368 = vmatprep.subr.mxu1 %v3284_v44  ;;  %v3381_v32 = vld [vmem:[%s6522_s3 + $0x8d8] sm:$0xff] }
 0x133   :  { %3888 = vmatprep.subr.mxu0 %v3317_v40  ;;  %4369 = vmatpush3.msra.mxu1 %v3284_v44 }
 0x134   :  { %3889 = vmatpush3.msra.mxu0 %v3301_v45  ;;  %v4104_v56 = vpop.f32.mrf.mxu1  ;;  %4338 = vmatprep.mubr.msk.f32.mxu0 %vm4461_vm0, %v4460_v0 }
 0x135   :  { %4370 = vmatprep.subr.mxu1 %v3283_v53  ;;  %v3582_v59 = vpop.f32.mrf.mxu0  ;;  %3890 = vmatprep.subr.mxu0 %v3316_v6  ;;  %v3364_v6 = vld [vmem:[%s6522_s3 + $0x850] sm:$0xff] }
 0x136   :  { %4339 = vmatmul.mubr.f32.gmra.mxu0 %v5346_v5  ;;  %4371 = vmatpush3.msra.mxu1 %v3283_v53  ;;  %v3298_v5 = vld [vmem:[%s6522_s3 + $0x708] sm:$0xff]  ;;  %v3380_v53 = vld [vmem:[%s6522_s3 + $0x8d0] sm:$0xff] }
 0x137   :  { %3891 = vmatpush3.msra.mxu0 %v3300_v63  ;;  %v3583_v1 = vpop.f32.mrf.mxu0  ;;  %4372 = vmatprep.subr.mxu1 %v3282_v13  ;;  %v716_v17 = vpop.f32.mrf.mxu1  ;;  %v3379_v63 = vld [vmem:[%s6522_s3 + $0x8c8] sm:$0xff] }
 0x138   :  { %3892 = vmatprep.subr.mxu0 %v3315_v20  ;;  %v6057_v9 = vadd.f32 %v3583_v1, %v3582_v59  ;;  %4373 = vmatpush3.msra.mxu1 %v3282_v13  ;;  %v3346_v13 = vld [vmem:[%s6521_s2 + $0x440] sm:$0xff]  ;;  %v3363_v59 = vld [vmem:[%s6522_s3 + $0x848] sm:$0xff] }
 0x139   :  { %3893 = vmatpush3.msra.mxu0 %v3299_v61  ;;  %4341 = vmatprep.mubr.msk.f32.mxu0 %vm4461_vm0, %v4460_v0  ;;  %v4107_v10 = vpop.f32.mrf.mxu1  ;;  %v6183_v61 = vld [vmem:[%s6523_s0 + $0x68] sm:$0xff]  ;;  %v3378_v1 = vld [vmem:[%s6522_s3 + $0x8c0] sm:$0xff] }
 0x13a   :  { %4374 = vmatprep.subr.mxu1 %v3281_v36  ;;  %v868_v7 = vadd.f32 %v6057_v9, %v716_v17  ;;  %v867_v11 = vadd.f32 %v6057_v9, %v711_v57  ;;  %3894 = vmatprep.subr.mxu0 %v3314_v3  ;;  %v3347_v57 = vld [vmem:[%s6521_s2 + $0x448] sm:$0xff]  ;;  %v3345_v17 = vld [vmem:[%s6521_s2 + $0x438] sm:$0xff] }
 0x13b   :  { %4342 = vmatmul.mubr.f32.gmra.mxu0 %v4457_v12  ;;  %4375 = vmatpush3.msra.mxu1 %v3281_v36  ;;  %v3377_v10 = vld [vmem:[%s6522_s3 + $0x8b8] sm:$0xff]  ;;  %v3344_v12 = vld [vmem:[%s6521_s2 + $0x430] sm:$0xff] }
 0x13c   :  { %4376 = vmatprep.mubr.f32.mxu1 %v5476_v50  ;;  %v6080_v31 = vadd.f32 %v868_v7, %v5894_v8  ;;  %v6083_v22 = vadd.f32 %v867_v11, %v5874_v37  ;;  %3895 = vmatpush3.msra.mxu0 %v3298_v5  ;;  %v721_v24 = vpop.f32.mrf.mxu1  ;;  %v3385_v50 = vld [vmem:[%s6522_s3 + $0x8f8] sm:$0xff]  ;;  %v3352_v37 = vld [vmem:[%s6521_s2 + $0x470] sm:$0xff]  ;;  %v3362_v5 = vld [vmem:[%s6522_s3 + $0x840] sm:$0xff] }
 0x13d   :  { %4377 = vmatmul.mubr.f32.vlgmr.msra.gmra.mxu1 %v5484_v51  ;;  %3896 = vmatprep.subr.mxu0 %v3313_v16  ;;  %v869_v25 = vadd.f32 %v6057_v9, %v721_v24  ;;  %v3369_v51 = vld [vmem:[%s6522_s3 + $0x878] sm:$0xff]  ;;  %v6207_v11 = vld [vmem:[%s6523_s0 + $0x70] sm:$0xff] }
 0x13e   :  { %4394 = vmatprep.subr.mxu1 %v4460_v0  ;;  %3897 = vmatpush3.msra.mxu0 %v3297_v19  ;;  %v4110_v8 = vpop.f32.mrf.mxu1  ;;  %v3361_v19 = vld [vmem:[%s6522_s3 + $0x838] sm:$0xff] }
 0x13f   :  { %4395 = vmatpush3.msra.mxu1 %v3353_v18  ;;  %2377 = vmatprep.mubr.f32.mxu0 %v5436_v38  ;;  %v6100_v28 = vadd.f32 %v869_v25, %v5883_v46  ;;  %v3351_v38 = vld [vmem:[%s6521_s2 + $0x468] sm:$0xff]  ;;  %v3368_v46 = vld [vmem:[%s6522_s3 + $0x870] sm:$0xff] }
 0x140   :  { %4396 = vmatprep.subr.mxu1 %v4460_v0  ;;  %3926 = vmatprep.subr.mxu0 %v3385_v50  ;;  %v3376_v18 = vld [vmem:[%s6522_s3 + $0x8b0] sm:$0xff] }
 0x141   :  { %4379 = vmatprep.mubr.f32.mxu1 %v5506_v54  ;;  %v726_v33 = vpop.f32.mrf.mxu1  ;;  %2378 = vmatmul.mubr.f32.vlgmr.msra.gmra.mxu0 %v5450_v42  ;;  %v3383_v54 = vld [vmem:[%s6522_s3 + $0x8e8] sm:$0xff]  ;;  %v3350_v42 = vld [vmem:[%s6521_s2 + $0x460] sm:$0xff]  ;;  %v3360_v50 = vld [vmem:[%s6522_s3 + $0x830] sm:$0xff] }
 0x142   :  { %4397 = vmatpush3.msra.mxu1 %v3352_v37  ;;  %v870_v35 = vadd.f32 %v6057_v9, %v726_v33  ;;  %3927 = vmatpush3.msra.mxu0 %v3369_v51  ;;  %v3375_v37 = vld [vmem:[%s6522_s3 + $0x8a8] sm:$0xff]  ;;  %v3342_v51 = vld [vmem:[%s6521_s2 + $0x420] sm:$0xff] }
 0x143   :  { %4380 = vmatmul.mubr.f32.gmra.mxu1 %v5696_v34  ;;  %v4113_v39 = vpop.f32.mrf.mxu1  ;;  %4398 = vmatprep.subr.mxu1 %v4460_v0 }
 0x144   :  { %3928 = vmatprep.subr.mxu0 %v3384_v29  ;;  %v6123_v58 = vadd.f32 %v870_v35, %v5903_v49  ;;  %4399 = vmatpush3.msra.mxu1 %v3351_v38  ;;  %v3349_v49 = vld [vmem:[%s6521_s2 + $0x458] sm:$0xff]  ;;  %v3359_v29 = vld [vmem:[%s6522_s3 + $0x828] sm:$0xff]  ;;  %v3340_v39 = vld [vmem:[%s6521_s2 + $0x410] sm:$0xff] }
 0x145   :  { %3929 = vmatpush3.msra.mxu0 %v3368_v46  ;;  %4400 = vmatprep.subr.mxu1 %v4460_v0  ;;  %v3341_v38 = vld [vmem:[%s6521_s2 + $0x418] sm:$0xff]  ;;  %v3358_v46 = vld [vmem:[%s6522_s3 + $0x820] sm:$0xff] }
 0x146   :  { %3930 = vmatprep.subr.mxu0 %v3383_v54  ;;  %4382 = vmatprep.mubr.f32.mxu1 %v5531_v60  ;;  %v731_v62 = vpop.f32.mrf.mxu1  ;;  %v3348_v60 = vld [vmem:[%s6521_s2 + $0x450] sm:$0xff] }
 0x147   :  { %4401 = vmatpush3.msra.mxu1 %v3350_v42  ;;  %3931 = vmatpush3.msra.mxu0 %v3367_v21  ;;  %v871_v44 = vadd.f32 %v6057_v9, %v731_v62  ;;  %v3357_v42 = vld [vmem:[%s6522_s3 + $0x818] sm:$0xff]  ;;  %v3356_v62 = vld [vmem:[%s6522_s3 + $0x810] sm:$0xff] }
 0x148   :  { %4383 = vmatmul.mubr.f32.gmra.mxu1 %v5539_v4  ;;  %4402 = vmatprep.subr.mxu1 %v4460_v0  ;;  %v4116_v40 = vpop.f32.mrf.mxu1  ;;  %v3365_v4 = vld [vmem:[%s6522_s3 + $0x858] sm:$0xff] }
 0x149   :  { %3932 = vmatprep.subr.mxu0 %v3382_v52  ;;  %4403 = vmatpush3.msra.mxu1 %v3349_v49  ;;  %v6152_v45 = vadd.f32 %v871_v44, %v5900_v47  ;;  %v3372_v52 = vld [vmem:[%s6522_s3 + $0x890] sm:$0xff]  ;;  %v3338_v44 = vld [vmem:[%s6521_s2 + $0x400] sm:$0xff]  ;;  %v3355_v40 = vld [vmem:[%s6522_s3 + $0x808] sm:$0xff] }
 0x14a   :  { %3933 = vmatpush3.msra.mxu0 %v3366_v48  ;;  %4404 = vmatprep.subr.mxu1 %v4460_v0  ;;  %v3339_v48 = vld [vmem:[%s6521_s2 + $0x408] sm:$0xff] }
 0x14b   :  { %3934 = vmatprep.subr.mxu0 %v3381_v32  ;;  %4385 = vmatprep.mubr.f32.mxu1 %v5561_v41  ;;  %v736_v47 = vpop.f32.mrf.mxu1  ;;  %v3277_v41 = vld [vmem:[%s6523_s0 + $0x60] sm:$0xff] }
 0x14c   :  { %4405 = vmatpush3.msra.mxu1 %v3348_v60  ;;  %3935 = vmatpush3.msra.mxu0 %v3365_v4  ;;  %v872_v56 = vadd.f32 %v6057_v9, %v736_v47  ;;  %v3329_v4 = vld [vmem:[%s6523_s0 + $0x28] sm:$0xff] }
 0x14d   :  { %4386 = vmatmul.mubr.f32.gmra.mxu1 %v5744_v23  ;;  %4406 = vmatprep.subr.mxu1 %v4460_v0  ;;  %v4119_v20 = vpop.f32.mrf.mxu1 }
 0x14e   :  { %3936 = vmatprep.subr.mxu0 %v3380_v53  ;;  %4407 = vmatpush3.msra.mxu1 %v3347_v57  ;;  %v6186_v36 = vadd.f32 %v872_v56, %v5938_v2  ;;  %v3370_v53 = vld [vmem:[%s6522_s3 + $0x880] sm:$0xff]  ;;  %v4458_v56 = vld [vmem:[%s6524_s1 + $0x8] sm:$0xff] }
 0x14f   :  { %3937 = vmatpush3.msra.mxu0 %v3364_v6  ;;  %4408 = vmatprep.subr.mxu1 %v4460_v0  ;;  %v741_v3 = vpop.f32.mrf.mxu1  ;;  %v3354_v6 = vld [vmem:[%s6522_s3 + $0x800] sm:$0xff] }
 0x150   :  { %3938 = vmatprep.subr.mxu0 %v3379_v63  ;;  %4388 = vmatprep.mubr.f32.mxu1 %v3277_v41  ;;  %v873_v2 = vadd.f32 %v6057_v9, %v741_v3  ;;  %v3330_v41 = vld [vmem:[%s6523_s0 + $0x30] sm:$0xff] }
 0x151   :  { %4409 = vmatpush3.msra.mxu1 %v3346_v13  ;;  %3939 = vmatpush3.msra.mxu0 %v3363_v59  ;;  %v4122_v7 = vpop.f32.mrf.mxu1  ;;  %v4459_v59 = vld [vmem:[%s6524_s1] sm:$0xff] }
 0x152   :  { %4389 = vmatmul.mubr.f32.gmra.mxu1 %v6183_v61  ;;  %4410 = vmatprep.subr.mxu1 %v4460_v0  ;;  %v6213_v16 = vadd.f32 %v873_v2, %v5960_v15  ;;  %v3343_v15 = vld [vmem:[%s6521_s2 + $0x428] sm:$0xff] }
 0x153   :  { %3940 = vmatprep.subr.mxu0 %v3378_v1  ;;  %4411 = vmatpush3.msra.mxu1 %v3345_v17 }
 0x154   :  { %3941 = vmatpush3.msra.mxu0 %v3362_v5  ;;  %4412 = vmatprep.subr.mxu1 %v4460_v0  ;;  %v746_v24 = vpop.f32.mrf.mxu1 }
 0x155   :  { %3942 = vmatprep.subr.mxu0 %v3377_v10  ;;  %4391 = vmatprep.mubr.f32.mxu1 %v6207_v11  ;;  %v874_v25 = vadd.f32 %v6057_v9, %v746_v24 }
 0x156   :  { %4413 = vmatpush3.msra.mxu1 %v3344_v12  ;;  %3943 = vmatpush3.msra.mxu0 %v3361_v19  ;;  %v4125_v8 = vpop.f32.mrf.mxu1 }
 0x157   :  { %4392 = vmatmul.mubr.f32.gmra.mxu1 %v5609_v26  ;;  %4414 = vmatprep.subr.mxu1 %v4460_v0  ;;  %v6242_v33 = vadd.f32 %v874_v25, %v5957_v14  ;;  %v3374_v26 = vld [vmem:[%s6522_s3 + $0x8a0] sm:$0xff]  ;;  %v3373_v14 = vld [vmem:[%s6522_s3 + $0x898] sm:$0xff] }
 0x158   :  { %3944 = vmatprep.subr.mxu0 %v3376_v18  ;;  %4415 = vmatpush3.msra.mxu1 %v3343_v15 }
 0x159   :  { %3945 = vmatpush3.msra.mxu0 %v3360_v50  ;;  %4416 = vmatprep.subr.mxu1 %v4460_v0  ;;  %v751_v35 = vpop.f32.mrf.mxu1 }
 0x15a   :  { %3946 = vmatprep.subr.mxu0 %v3375_v37  ;;  %4417 = vmatpush3.msra.mxu1 %v3342_v51  ;;  %v875_v54 = vadd.f32 %v6057_v9, %v751_v35 }
 0x15b   :  { %3947 = vmatpush3.msra.mxu0 %v3359_v29  ;;  %4418 = vmatprep.subr.mxu1 %v4460_v0  ;;  %v4128_v21 = vpop.f32.mrf.mxu1 }
 0x15c   :  { %3948 = vmatprep.subr.mxu0 %v3374_v26  ;;  %4419 = vmatpush3.msra.mxu1 %v3341_v38  ;;  %v6269_v9 = vadd.f32 %v875_v54, %v5995_v43  ;;  %v6271_v49 = vpop.f32.mrf.mxu0  ;;  %v3371_v43 = vld [vmem:[%s6522_s3 + $0x888] sm:$0xff] }
 0x15d   :  { %3949 = vmatpush3.msra.mxu0 %v3358_v46  ;;  %4420 = vmatprep.subr.mxu1 %v4460_v0 }
 0x15e   :  { %3950 = vmatprep.subr.mxu0 %v3373_v14  ;;  %4421 = vmatpush3.msra.mxu1 %v3340_v39  ;;  %v6283_v32 = vpop.f32.mrf.mxu0 }
 0x15f   :  { %3951 = vmatpush3.msra.mxu0 %v3357_v42  ;;  %4422 = vmatprep.subr.mxu1 %v4460_v0  ;;  %v3645_v60 = vpop.f32.mrf.mxu1 }
 0x160   :  { %3952 = vmatprep.subr.mxu0 %v3372_v52  ;;  %4423 = vmatpush3.msra.mxu1 %v3339_v48 }
 0x161   :  { %3953 = vmatpush3.msra.mxu0 %v3356_v62  ;;  %4424 = vmatprep.subr.mxu1 %v4460_v0  ;;  %v3646_v57 = vpop.f32.mrf.mxu1 }
 0x162   :  { %3954 = vmatprep.subr.mxu0 %v3371_v43  ;;  %4425 = vmatpush3.msra.mxu1 %v3338_v44  ;;  %v4166_v47 = vpop.f32.mrf.mxu0  ;;  %v6304_v63 = vadd.f32 %v3646_v57, %v3645_v60 }
 0x163   :  { %4426 = vmatprep.mubr.msk.f32.mxu1 %vm4461_vm0, %v4460_v0  ;;  %3955 = vmatpush3.msra.mxu0 %v3355_v40 }
 0x164   :  { %4427 = vmatmul.mubr.f32.vlgmr.msra.gmra.mxu1 %v3329_v4  ;;  %3956 = vmatprep.subr.mxu0 %v3370_v53  ;;  %v999_v13 = vpop.f32.mrf.mxu0  ;;  %v1167_v20 = vadd.f32 %v4166_v47, %v6304_v63  ;;  %v1165_v52 = vadd.f32 %v6271_v49, %v6304_v63 }
 0x165   :  { %2665 = vmatprep.mubr.f32.mxu0 %v4458_v56  ;;  %3957 = vmatpush3.msra.mxu0 %v3354_v6  ;;  %v1166_v54 = vadd.f32 %v6304_v63, %v999_v13 }
 0x166   :  { %4429 = vmatprep.mubr.msk.f32.mxu1 %vm4461_vm0, %v4460_v0  ;;  %2666 = vmatmul.mubr.f32.vlgmr.msra.gmra.mxu0 %v4459_v59  ;;  %v1179_v1 = vadd.f32 %v1167_v20, %v6080_v31  ;;  %v3332_v31 = vld [vmem:[%s6523_s0 + $0x48] sm:$0xff] }
 0x167   :  { %v4169_v3 = vpop.f32.mrf.mxu0 }
 0x168   :  { %4430 = vmatmul.mubr.f32.gmra.mxu1 %v3330_v41  ;;  %v1169_v17 = vadd.f32 %v4169_v3, %v6304_v63 }
 0x169   :  { %4432 = vmatprep.mubr.msk.f32.mxu1 %vm4461_vm0, %v4460_v0  ;;  %v1009_v5 = vpop.f32.mrf.mxu0 }
 0x16a   :  { %v1181_v2 = vadd.f32 %v1169_v17, %v5887_v55  ;;  %v1168_v10 = vadd.f32 %v6304_v63, %v1009_v5 }
 0x16c   :  { %4433 = vmatmul.mubr.f32.gmra.mxu1 %v5696_v34  ;;  %v1180_v7 = vadd.f32 %v1168_v10, %v6100_v28  ;;  %v4172_v12 = vpop.f32.mrf.mxu0  ;;  %v3333_v34 = vld [vmem:[%s6523_s0 + $0x50] sm:$0xff] }
 0x16d   :  { %4435 = vmatprep.mubr.msk.f32.mxu1 %vm4461_vm0, %v4460_v0  ;;  %v1171_v19 = vadd.f32 %v4172_v12, %v6304_v63 }
 0x16e   :  { %v1019_v18 = vpop.f32.mrf.mxu0 }
 0x16f   :  { %v6333_v55 = vadd.f32 %v1171_v19, %v6186_v36  ;;  %v1170_v24 = vadd.f32 %v6304_v63, %v1019_v18 }
 0x170   :  { %4436 = vmatmul.mubr.f32.gmra.mxu1 %v3332_v31 }
 0x171   :  { %4438 = vmatprep.mubr.msk.f32.mxu1 %vm4461_vm0, %v4460_v0  ;;  %v1182_v15 = vadd.f32 %v1170_v24, %v6152_v45  ;;  %v4175_v28 = vpop.f32.mrf.mxu0 }
 0x172   :  { %v1173_v50 = vadd.f32 %v4175_v28, %v6304_v63 }
 0x173   :  { %v1029_v25 = vpop.f32.mrf.mxu0 }
 0x174   :  { %4439 = vmatmul.mubr.f32.gmra.mxu1 %v3333_v34  ;;  %v1185_v36 = vadd.f32 %v1173_v50, %v6242_v33  ;;  %v1172_v37 = vadd.f32 %v6304_v63, %v1029_v25 }
 0x175   :  { %4441 = vmatprep.mubr.msk.f32.mxu1 %vm4461_vm0, %v4460_v0 }
 0x176   :  { %v1184_v8 = vadd.f32 %v1172_v37, %v5928_v27  ;;  %v4178_v51 = vpop.f32.mrf.mxu0 }
 0x177   :  { %v1175_v29 = vadd.f32 %v4178_v51, %v6304_v63 }
 0x178   :  { %4442 = vmatmul.mubr.f32.gmra.mxu1 %v5744_v23  ;;  %v1039_v45 = vpop.f32.mrf.mxu0  ;;  %v3337_v23 = vld [vmem:[%s6523_s0 + $0x78] sm:$0xff] }
 0x179   :  { %4444 = vmatprep.mubr.msk.f32.mxu1 %vm4461_vm0, %v4460_v0  ;;  %v1187_v26 = vadd.f32 %v1175_v29, %v5985_v30  ;;  %v1174_v38 = vadd.f32 %v6304_v63, %v1039_v45 }
 0x17b   :  { %v1186_v33 = vadd.f32 %v1174_v38, %v6269_v9 }
 0x17c   :  { %4445 = vmatmul.mubr.f32.gmra.mxu1 %v6183_v61 }
 0x17d   :  { %4447 = vmatprep.mubr.msk.f32.mxu1 %vm4461_vm0, %v4460_v0 }
 0x180   :  { %4448 = vmatmul.mubr.f32.gmra.mxu1 %v6207_v11  ;;  %v1164_v11 = vadd.f32 %v6304_v63, %v6283_v32 }
 0x181   :  { %4450 = vmatprep.mubr.msk.f32.mxu1 %vm4461_vm0, %v4460_v0 }
 0x183   :  { %v4213_v27 = vpop.f32.mrf.mxu0 }
 0x184   :  { %4451 = vmatmul.mubr.f32.gmra.mxu1 %v3337_v23 }
 0x185   :  { %v3712_v30 = vpop.f32.mrf.mxu1  ;;  %v1299_v46 = vpop.f32.mrf.mxu0 }
 0x187   :  { %v3713_v35 = vpop.f32.mrf.mxu1 }
 0x188   :  { %v3714_v61 = vadd.f32 %v3713_v35, %v3712_v30 }
 0x189   :  { %v4216_v14 = vpop.f32.mrf.mxu0 }
 0x18a   :  { %v1500_v39 = vadd.f32 %v4216_v14, %v3714_v61  ;;  %v1498_v42 = vadd.f32 %v4213_v27, %v3714_v61  ;;  %v1497_v23 = vadd.f32 %v3714_v61, %v1299_v46 }
 0x18b   :  { %v1309_v21 = vpop.f32.mrf.mxu0 }
 0x18c   :  { %v6367_v0 = vadd.f32 %v1500_v39, %v1166_v54  ;;  %v1499_v9 = vadd.f32 %v3714_v61, %v1309_v21  ;;  %v1514_v48 = vadd.f32 %v1498_v42, %v1164_v11 }
 0x18e   :  { %v1515_v62 = vadd.f32 %v1499_v9, %v1165_v52  ;;  %v4219_v43 = vpop.f32.mrf.mxu0 }
 0x18f   :  { %v1502_v44 = vadd.f32 %v4219_v43, %v3714_v61 }
 0x190   :  { %v1319_v60 = vpop.f32.mrf.mxu0 }
 0x191   :  { %v1518_v40 = vadd.f32 %v1502_v44, %v1179_v1  ;;  %v1501_v4 = vadd.f32 %v3714_v61, %v1319_v60 }
 0x193   :  { %v1517_v53 = vadd.f32 %v1501_v4, %v6083_v22  ;;  %v4222_v57 = vpop.f32.mrf.mxu0 }
 0x194   :  { %v1504_v6 = vadd.f32 %v4222_v57, %v3714_v61 }
 0x195   :  { %v1329_v32 = vpop.f32.mrf.mxu0 }
 0x196   :  { %v6372_v47 = vadd.f32 %v1504_v6, %v1181_v2  ;;  %v1503_v56 = vadd.f32 %v3714_v61, %v1329_v32 }
 0x198   :  { %v1519_v41 = vadd.f32 %v1503_v56, %v1180_v7  ;;  %v4225_v13 = vpop.f32.mrf.mxu0 }
 0x199   :  { %v1506_v20 = vadd.f32 %v4225_v13, %v3714_v61 }
 0x19a   :  { %v1339_v49 = vpop.f32.mrf.mxu0 }
 0x19b   :  { %v1522_v63 = vadd.f32 %v1506_v20, %v1182_v15  ;;  %v1505_v59 = vadd.f32 %v3714_v61, %v1339_v49 }
 0x19d   :  { %v1521_v3 = vadd.f32 %v1505_v59, %v6123_v58  ;;  %v4228_v17 = vpop.f32.mrf.mxu0 }
 0x19e   :  { %v1508_v5 = vadd.f32 %v4228_v17, %v3714_v61 }
 0x19f   :  { %v1349_v1 = vpop.f32.mrf.mxu0 }
 0x1a0   :  { %v6375_v10 = vadd.f32 %v1508_v5, %v1184_v8  ;;  %v1507_v22 = vadd.f32 %v3714_v61, %v1349_v1 }
 0x1a2   :  { %v1523_v31 = vadd.f32 %v1507_v22, %v6333_v55  ;;  %v4231_v12 = vpop.f32.mrf.mxu0 }
 0x1a3   :  { %v1510_v2 = vadd.f32 %v4231_v12, %v3714_v61 }
 0x1a4   :  { %v1359_v19 = vpop.f32.mrf.mxu0 }
 0x1a5   :  { %v1526_v18 = vadd.f32 %v1510_v2, %v1185_v36  ;;  %v1509_v7 = vadd.f32 %v3714_v61, %v1359_v19 }
 0x1a7   :  { %v1525_v24 = vadd.f32 %v1509_v7, %v6213_v16  ;;  %v4234_v34 = vpop.f32.mrf.mxu0 }
 0x1a8   :  { %v1512_v15 = vadd.f32 %v4234_v34, %v3714_v61 }
 0x1a9   :  { %v1369_v28 = vpop.f32.mrf.mxu0 }
 0x1aa   :  { %v6379_v50 = vadd.f32 %v1512_v15, %v1187_v26  ;;  %v1511_v58 = vadd.f32 %v3714_v61, %v1369_v28 }
 0x1ac   :  { %v1527_v25 = vadd.f32 %v1511_v58, %v1186_v33  ;;  %v4269_v37 = vpop.f32.mrf.mxu0  ;;  %vm2738_vm15 = vcmp.ge.f32.partialorder %v6379_v50, 0.0 }
 0x1ae   :  { %v3775_v8 = vpop.f32.mrf.mxu1  ;;  %v1640_v51 = vpop.f32.mrf.mxu0 }
 0x1b0   :  { %v3776_v29 = vpop.f32.mrf.mxu1 }
 0x1b1   :  { %v3777_v45 = vadd.f32 %v3776_v29, %v3775_v8 }
 0x1b2   :  { %v4272_v55 = vpop.f32.mrf.mxu0 }
 0x1b3   :  { %v1817_v38 = vadd.f32 %v4272_v55, %v3777_v45  ;;  %v1814_v27 = vadd.f32 %v3777_v45, %v1640_v51  ;;  %v1815_v36 = vadd.f32 %v4269_v37, %v3777_v45 }
 0x1b4   :  { %v1650_v30 = vpop.f32.mrf.mxu0 }
 0x1b5   :  { %v6381_v35 = vadd.f32 %v1817_v38, %v1517_v53  ;;  %v1816_v16 = vadd.f32 %v3777_v45, %v1650_v30  ;;  %v6383_v14 = vadd.f32 %v1814_v27, %v1497_v23  ;;  %v1827_v26 = vadd.f32 %v1815_v36, %v1514_v48 }
 0x1b7   :  { %v1828_v54 = vadd.f32 %v1816_v16, %v1515_v62  ;;  %v4275_v39 = vpop.f32.mrf.mxu0 }
 0x1b8   :  { %v1819_v33 = vadd.f32 %v4275_v39, %v3777_v45 }
 0x1b9   :  { %v1660_v11 = vpop.f32.mrf.mxu0 }
 0x1ba   :  { %v1831_v42 = vadd.f32 %v1819_v33, %v1519_v41  ;;  %v1818_v21 = vadd.f32 %v3777_v45, %v1660_v11 }
 0x1bc   :  { %v1830_v52 = vadd.f32 %v1818_v21, %v1518_v40  ;;  %v4278_v9 = vpop.f32.mrf.mxu0 }
 0x1bd   :  { %v1821_v43 = vadd.f32 %v4278_v9, %v3777_v45 }
 0x1be   :  { %v1670_v44 = vpop.f32.mrf.mxu0 }
 0x1bf   :  { %v1833_v46 = vadd.f32 %v1821_v43, %v1522_v63  ;;  %v1820_v61 = vadd.f32 %v3777_v45, %v1670_v44 }
 0x1c1   :  { %v6385_v60 = vadd.f32 %v1820_v61, %v1521_v3  ;;  %v4281_v4 = vpop.f32.mrf.mxu0 }
 0x1c2   :  { %v1823_v53 = vadd.f32 %v4281_v4, %v3777_v45 }
 0x1c3   :  { %v1680_v57 = vpop.f32.mrf.mxu0 }
 0x1c4   :  { %v6387_v6 = vadd.f32 %v1823_v53, %v1525_v24  ;;  %v1822_v48 = vadd.f32 %v3777_v45, %v1680_v57 }
 0x1c6   :  { %v1834_v62 = vadd.f32 %v1822_v48, %v1523_v31  ;;  %v4284_v32 = vpop.f32.mrf.mxu0  ;;  %vm2735_vm14 = vcmp.ge.f32.partialorder %v6387_v6, 0.0 }
 0x1c7   :  { %v1825_v56 = vadd.f32 %v4284_v32, %v3777_v45 }
 0x1c8   :  { %v1690_v13 = vpop.f32.mrf.mxu0 }
 0x1c9   :  { %v6389_v41 = vadd.f32 %v1825_v56, %v1527_v25  ;;  %v1824_v40 = vadd.f32 %v3777_v45, %v1690_v13 }
 0x1cb   :  { %v6391_v20 = vadd.f32 %v1824_v40, %v1526_v18  ;;  %vm2737_vm0 = vcmp.ge.f32.partialorder %v6389_v41, 0.0 }
 0x1cd   :  { %vm2736_vm13 = vcmp.ge.f32.partialorder %v6391_v20, 0.0 }
 0x1d3   :  { %v1943_v49 = vpop.f32.mrf.mxu0 }
 0x1d5   :  { %v3835_v63 = vpop.f32.mrf.mxu1  ;;  %v4319_v59 = vpop.f32.mrf.mxu0 }
 0x1d7   :  { %v3836_v3 = vpop.f32.mrf.mxu1 }
 0x1d8   :  { %v1948_v17 = vpop.f32.mrf.mxu0  ;;  %v3837_v5 = vadd.f32 %v3836_v3, %v3835_v63 }
 0x1da   :  { %v4322_v1 = vpop.f32.mrf.mxu0  ;;  %v2100_v22 = vadd.f32 %v3837_v5, %v1948_v17  ;;  %v2099_v12 = vadd.f32 %v3837_v5, %v1943_v49 }
 0x1dc   :  { %v6393_v2 = vadd.f32 %v2100_v22, %v1828_v54  ;;  %v2108_v19 = vadd.f32 %v2099_v12, %v1827_v26 }
 0x1dd   :  { %v1953_v31 = vpop.f32.mrf.mxu0 }
 0x1de   :  { %v2101_v7 = vadd.f32 %v3837_v5, %v1953_v31 }
 0x1df   :  { %v4325_v24 = vpop.f32.mrf.mxu0 }
 0x1e0   :  { %v2110_v34 = vadd.f32 %v2101_v7, %v6367_v0 }
 0x1e2   :  { %v1958_v15 = vpop.f32.mrf.mxu0 }
 0x1e3   :  { %v2102_v18 = vadd.f32 %v3837_v5, %v1958_v15 }
 0x1e4   :  { %v4328_v28 = vpop.f32.mrf.mxu0 }
 0x1e5   :  { %v6396_v58 = vadd.f32 %v2102_v18, %v1830_v52 }
 0x1e7   :  { %v1963_v25 = vpop.f32.mrf.mxu0 }
 0x1e8   :  { %v2103_v37 = vadd.f32 %v3837_v5, %v1963_v25 }
 0x1e9   :  { %v4331_v8 = vpop.f32.mrf.mxu0 }
 0x1ea   :  { %v6398_v51 = vadd.f32 %v2103_v37, %v1831_v42 }
 0x1ec   :  { %v1968_v29 = vpop.f32.mrf.mxu0 }
 0x1ed   :  { %v2104_v45 = vadd.f32 %v3837_v5, %v1968_v29 }
 0x1ee   :  { %v4334_v55 = vpop.f32.mrf.mxu0 }
 0x1ef   :  { %v6401_v38 = vadd.f32 %v2104_v45, %v6372_v47 }
 0x1f1   :  { %v1973_v23 = vpop.f32.mrf.mxu0 }
 0x1f2   :  { %v2105_v27 = vadd.f32 %v3837_v5, %v1973_v23 }
 0x1f3   :  { %v4337_v36 = vpop.f32.mrf.mxu0 }
 0x1f4   :  { %v6403_v0 = vadd.f32 %v2105_v27, %v1833_v46 }
 0x1f6   :  { %v1978_v30 = vpop.f32.mrf.mxu0 }
 0x1f7   :  { %v2106_v16 = vadd.f32 %v3837_v5, %v1978_v30 }
 0x1f8   :  { %v4340_v26 = vpop.f32.mrf.mxu0 }
 0x1f9   :  { %v6405_v54 = vadd.f32 %v2106_v16, %v1834_v62 }
 0x1fb   :  { %v1983_v39 = vpop.f32.mrf.mxu0 }
 0x1fc   :  { %v2107_v33 = vadd.f32 %v3837_v5, %v1983_v39 }
 0x1fd   :  { %v4378_v11 = vpop.f32.mrf.mxu1  ;;  %v4343_v42 = vpop.f32.mrf.mxu0 }
 0x1fe   :  { %v6408_v21 = vadd.f32 %v2107_v33, %v6375_v10 }
 0x1ff   :  { %v2221_v52 = vpop.f32.mrf.mxu1 }
 0x201   :  { %v3898_v57 = vpop.f32.mrf.mxu0 }
 0x203   :  { %v4381_v47 = vpop.f32.mrf.mxu1  ;;  %v3899_v62 = vpop.f32.mrf.mxu0 }
 0x204   :  { %v6418_v56 = vadd.f32 %v3899_v62, %v3898_v57  ;;  %v3387_v62 = vld [vmem:[%s6525_s4 + $0x1] ss:$0 sm:$0xff] }
 0x205   :  { %v2231_v9 = vpop.f32.mrf.mxu1 }
 0x206   :  { %v2398_v49 = vadd.f32 %v4381_v47, %v6418_v56  ;;  %v2395_v59 = vadd.f32 %v6418_v56, %v2221_v52  ;;  %v2396_v3 = vadd.f32 %v4378_v11, %v6418_v56  ;;  %v2397_v17 = vadd.f32 %v6418_v56, %v2231_v9 }
 0x208   :  { %v4384_v43 = vpop.f32.mrf.mxu1  ;;  %v2410_v31 = vadd.f32 %v2398_v49, %v2110_v34  ;;  %v2407_v24 = vadd.f32 %v2395_v59, %v6383_v14  ;;  %v2408_v18 = vadd.f32 %v2396_v3, %v2108_v19  ;;  %v2409_v25 = vadd.f32 %v2397_v17, %v6393_v2  ;;  %v3386_v14 = vld [vmem:[%s6525_s4] ss:$0 sm:$0xff] }
 0x209   :  { %v2400_v8 = vadd.f32 %v4384_v43, %v6418_v56 }
 0x20a   :  { %v2241_v44 = vpop.f32.mrf.mxu1  ;;  %vm2726_vm1 = vcmp.ge.f32.partialorder %v2410_v31, 0.0  ;;  %v2742_v19 = vmul.f32 0.2, %v2410_v31 }
 0x20b   :  { %v2399_v12 = vadd.f32 %v6418_v56, %v2241_v44 }
 0x20c   :  { %v2758_v47 = vsel %vm2726_vm1, %v2410_v31, %v2742_v19 }
 0x20d   :  { %v4387_v61 = vpop.f32.mrf.mxu1  ;;  %v2411_v23 = vadd.f32 %v2399_v12, %v6381_v35  ;;  %v3388_v35 = vld [vmem:[%s6525_s4 + $0x2] ss:$0 sm:$0xff] }
 0x20e   :  { %v2402_v27 = vadd.f32 %v4387_v61, %v6418_v56 }
 0x20f   :  { %v2251_v46 = vpop.f32.mrf.mxu1 }
 0x210   :  { %v2414_v9 = vadd.f32 %v2402_v27, %v6401_v38  ;;  %v2401_v43 = vadd.f32 %v6418_v56, %v2251_v46 }
 0x212   :  { %v6410_v4 = vpop.f32.mrf.mxu1  ;;  %v2413_v3 = vadd.f32 %v2401_v43, %v6398_v51  ;;  %v2746_v12 = vmul.f32 0.2, %v2414_v9  ;;  %vm2730_vm7 = vcmp.ge.f32.partialorder %v2414_v9, 0.0 }
 0x214   :  { %v6412_v53 = vpop.f32.mrf.mxu1 }
 0x215   :  { %v2403_v17 = vadd.f32 %v6418_v56, %v6412_v53 }
 0x217   :  { %v6414_v48 = vpop.f32.mrf.mxu1 }
 0x219   :  { %v6416_v32 = vpop.f32.mrf.mxu1 }
 0x224   :  { %v2524_v10 = vpop.f32.mrf.mxu1 }
 0x226   :  { %v4428_v13 = vpop.f32.mrf.mxu1  ;;  %v3958_v40 = vpop.f32.mrf.mxu0 }
 0x227   :  { %v2412_v13 = vadd.f32 %v2400_v8, %v6396_v58  ;;  %v3390_v58 = vld [vmem:[%s6525_s4 + $0x4] ss:$0 sm:$0xff] }
 0x228   :  { %v2529_v63 = vpop.f32.mrf.mxu1  ;;  %v3959_v5 = vpop.f32.mrf.mxu0 }
 0x229   :  { %v6424_v1 = vadd.f32 %v3959_v5, %v3958_v40 }
 0x22a   :  { %v4431_v22 = vpop.f32.mrf.mxu1 }
 0x22b   :  { %v2680_v15 = vadd.f32 %v6424_v1, %v2524_v10  ;;  %v2681_v28 = vadd.f32 %v6424_v1, %v2529_v63  ;;  %v3389_v10 = vld [vmem:[%s6525_s4 + $0x3] ss:$0 sm:$0xff] }
 0x22c   :  { %v2534_v7 = vpop.f32.mrf.mxu1  ;;  %v2886_v59 = vmul.f32 %v3389_v10, %v2758_v47  ;;  %v2751_v10 = vmul.f32 0.2, %v6387_v6 }
 0x22d   :  { %v2682_v37 = vadd.f32 %v6424_v1, %v2534_v7  ;;  %v2689_v45 = vadd.f32 %v2680_v15, %v2407_v24  ;;  %v2690_v55 = vadd.f32 %v2681_v28, %v2408_v18  ;;  %v3391_v24 = vld [vmem:[%s6525_s4 + $0x5] ss:$0 sm:$0xff]  ;;  %v2404_v28 = vadd.f32 %v6410_v4, %v6418_v56  ;;  %v3392_v4 = vld [vmem:[%s6525_s4 + $0x6] ss:$0 sm:$0xff] }
 0x22e   :  { %v4434_v29 = vpop.f32.mrf.mxu1 }
 0x22f   :  { %v2691_v34 = vadd.f32 %v2682_v37, %v2409_v25  ;;  %vm2723_vm2 = vcmp.ge.f32.partialorder %v2689_v45, 0.0  ;;  %v2739_v2 = vmul.f32 0.2, %v2689_v45  ;;  %v2740_v30 = vmul.f32 0.2, %v2690_v55 }
 0x230   :  { %v2539_v36 = vpop.f32.mrf.mxu1  ;;  %vm2724_vm4 = vcmp.ge.f32.partialorder %v2690_v55, 0.0  ;;  %v2415_v25 = vadd.f32 %v2403_v17, %v6385_v60  ;;  %v2762_v29 = vsel %vm2730_vm7, %v2414_v9, %v2746_v12  ;;  %v2416_v27 = vadd.f32 %v2404_v28, %v6403_v0 }
 0x231   :  { %v2683_v16 = vadd.f32 %v6424_v1, %v2539_v36  ;;  %vm2725_vm3 = vcmp.ge.f32.partialorder %v2691_v34, 0.0  ;;  %v2741_v26 = vmul.f32 0.2, %v2691_v34  ;;  %v2755_v33 = vsel %vm2723_vm2, %v2689_v45, %v2739_v2  ;;  %v3393_v45 = vld [vmem:[%s6525_s4 + $0x7] ss:$0 sm:$0xff] }
 0x232   :  { %v4437_v39 = vpop.f32.mrf.mxu1  ;;  %v2883_v42 = vmul.f32 %v3386_v14, %v2755_v33  ;;  %v2756_v57 = vsel %vm2724_vm4, %v2690_v55, %v2740_v30  ;;  %v2406_v55 = vadd.f32 %v6414_v48, %v6418_v56  ;;  %v2405_v36 = vadd.f32 %v6418_v56, %v6416_v32 }
 0x233   :  { %v2692_v11 = vadd.f32 %v2683_v16, %v2411_v23  ;;  %v2757_v52 = vsel %vm2725_vm3, %v2691_v34, %v2741_v26  ;;  %v2884_v63 = vmul.f32 %v3387_v62, %v2756_v57  ;;  %v2890_v48 = vmul.f32 %v3393_v45, %v2762_v29  ;;  %v3394_v39 = vld [vmem:[%s6525_s4 + $0x8] ss:$0 sm:$0xff]  ;;  %v3396_v62 = vld [vmem:[%s6525_s4 + $0xa] ss:$0 sm:$0xff] }
 0x234   :  { %v2544_v44 = vpop.f32.mrf.mxu1  ;;  %v2885_v61 = vmul.f32 %v3388_v35, %v2757_v52  ;;  %2899 = vadd.xlane.f32.xlu0 %v2883_v42  ;;  %v2418_v16 = vadd.f32 %v2406_v55, %v6408_v21  ;;  %v2417_v32 = vadd.f32 %v2405_v36, %v6405_v54  ;;  %v3395_v21 = vld [vmem:[%s6525_s4 + $0x9] ss:$0 sm:$0xff]  ;;  %v3397_v54 = vld [vmem:[%s6525_s4 + $0xb] ss:$0 sm:$0xff]  ;;  %v2767_v17 = vsel %vm2735_vm14, %v6387_v6, %v2751_v10 }
 0x235   :  { %v2684_v40 = vadd.f32 %v6424_v1, %v2544_v44  ;;  %vm2727_vm5 = vcmp.ge.f32.partialorder %v2692_v11, 0.0  ;;  %v2743_v38 = vmul.f32 0.2, %v2692_v11 }
 0x236   :  { %v4440_v49 = vpop.f32.mrf.mxu1  ;;  %2903 = vadd.xlane.f32.xlu1 %v2885_v61  ;;  %v2750_v9 = vmul.f32 0.2, %v2418_v16  ;;  %vm2734_vm11 = vcmp.ge.f32.partialorder %v2418_v16, 0.0 }
 0x237   :  { %v2693_v46 = vadd.f32 %v2684_v40, %v2412_v13  ;;  %v2759_v22 = vsel %vm2727_vm5, %v2692_v11, %v2743_v38  ;;  %v2752_v40 = vmul.f32 0.2, %v6391_v20 }
 0x238   :  { %v2549_v5 = vpop.f32.mrf.mxu1  ;;  %2901 = vadd.xlane.f32.xlu0 %v2884_v63  ;;  %v2887_v15 = vmul.f32 %v3390_v58, %v2759_v22  ;;  %v3398_v63 = vld [vmem:[%s6525_s4 + $0xc] ss:$0 sm:$0xff]  ;;  %v2753_v22 = vmul.f32 0.2, %v6389_v41 }
 0x239   :  { %v2685_v31 = vadd.f32 %v6424_v1, %v2549_v5  ;;  %vm2728_vm6 = vcmp.ge.f32.partialorder %v2693_v46, 0.0  ;;  %v2744_v7 = vmul.f32 0.2, %v2693_v46  ;;  %v2754_v5 = vmul.f32 0.2, %v6379_v50 }
 0x23a   :  { %v4443_v51 = vpop.f32.mrf.mxu1  ;;  %2905 = vadd.xlane.f32.xlu1 %v2886_v59  ;;  %v2768_v59 = vsel %vm2736_vm13, %v6391_v20, %v2752_v40  ;;  %v2895_v12 = vmul.f32 %v3398_v63, %v2767_v17  ;;  %v2769_v6 = vsel %vm2737_vm0, %v6389_v41, %v2753_v22 }
 0x23b   :  { %v2694_v53 = vadd.f32 %v2685_v31, %v2413_v3  ;;  %v2760_v18 = vsel %vm2728_vm6, %v2693_v46, %v2744_v7  ;;  %v3399_v3 = vld [vmem:[%s6525_s4 + $0xd] ss:$0 sm:$0xff]  ;;  %v2770_v20 = vsel %vm2738_vm15, %v6379_v50, %v2754_v5  ;;  %v3401_v31 = vld [vmem:[%s6525_s4 + $0xf] ss:$0 sm:$0xff]  ;;  %v3400_v7 = vld [vmem:[%s6525_s4 + $0xe] ss:$0 sm:$0xff] }
 0x23c   :  { %v2554_v37 = vpop.f32.mrf.mxu1  ;;  %v2888_v8 = vmul.f32 %v3391_v24, %v2760_v18  ;;  %2907 = vadd.xlane.f32.xlu0 %v2887_v15  ;;  %v2896_v58 = vmul.f32 %v3399_v3, %v2768_v59  ;;  %v2898_v24 = vmul.f32 %v3401_v31, %v2770_v20  ;;  %v2897_v51 = vmul.f32 %v3400_v7, %v2769_v6 }
 0x23d   :  { %v2686_v23 = vadd.f32 %v6424_v1, %v2554_v37  ;;  %vm2729_vm8 = vcmp.ge.f32.partialorder %v2694_v53, 0.0  ;;  %v2745_v34 = vmul.f32 0.2, %v2694_v53 }
 0x23e   :  { %v4446_v60 = vpop.f32.mrf.mxu1  ;;  %2909 = vadd.xlane.f32.xlu1 %v2888_v8 }
 0x23f   :  { %v2695_v14 = vadd.f32 %v2686_v23, %v2415_v25  ;;  %v2761_v19 = vsel %vm2729_vm8, %v2694_v53, %v2745_v34 }
 0x240   :  { %v2559_v2 = vpop.f32.mrf.mxu1  ;;  %v2889_v30 = vmul.f32 %v3392_v4, %v2761_v19 }
 0x241   :  { %v2687_v26 = vadd.f32 %v6424_v1, %v2559_v2  ;;  %vm2731_vm9 = vcmp.ge.f32.partialorder %v2695_v14, 0.0  ;;  %v2747_v35 = vmul.f32 0.2, %v2695_v14 }
 0x242   :  { %v4449_v33 = vpop.f32.mrf.mxu1  ;;  %2913 = vadd.xlane.f32.xlu1 %v2890_v48  ;;  %2911 = vadd.xlane.f32.xlu0 %v2889_v30 }
 0x243   :  { %v2696_v0 = vadd.f32 %v2687_v26, %v2416_v27  ;;  %v2763_v11 = vsel %vm2731_vm9, %v2695_v14, %v2747_v35 }
 0x244   :  { %v2564_v56 = vpop.f32.mrf.mxu1  ;;  %v2891_v42 = vmul.f32 %v3394_v39, %v2763_v11 }
 0x245   :  { %v2688_v52 = vadd.f32 %v6424_v1, %v2564_v56  ;;  %vm2732_vm10 = vcmp.ge.f32.partialorder %v2696_v0, 0.0  ;;  %v2748_v47 = vmul.f32 0.2, %v2696_v0  ;;  %v2766_v1 = vsel %vm2734_vm11, %v2418_v16, %v2750_v9 }
 0x246   :  { %v4452_v43 = vpop.f32.mrf.mxu1  ;;  %2915 = vadd.xlane.f32.xlu0 %v2891_v42  ;;  %v2894_v49 = vmul.f32 %v3397_v54, %v2766_v1 }
 0x247   :  { %v2697_v44 = vadd.f32 %v2688_v52, %v2417_v32  ;;  %v2764_v61 = vsel %vm2732_vm10, %v2696_v0, %v2748_v47 }
 0x248   :  { %v2892_v57 = vmul.f32 %v3395_v21, %v2764_v61 }
 0x249   :  { %vm2733_vm12 = vcmp.ge.f32.partialorder %v2697_v44, 0.0  ;;  %v2749_v13 = vmul.f32 0.2, %v2697_v44 }
 0x24a   :  { %2917 = vadd.xlane.f32.xlu1 %v2892_v57 }
 0x24b   :  { %v2765_v38 = vsel %vm2733_vm12, %v2697_v44, %v2749_v13 }
 0x24c   :  { %v2893_v46 = vmul.f32 %v3396_v62, %v2765_v38 }
 0x24e   :  { %2921 = vadd.xlane.f32.xlu1 %v2894_v49  ;;  %2919 = vadd.xlane.f32.xlu0 %v2893_v46 }
 0x252   :  { %2925 = vadd.xlane.f32.xlu1 %v2896_v58  ;;  %2923 = vadd.xlane.f32.xlu0 %v2895_v12 }
 0x256   :  { %2929 = vadd.xlane.f32.xlu1 %v2898_v24  ;;  %2927 = vadd.xlane.f32.xlu0 %v2897_v51 }
 0x2bd   :  { %v2900_v53 = vpop.xlane.xlu0 %2899 }
 0x2bf   :  { %v2904_v15 = vpop.xlane.xlu1 %2903 }
 0x2c1   :  { %v2902_v18 = vpop.xlane.xlu0 %2901 }
 0x2c2   :  { %v2931_v50 = vadd.f32 %v2902_v18, %v2900_v53 }
 0x2c3   :  { %v2906_v28 = vpop.xlane.xlu1 %2905 }
 0x2c4   :  { %v2932_v25 = vadd.f32 %v2931_v50, %v2904_v15 }
 0x2c5   :  { %v2908_v8 = vpop.xlane.xlu0 %2907 }
 0x2c6   :  { %v2933_v37 = vadd.f32 %v2932_v25, %v2906_v28 }
 0x2c7   :  { %v2910_v41 = vpop.xlane.xlu1 %2909 }
 0x2c8   :  { %v2934_v29 = vadd.f32 %v2933_v37, %v2908_v8 }
 0x2ca   :  { %v2935_v45 = vadd.f32 %v2934_v29, %v2910_v41 }
 0x2cb   :  { %v2912_v55 = vpop.xlane.xlu0 %2911  ;;  %v2914_v34 = vpop.xlane.xlu1 %2913 }
 0x2cc   :  { %v2936_v23 = vadd.f32 %v2935_v45, %v2912_v55 }
 0x2ce   :  { %v2937_v4 = vadd.f32 %v2936_v23, %v2914_v34 }
 0x2cf   :  { %v2916_v60 = vpop.xlane.xlu0 %2915 }
 0x2d0   :  { %v2938_v19 = vadd.f32 %v2937_v4, %v2916_v60 }
 0x2d3   :  { %v2918_v14 = vpop.xlane.xlu1 %2917 }
 0x2d4   :  { %v2939_v27 = vadd.f32 %v2938_v19, %v2918_v14 }
 0x2d7   :  { %v2922_v36 = vpop.xlane.xlu1 %2921  ;;  %v2920_v2 = vpop.xlane.xlu0 %2919 }
 0x2d8   :  { %v2940_v48 = vadd.f32 %v2939_v27, %v2920_v2 }
 0x2da   :  { %v2941_v30 = vadd.f32 %v2940_v48, %v2922_v36 }
 0x2db   :  { %v2926_v16 = vpop.xlane.xlu1 %2925  ;;  %v2924_v26 = vpop.xlane.xlu0 %2923 }
 0x2dc   :  { %v2942_v35 = vadd.f32 %v2941_v30, %v2924_v26 }
 0x2de   :  { %v2943_v39 = vadd.f32 %v2942_v35, %v2926_v16 }
 0x2df   :  { %v2928_v33 = vpop.xlane.xlu0 %2927  ;;  %v2930_v11 = vpop.xlane.xlu1 %2929 }
 0x2e0   :  { %v2944_v0 = vadd.f32 %v2943_v39, %v2928_v33 }
 0x2e2   :  { %v2945_v32 = vadd.f32 %v2944_v0, %v2930_v11 }
 0x2e4   :  { %2946 = vst [vmem:[%s6526_s5] sm:$0xff] %v2945_v32 }

</bundles_post_ra>
